<compile_context>
chip_gen: v7x
topology: tpu7x:2x2x1
jax: 0.10.0
libtpu: 0.0.40
codegen_flags: <defaults>
</compile_context>

<pallas_src>
import functools

import jax
import jax.numpy as jnp
from jax import lax
from jax.experimental import pallas as pl
from jax.experimental.pallas import tpu as pltpu

# ----------------------------- configuration ------------------------------
EMBED_DIM = 16           # embed_dim
VISION_W  = 32           # vision_width
CTX_LEN   = 8            # context_length
VOCAB     = 64           # vocab_size
WIDTH     = 32           # transformer_width
HEADS     = 4            # transformer_heads
HEAD_DIM  = WIDTH // HEADS
LAYERS    = 2            # transformer_layers (kept small)
IMG_C, IMG_H, IMG_W = 3, 16, 16
SIAM_HID  = 32           # siamlip_hidden_dim
SIAM_PROJ = 16           # siamlip_proj_dim
LN_EPS    = 1e-5
BN_EPS    = 1e-5


# ------------------------------ kernel helpers ------------------------------
def _ln(x, w, b, eps=LN_EPS):
    # LayerNorm over last dim, fp32 math (matches the fp16-safe LayerNorm).
    mu = jnp.mean(x, axis=-1, keepdims=True)
    var = jnp.mean((x - mu) ** 2, axis=-1, keepdims=True)
    return (x - mu) * lax.rsqrt(var + eps) * w + b


def _mm(a, w):
    # Weights are pre-transposed host-side to (in, out): plain a @ w, MXU f32 acc.
    return jnp.dot(a, w, preferred_element_type=jnp.float32)


def _siamlip_head_math(x, pw1, pb1, pw2, pb2, qw1, qb1, qw2, qb2):
    # projector: Linear(no bias)+foldedBN -> ReLU -> Linear(no bias)+foldedBN(affine=False)
    h = jnp.maximum(_mm(x, pw1) + pb1, 0.0)
    v = _mm(h, pw2) + pb2
    # predictor: Linear(no bias)+foldedBN -> ReLU -> Linear(+bias)
    g = jnp.maximum(_mm(v, qw1) + qb1, 0.0)
    p = _mm(g, qw2) + qb2
    return v, p


# ------------------------------ Pallas kernels ------------------------------
def image_pipeline_kernel(x_ref, vis_w, vis_b, proj_w,
                          pw1, pb1, pw2, pb2, qw1, qb1, qw2, qb2,
                          feats_ref, z_ref, v_ref, p_ref):
    """Whole image pathway (all views): vision stub -> CLIP projector ->
    SIAMLIP projector/predictor, in one single-invocation kernel."""
    x = x_ref[...].astype(jnp.float32)
    feats = _mm(x, vis_w[...]) + vis_b[...]            # vision backbone stub
    feats_ref[...] = feats
    z_ref[...] = _mm(feats, proj_w[...])               # CLIP image projector
    v, p = _siamlip_head_math(feats, pw1[...], pb1[...], pw2[...], pb2[...],
                              qw1[...], qb1[...], qw2[...], qb2[...])
    v_ref[...] = v
    p_ref[...] = p


def text_pipeline_kernel(x0_ref, mask_ref, onehot_ref,
                         ln1w, ln1b, wq, bq, wk, bk, wv, bv, wo, bo,
                         ln2w, ln2b, wfc, bfc, wpj, bpj,
                         lnfw, lnfb, projw,
                         pw1, pb1, pw2, pb2, qw1, qb1, qw2, qb2,
                         feats_ref, z_ref, v_ref, p_ref,
                         *, n_head, n_layers):
    """Whole text pathway (all views): transformer layers (static unrolled
    loop, all weights VMEM-resident) -> final LN -> EOT select -> text
    projection -> SIAMLIP text head.  Single invocation, no grid."""
    x3 = x0_ref[...].astype(jnp.float32)               # (NB, L, W)
    NB, L, W = x3.shape
    x = x3.reshape(NB * L, W)
    bias = mask_ref[...][None, :, :]                   # (1, L, L), hoisted

    for l in range(n_layers):                          # static unrolled layers
        # ------------------ attention branch: x + MHA(LN1(x)) ---------------
        h = _ln(x, ln1w[l], ln1b[l])
        attn = jnp.zeros_like(x)
        for hh in range(n_head):                       # static head loop
            i = l * n_head + hh
            # Per-head q/k/v from per-head weight stacks (no value lane slices);
            # the 1/sqrt(Dh) query scale is folded into wq/bq host-side.
            q = (_mm(h, wq[i]) + bq[i]).reshape(NB, L, -1)
            k = (_mm(h, wk[i]) + bk[i]).reshape(NB, L, -1)
            v = (_mm(h, wv[i]) + bv[i]).reshape(NB, L, -1)
            s = jnp.einsum('bqd,bkd->bqk', q, k,
                           preferred_element_type=jnp.float32) + bias
            s = s - jnp.max(s, axis=-1, keepdims=True)
            p = jnp.exp(s)
            p = p / jnp.sum(p, axis=-1, keepdims=True)        # exact softmax
            ctx = jnp.einsum('bqk,bkd->bqd', p, v,
                             preferred_element_type=jnp.float32)
            # Accumulate the output projection per head (no lane-axis concat).
            attn = attn + _mm(ctx.reshape(NB * L, -1), wo[i])
        x = x + attn + bo[l]

        # --------------------- MLP branch: x + MLP(LN2(x)) ------------------
        h2 = _ln(x, ln2w[l], ln2b[l])
        u = _mm(h2, wfc[l]) + bfc[l]
        u = u / (1.0 + jnp.exp(-1.702 * u))            # QuickGELU: x*sigmoid(1.702x)
        x = x + _mm(u, wpj[l]) + bpj[l]

    # ---- final LN + vectorized EOT select + text proj + SIAMLIP text head ---
    xf = _ln(x, lnfw[...], lnfb[...]).reshape(NB, L, W)
    feats = jnp.sum(onehot_ref[...][:, :, None] * xf, axis=1)   # (NB, W)
    feats_ref[...] = feats
    z_ref[...] = _mm(feats, projw[...])                          # text projector
    v, p = _siamlip_head_math(feats, pw1[...], pb1[...], pw2[...], pb2[...],
                              qw1[...], qb1[...], qw2[...], qb2[...])
    v_ref[...] = v
    p_ref[...] = p


# ---------------------------- pallas_call wrappers --------------------------
def _vmem_call(kernel, out_shapes, args):
    # Small shapes: everything resident in VMEM, single invocation, no grid.
    return pl.pallas_call(
        kernel,
        out_shape=tuple(out_shapes),
        in_specs=[pl.BlockSpec(memory_space=pltpu.MemorySpace.VMEM)] * len(args),
        out_specs=tuple(pl.BlockSpec(memory_space=pltpu.MemorySpace.VMEM)
                        for _ in out_shapes),
    )(*args)


def pallas_image_pipeline(params, images):
    Bi = images.shape[0]
    flat = images.reshape(Bi, -1).astype(jnp.float32)
    hp = params['siamlip_img']
    outs = (jax.ShapeDtypeStruct((Bi, VISION_W), jnp.float32),
            jax.ShapeDtypeStruct((Bi, EMBED_DIM), jnp.float32),
            jax.ShapeDtypeStruct((Bi, SIAM_PROJ), jnp.float32),
            jax.ShapeDtypeStruct((Bi, SIAM_PROJ), jnp.float32))
    args = (flat, params['vis_w'], params['vis_b'], params['img_proj_w'],
            hp['pw1'], hp['pb1'], hp['pw2'], hp['pb2'],
            hp['qw1'], hp['qb1'], hp['qw2'], hp['qb2'])
    return _vmem_call(image_pipeline_kernel, outs, args)


def pallas_text_pipeline(params, x0, eot_onehot):
    NB = x0.shape[0]
    lyr = params['layers']
    hp = params['siamlip_txt']
    outs = (jax.ShapeDtypeStruct((NB, WIDTH), jnp.float32),
            jax.ShapeDtypeStruct((NB, EMBED_DIM), jnp.float32),
            jax.ShapeDtypeStruct((NB, SIAM_PROJ), jnp.float32),
            jax.ShapeDtypeStruct((NB, SIAM_PROJ), jnp.float32))
    args = (x0, params['attn_mask'], eot_onehot,
            lyr['ln1_w'], lyr['ln1_b'],
            lyr['wq'], lyr['bq'], lyr['wk'], lyr['bk'], lyr['wv'], lyr['bv'],
            lyr['wo'], lyr['bo'],
            lyr['ln2_w'], lyr['ln2_b'], lyr['wfc'], lyr['bfc'],
            lyr['wpj'], lyr['bpj'],
            params['lnf_w'], params['lnf_b'], params['txt_proj_w'],
            hp['pw1'], hp['pb1'], hp['pw2'], hp['pb2'],
            hp['qw1'], hp['qb1'], hp['qw2'], hp['qb2'])
    kern = functools.partial(text_pipeline_kernel, n_head=HEADS, n_layers=LAYERS)
    return _vmem_call(kern, outs, args)


# ------------------------------- model forward ------------------------------
def siamlip_forward(params, image_global, text, image_local):
    """SIAMLIP.forward (eval mode): CLIP global views + CL2L local views +
    SIAMLIP projector/predictor heads.  text: (B, n_views, L); image_local:
    tuple of NCHW crops."""
    B = image_global.shape[0]
    n_views = text.shape[1]
    n_local_img = len(image_local)
    L = text.shape[2]

    # ---- image pathway: global + all local crops in ONE kernel ----
    imgs = jnp.concatenate((image_global,) + tuple(image_local), axis=0)
    feats_img, z_img, v_img, p_img = pallas_image_pipeline(params, imgs)

    # ---- text pathway: all views batched (view-major) in ONE kernel ----
    text_vm = jnp.transpose(text, (1, 0, 2)).reshape(n_views * B, L)
    # host glue: EOT index (CLIP argmax-of-token-id convention) as a one-hot,
    # and the token-embedding gather.
    eot = jnp.argmax(text_vm, axis=-1)
    eot_onehot = (jnp.arange(L, dtype=jnp.int32)[None, :]
                  == eot[:, None]).astype(jnp.float32)
    x0 = (jnp.take(params['token_emb'], text_vm, axis=0)
          + params['pos_emb'][None]).astype(jnp.float32)
    feats_txt, z_txt, v_txt, p_txt = pallas_text_pipeline(params, x0, eot_onehot)

    def view(a, i):           # i=0 -> global view, i>=1 -> local view i-1
        return a[i * B:(i + 1) * B]

    logit_scale = jnp.exp(params['logit_scale'])

    out = {
        # CLIP (global views)
        'feats_image': view(feats_img, 0),
        'feats_text': view(feats_txt, 0),
        'z_image_global': view(z_img, 0),
        'z_text_global': view(z_txt, 0),
        'logit_scale': logit_scale,
        # CL2L (local views; separate_proj=False -> shared projectors)
        'feats_image_local': [view(feats_img, 1 + i) for i in range(n_local_img)],
        'feats_text_local': [view(feats_txt, 1 + i) for i in range(n_views - 1)],
        'h_image_local': [view(z_img, 1 + i) for i in range(n_local_img)],
        'h_text_local': [view(z_txt, 1 + i) for i in range(n_views - 1)],
        'h_logit_scale': logit_scale,
        # SIAMLIP heads (shared global/local heads)
        'v_image': view(v_img, 0), 'p_image': view(p_img, 0),
        'v_text': view(v_txt, 0), 'p_text': view(p_txt, 0),
        'v_image_local': [view(v_img, 1 + i) for i in range(n_local_img)],
        'p_image_local': [view(p_img, 1 + i) for i in range(n_local_img)],
        'v_text_local': [view(v_txt, 1 + i) for i in range(n_views - 1)],
        'p_text_local': [view(p_txt, 1 + i) for i in range(n_views - 1)],
    }
    return out


# --------------------------- deterministic params ---------------------------
def init_params(key):
    """Weights generated with the PyTorch init distributions, then converted
    to the kernel layout host-side: (in, out) matmul layout, eval-mode BN
    folded into the adjacent bias-free linears, qkv split per head + stacked,
    1/sqrt(Dh) folded into wq/bq."""
    keys = iter(jax.random.split(key, 64))

    def nrm(shape, std):
        return (std * jax.random.normal(next(keys), shape)).astype(jnp.float32)

    attn_std = WIDTH ** (-0.5)
    proj_std = WIDTH ** (-0.5) * (2 * LAYERS) ** (-0.5)
    fc_std = (2 * WIDTH) ** (-0.5)
    q_scale = HEAD_DIM ** (-0.5)

    def split_cols(w_io):     # (W, W) (in,out) -> (H, W, Dh) per-head columns
        return jnp.stack([w_io[:, h * HEAD_DIM:(h + 1) * HEAD_DIM]
                          for h in range(HEADS)], axis=0)

    per_layer = []
    for _ in range(LAYERS):
        in_w = nrm((3 * WIDTH, WIDTH), attn_std)       # torch in_proj layout
        in_b = jnp.zeros((3 * WIDTH,), jnp.float32)
        wq_io = in_w[:WIDTH].T * q_scale               # fold query scale
        wk_io = in_w[WIDTH:2 * WIDTH].T
        wv_io = in_w[2 * WIDTH:].T
        wo_io = nrm((WIDTH, WIDTH), proj_std).T        # out_proj (out,in)->(in,out)
        per_layer.append(dict(
            ln1_w=jnp.ones((1, WIDTH), jnp.float32),
            ln1_b=jnp.zeros((1, WIDTH), jnp.float32),
            wq=split_cols(wq_io),
            bq=(in_b[:WIDTH] * q_scale).reshape(HEADS, 1, HEAD_DIM),
            wk=split_cols(wk_io),
            bk=in_b[WIDTH:2 * WIDTH].reshape(HEADS, 1, HEAD_DIM),
            wv=split_cols(wv_io),
            bv=in_b[2 * WIDTH:].reshape(HEADS, 1, HEAD_DIM),
            wo=jnp.stack([wo_io[h * HEAD_DIM:(h + 1) * HEAD_DIM, :]
                          for h in range(HEADS)], axis=0),        # (H, Dh, W)
            bo=jnp.zeros((1, WIDTH), jnp.float32),
            ln2_w=jnp.ones((1, WIDTH), jnp.float32),
            ln2_b=jnp.zeros((1, WIDTH), jnp.float32),
            wfc=nrm((4 * WIDTH, WIDTH), fc_std).T,                # (W, 4W)
            bfc=jnp.zeros((1, 4 * WIDTH), jnp.float32),
            wpj=nrm((WIDTH, 4 * WIDTH), proj_std).T,              # (4W, W)
            bpj=jnp.zeros((1, WIDTH), jnp.float32),
        ))

    def stack(name):
        return jnp.stack([blk[name] for blk in per_layer], axis=0)

    layers = {}
    for name in ('ln1_w', 'ln1_b', 'bo', 'ln2_w', 'ln2_b',
                 'wfc', 'bfc', 'wpj', 'bpj'):
        layers[name] = stack(name)                                # (LAYERS, ...)
    for name in ('wq', 'bq', 'wk', 'bk', 'wv', 'bv', 'wo'):
        s = stack(name)                                           # (LAYERS, H, ...)
        layers[name] = s.reshape((LAYERS * HEADS,) + s.shape[2:])

    def bn_fold_into(w_io, dim):
        # eval-mode BatchNorm1d(dim) folded into the preceding bias-free Linear
        # (init running stats: mean 0, var 1, gamma 1, beta 0).
        rm = jnp.zeros((dim,), jnp.float32)
        rv = jnp.ones((dim,), jnp.float32)
        gamma = jnp.ones((dim,), jnp.float32)
        beta = jnp.zeros((dim,), jnp.float32)
        scale = gamma * lax.rsqrt(rv + BN_EPS)
        shift = beta - rm * scale
        return w_io * scale[None, :], shift.reshape(1, -1)

    def siamlip_head(in_dim):
        # projector: Linear(no bias)+BN+ReLU+Linear(no bias)+BN(affine=False)
        pw1, pb1 = bn_fold_into(nrm((SIAM_HID, in_dim), in_dim ** (-0.5)).T, SIAM_HID)
        pw2, pb2 = bn_fold_into(nrm((SIAM_PROJ, SIAM_HID), SIAM_HID ** (-0.5)).T, SIAM_PROJ)
        # predictor: Linear(no bias)+BN+ReLU+Linear(+bias)
        qw1, qb1 = bn_fold_into(nrm((SIAM_HID, SIAM_PROJ), SIAM_PROJ ** (-0.5)).T, SIAM_HID)
        qw2 = nrm((SIAM_PROJ, SIAM_HID), SIAM_HID ** (-0.5)).T
        qb2 = jnp.zeros((1, SIAM_PROJ), jnp.float32)
        return dict(pw1=pw1, pb1=pb1, pw2=pw2, pb2=pb2,
                    qw1=qw1, qb1=qb1, qw2=qw2, qb2=qb2)

    params = dict(
        # TODO(synk): the CLIP vision backbone is injected and unspecified in
        # the reference; use a deterministic flatten+linear stub.
        vis_w=nrm((VISION_W, IMG_C * IMG_H * IMG_W), 0.02).T,     # (768, 32)
        vis_b=jnp.zeros((1, VISION_W), jnp.float32),
        token_emb=nrm((VOCAB, WIDTH), 0.02),
        pos_emb=nrm((CTX_LEN, WIDTH), 0.01),
        layers=layers,
        lnf_w=jnp.ones((1, WIDTH), jnp.float32),
        lnf_b=jnp.zeros((1, WIDTH), jnp.float32),
        img_proj_w=nrm((EMBED_DIM, VISION_W), VISION_W ** (-0.5)).T,  # (32, 16)
        txt_proj_w=nrm((EMBED_DIM, WIDTH), WIDTH ** (-0.5)).T,        # (32, 16)
        logit_scale=jnp.log(jnp.asarray(1.0 / 0.07, jnp.float32)),
        # causal additive mask (-1e30 above diagonal; equivalent to -inf in
        # fp32 after max-subtraction softmax)
        attn_mask=jnp.triu(jnp.full((CTX_LEN, CTX_LEN), -1e30, jnp.float32), k=1),
        siamlip_img=siamlip_head(VISION_W),
        siamlip_txt=siamlip_head(WIDTH),
    )
    return params


# ------------------------------------ main -----------------------------------
if __name__ == "__main__":
    key = jax.random.PRNGKey(0)
    k_p, k_ig, k_il, k_t = jax.random.split(key, 4)

    params = init_params(k_p)

    B = 2
    image_global = jax.random.normal(k_ig, (B, IMG_C, IMG_H, IMG_W), jnp.float32)
    image_local = (jax.random.normal(k_il, (B, IMG_C, IMG_H, IMG_W), jnp.float32),)
    text = jax.random.randint(k_t, (B, 2, CTX_LEN), 0, VOCAB, dtype=jnp.int32)

    fwd = jax.jit(siamlip_forward)
    out = fwd(params, image_global, text, image_local)
    jax.block_until_ready(out)

    # light sanity checks on shapes
    assert out['z_image_global'].shape == (B, EMBED_DIM)
    assert out['z_text_global'].shape == (B, EMBED_DIM)
    assert out['feats_text'].shape == (B, WIDTH)
    assert out['feats_image'].shape == (B, VISION_W)
    assert out['h_image_local'][0].shape == (B, EMBED_DIM)
    assert out['h_text_local'][0].shape == (B, EMBED_DIM)
    assert out['v_image'].shape == (B, SIAM_PROJ)
    assert out['p_image'].shape == (B, SIAM_PROJ)
    assert out['v_text'].shape == (B, SIAM_PROJ)
    assert out['p_text'].shape == (B, SIAM_PROJ)
    assert out['p_image_local'][0].shape == (B, SIAM_PROJ)
    assert out['p_text_local'][0].shape == (B, SIAM_PROJ)
    assert bool(jnp.all(jnp.isfinite(out['p_text'])))

    print("KERNEL_OK")
</pallas_src>

<mosaic_0001>
module attributes {stable_mosaic.version = 11 : i64} {
  func.func @image_pipeline_kernel(%arg0: memref<4x768xf32, #tpu.memory_space<vmem>>, %arg1: memref<768x32xf32, #tpu.memory_space<vmem>>, %arg2: memref<1x32xf32, #tpu.memory_space<vmem>>, %arg3: memref<32x16xf32, #tpu.memory_space<vmem>>, %arg4: memref<32x32xf32, #tpu.memory_space<vmem>>, %arg5: memref<1x32xf32, #tpu.memory_space<vmem>>, %arg6: memref<32x16xf32, #tpu.memory_space<vmem>>, %arg7: memref<1x16xf32, #tpu.memory_space<vmem>>, %arg8: memref<16x32xf32, #tpu.memory_space<vmem>>, %arg9: memref<1x32xf32, #tpu.memory_space<vmem>>, %arg10: memref<32x16xf32, #tpu.memory_space<vmem>>, %arg11: memref<1x16xf32, #tpu.memory_space<vmem>>, %arg12: memref<4x32xf32, #tpu.memory_space<vmem>>, %arg13: memref<4x16xf32, #tpu.memory_space<vmem>>, %arg14: memref<4x16xf32, #tpu.memory_space<vmem>>, %arg15: memref<4x16xf32, #tpu.memory_space<vmem>>) attributes {dimension_semantics = [], scalar_prefetch = 0 : i64, scratch_operands = 0 : i64, tpu.core_type = #tpu.core_type<tc>} {
    %c0 = arith.constant 0 : index
    %c0_0 = arith.constant 0 : index
    %0 = vector.load %arg0[%c0, %c0_0] : memref<4x768xf32, #tpu.memory_space<vmem>>, vector<4x768xf32>
    %c0_1 = arith.constant 0 : index
    %c0_2 = arith.constant 0 : index
    %1 = vector.load %arg1[%c0_1, %c0_2] : memref<768x32xf32, #tpu.memory_space<vmem>>, vector<768x32xf32>
    %cst = arith.constant dense<0.000000e+00> : vector<4x32xf32>
    %2 = tpu.matmul %0, %1, %cst {dimension_numbers = #tpu.dot_dimension_numbers<[1], [0], [0], [1], [0, 0, 1, 1], [], []>} : vector<4x768xf32>, vector<768x32xf32>, vector<4x32xf32> -> vector<4x32xf32>
    %c0_3 = arith.constant 0 : index
    %c0_4 = arith.constant 0 : index
    %3 = vector.load %arg2[%c0_3, %c0_4] : memref<1x32xf32, #tpu.memory_space<vmem>>, vector<1x32xf32>
    %4 = vector.broadcast %3 : vector<1x32xf32> to vector<4x32xf32>
    %5 = arith.addf %2, %4 : vector<4x32xf32>
    %c0_5 = arith.constant 0 : index
    %c0_6 = arith.constant 0 : index
    %6 = vector.load %arg12[%c0_5, %c0_6] : memref<4x32xf32, #tpu.memory_space<vmem>>, vector<4x32xf32>
    tpu.vector_store %arg12[%c0_5, %c0_6], %5 {strides = array<i32>} : memref<4x32xf32, #tpu.memory_space<vmem>>, vector<4x32xf32>,
    %c0_7 = arith.constant 0 : index
    %c0_8 = arith.constant 0 : index
    %7 = vector.load %arg3[%c0_7, %c0_8] : memref<32x16xf32, #tpu.memory_space<vmem>>, vector<32x16xf32>
    %cst_9 = arith.constant dense<0.000000e+00> : vector<4x16xf32>
    %8 = tpu.matmul %5, %7, %cst_9 {dimension_numbers = #tpu.dot_dimension_numbers<[1], [0], [0], [1], [0, 0, 1, 1], [], []>} : vector<4x32xf32>, vector<32x16xf32>, vector<4x16xf32> -> vector<4x16xf32>
    %c0_10 = arith.constant 0 : index
    %c0_11 = arith.constant 0 : index
    %9 = vector.load %arg13[%c0_10, %c0_11] : memref<4x16xf32, #tpu.memory_space<vmem>>, vector<4x16xf32>
    tpu.vector_store %arg13[%c0_10, %c0_11], %8 {strides = array<i32>} : memref<4x16xf32, #tpu.memory_space<vmem>>, vector<4x16xf32>,
    %c0_12 = arith.constant 0 : index
    %c0_13 = arith.constant 0 : index
    %10 = vector.load %arg4[%c0_12, %c0_13] : memref<32x32xf32, #tpu.memory_space<vmem>>, vector<32x32xf32>
    %c0_14 = arith.constant 0 : index
    %c0_15 = arith.constant 0 : index
    %11 = vector.load %arg5[%c0_14, %c0_15] : memref<1x32xf32, #tpu.memory_space<vmem>>, vector<1x32xf32>
    %c0_16 = arith.constant 0 : index
    %c0_17 = arith.constant 0 : index
    %12 = vector.load %arg6[%c0_16, %c0_17] : memref<32x16xf32, #tpu.memory_space<vmem>>, vector<32x16xf32>
    %c0_18 = arith.constant 0 : index
    %c0_19 = arith.constant 0 : index
    %13 = vector.load %arg7[%c0_18, %c0_19] : memref<1x16xf32, #tpu.memory_space<vmem>>, vector<1x16xf32>
    %c0_20 = arith.constant 0 : index
    %c0_21 = arith.constant 0 : index
    %14 = vector.load %arg8[%c0_20, %c0_21] : memref<16x32xf32, #tpu.memory_space<vmem>>, vector<16x32xf32>
    %c0_22 = arith.constant 0 : index
    %c0_23 = arith.constant 0 : index
    %15 = vector.load %arg9[%c0_22, %c0_23] : memref<1x32xf32, #tpu.memory_space<vmem>>, vector<1x32xf32>
    %c0_24 = arith.constant 0 : index
    %c0_25 = arith.constant 0 : index
    %16 = vector.load %arg10[%c0_24, %c0_25] : memref<32x16xf32, #tpu.memory_space<vmem>>, vector<32x16xf32>
    %c0_26 = arith.constant 0 : index
    %c0_27 = arith.constant 0 : index
    %17 = vector.load %arg11[%c0_26, %c0_27] : memref<1x16xf32, #tpu.memory_space<vmem>>, vector<1x16xf32>
    %cst_28 = arith.constant dense<0.000000e+00> : vector<4x32xf32>
    %18 = tpu.matmul %5, %10, %cst_28 {dimension_numbers = #tpu.dot_dimension_numbers<[1], [0], [0], [1], [0, 0, 1, 1], [], []>} : vector<4x32xf32>, vector<32x32xf32>, vector<4x32xf32> -> vector<4x32xf32>
    %19 = vector.broadcast %11 : vector<1x32xf32> to vector<4x32xf32>
    %20 = arith.addf %18, %19 : vector<4x32xf32>
    %cst_29 = arith.constant 0.000000e+00 : f32
    %21 = vector.broadcast %cst_29 : f32 to vector<4x32xf32>
    %22 = arith.maximumf %20, %21 : vector<4x32xf32>
    %cst_30 = arith.constant dense<0.000000e+00> : vector<4x16xf32>
    %23 = tpu.matmul %22, %12, %cst_30 {dimension_numbers = #tpu.dot_dimension_numbers<[1], [0], [0], [1], [0, 0, 1, 1], [], []>} : vector<4x32xf32>, vector<32x16xf32>, vector<4x16xf32> -> vector<4x16xf32>
    %24 = vector.broadcast %13 : vector<1x16xf32> to vector<4x16xf32>
    %25 = arith.addf %23, %24 : vector<4x16xf32>
    %cst_31 = arith.constant dense<0.000000e+00> : vector<4x32xf32>
    %26 = tpu.matmul %25, %14, %cst_31 {dimension_numbers = #tpu.dot_dimension_numbers<[1], [0], [0], [1], [0, 0, 1, 1], [], []>} : vector<4x16xf32>, vector<16x32xf32>, vector<4x32xf32> -> vector<4x32xf32>
    %27 = vector.broadcast %15 : vector<1x32xf32> to vector<4x32xf32>
    %28 = arith.addf %26, %27 : vector<4x32xf32>
    %cst_32 = arith.constant 0.000000e+00 : f32
    %29 = vector.broadcast %cst_32 : f32 to vector<4x32xf32>
    %30 = arith.maximumf %28, %29 : vector<4x32xf32>
    %cst_33 = arith.constant dense<0.000000e+00> : vector<4x16xf32>
    %31 = tpu.matmul %30, %16, %cst_33 {dimension_numbers = #tpu.dot_dimension_numbers<[1], [0], [0], [1], [0, 0, 1, 1], [], []>} : vector<4x32xf32>, vector<32x16xf32>, vector<4x16xf32> -> vector<4x16xf32>
    %32 = vector.broadcast %17 : vector<1x16xf32> to vector<4x16xf32>
    %33 = arith.addf %31, %32 : vector<4x16xf32>
    %c0_34 = arith.constant 0 : index
    %c0_35 = arith.constant 0 : index
    %34 = vector.load %arg14[%c0_34, %c0_35] : memref<4x16xf32, #tpu.memory_space<vmem>>, vector<4x16xf32>
    tpu.vector_store %arg14[%c0_34, %c0_35], %25 {strides = array<i32>} : memref<4x16xf32, #tpu.memory_space<vmem>>, vector<4x16xf32>,
    %c0_36 = arith.constant 0 : index
    %c0_37 = arith.constant 0 : index
    %35 = vector.load %arg15[%c0_36, %c0_37] : memref<4x16xf32, #tpu.memory_space<vmem>>, vector<4x16xf32>
    tpu.vector_store %arg15[%c0_36, %c0_37], %33 {strides = array<i32>} : memref<4x16xf32, #tpu.memory_space<vmem>>, vector<4x16xf32>,
    return
  }
}

module attributes {stable_mosaic.version = 11 : i64} {
  func.func @text_pipeline_kernel(%arg0: memref<4x8x32xf32, #tpu.memory_space<vmem>>, %arg1: memref<8x8xf32, #tpu.memory_space<vmem>>, %arg2: memref<4x8xf32, #tpu.memory_space<vmem>>, %arg3: memref<2x1x32xf32, #tpu.memory_space<vmem>>, %arg4: memref<2x1x32xf32, #tpu.memory_space<vmem>>, %arg5: memref<8x32x8xf32, #tpu.memory_space<vmem>>, %arg6: memref<8x1x8xf32, #tpu.memory_space<vmem>>, %arg7: memref<8x32x8xf32, #tpu.memory_space<vmem>>, %arg8: memref<8x1x8xf32, #tpu.memory_space<vmem>>, %arg9: memref<8x32x8xf32, #tpu.memory_space<vmem>>, %arg10: memref<8x1x8xf32, #tpu.memory_space<vmem>>, %arg11: memref<8x8x32xf32, #tpu.memory_space<vmem>>, %arg12: memref<2x1x32xf32, #tpu.memory_space<vmem>>, %arg13: memref<2x1x32xf32, #tpu.memory_space<vmem>>, %arg14: memref<2x1x32xf32, #tpu.memory_space<vmem>>, %arg15: memref<2x32x128xf32, #tpu.memory_space<vmem>>, %arg16: memref<2x1x128xf32, #tpu.memory_space<vmem>>, %arg17: memref<2x128x32xf32, #tpu.memory_space<vmem>>, %arg18: memref<2x1x32xf32, #tpu.memory_space<vmem>>, %arg19: memref<1x32xf32, #tpu.memory_space<vmem>>, %arg20: memref<1x32xf32, #tpu.memory_space<vmem>>, %arg21: memref<32x16xf32, #tpu.memory_space<vmem>>, %arg22: memref<32x32xf32, #tpu.memory_space<vmem>>, %arg23: memref<1x32xf32, #tpu.memory_space<vmem>>, %arg24: memref<32x16xf32, #tpu.memory_space<vmem>>, %arg25: memref<1x16xf32, #tpu.memory_space<vmem>>, %arg26: memref<16x32xf32, #tpu.memory_space<vmem>>, %arg27: memref<1x32xf32, #tpu.memory_space<vmem>>, %arg28: memref<32x16xf32, #tpu.memory_space<vmem>>, %arg29: memref<1x16xf32, #tpu.memory_space<vmem>>, %arg30: memref<4x32xf32, #tpu.memory_space<vmem>>, %arg31: memref<4x16xf32, #tpu.memory_space<vmem>>, %arg32: memref<4x16xf32, #tpu.memory_space<vmem>>, %arg33: memref<4x16xf32, #tpu.memory_space<vmem>>) attributes {dimension_semantics = [], scalar_prefetch = 0 : i64, scratch_operands = 0 : i64, tpu.core_type = #tpu.core_type<tc>} {
    %c0 = arith.constant 0 : index
    %c0_0 = arith.constant 0 : index
    %c0_1 = arith.constant 0 : index
    %0 = vector.load %arg0[%c0, %c0_0, %c0_1] : memref<4x8x32xf32, #tpu.memory_space<vmem>>, vector<4x8x32xf32>
    %1 = vector.shape_cast %0 : vector<4x8x32xf32> to vector<32x32xf32>
    %c0_2 = arith.constant 0 : index
    %c0_3 = arith.constant 0 : index
    %2 = vector.load %arg1[%c0_2, %c0_3] : memref<8x8xf32, #tpu.memory_space<vmem>>, vector<8x8xf32>
    %3 = vector.shape_cast %2 : vector<8x8xf32> to vector<1x8x8xf32>
    %c0_4 = arith.constant 0 : index
    %c0_5 = arith.constant 0 : index
    %c0_6 = arith.constant 0 : index
    %4 = vector.load %arg3[%c0_4, %c0_5, %c0_6] : memref<2x1x32xf32, #tpu.memory_space<vmem>>, vector<1x1x32xf32>
    %5 = vector.shape_cast %4 : vector<1x1x32xf32> to vector<1x32xf32>
    %c0_7 = arith.constant 0 : index
    %c0_8 = arith.constant 0 : index
    %c0_9 = arith.constant 0 : index
    %6 = vector.load %arg4[%c0_7, %c0_8, %c0_9] : memref<2x1x32xf32, #tpu.memory_space<vmem>>, vector<1x1x32xf32>
    %7 = vector.shape_cast %6 : vector<1x1x32xf32> to vector<1x32xf32>
    %cst = arith.constant dense<0.000000e+00> : vector<32xf32>
    %8 = vector.multi_reduction <add>, %1, %cst [1] : vector<32x32xf32> to vector<32xf32>
    %9 = vector.shape_cast %8 : vector<32xf32> to vector<32x1xf32>
    %cst_10 = arith.constant 3.200000e+01 : f32
    %10 = vector.broadcast %cst_10 : f32 to vector<32x1xf32>
    %11 = arith.divf %9, %10 : vector<32x1xf32>
    %12 = vector.broadcast %11 : vector<32x1xf32> to vector<32x32xf32>
    %13 = arith.subf %1, %12 : vector<32x32xf32>
    %14 = arith.mulf %13, %13 : vector<32x32xf32>
    %cst_11 = arith.constant dense<0.000000e+00> : vector<32xf32>
    %15 = vector.multi_reduction <add>, %14, %cst_11 [1] : vector<32x32xf32> to vector<32xf32>
    %16 = vector.shape_cast %15 : vector<32xf32> to vector<32x1xf32>
    %cst_12 = arith.constant 3.200000e+01 : f32
    %17 = vector.broadcast %cst_12 : f32 to vector<32x1xf32>
    %18 = arith.divf %16, %17 : vector<32x1xf32>
    %19 = vector.broadcast %11 : vector<32x1xf32> to vector<32x32xf32>
    %20 = arith.subf %1, %19 : vector<32x32xf32>
    %cst_13 = arith.constant 9.99999974E-6 : f32
    %21 = vector.broadcast %cst_13 : f32 to vector<32x1xf32>
    %22 = arith.addf %18, %21 : vector<32x1xf32>
    %23 = math.rsqrt %22 : vector<32x1xf32>
    %24 = vector.broadcast %23 : vector<32x1xf32> to vector<32x32xf32>
    %25 = arith.mulf %20, %24 : vector<32x32xf32>
    %26 = vector.broadcast %5 : vector<1x32xf32> to vector<32x32xf32>
    %27 = arith.mulf %25, %26 : vector<32x32xf32>
    %28 = vector.broadcast %7 : vector<1x32xf32> to vector<32x32xf32>
    %29 = arith.addf %27, %28 : vector<32x32xf32>
    %cst_14 = arith.constant 0.000000e+00 : f32
    %30 = vector.broadcast %cst_14 : f32 to vector<32x32xf32>
    %c0_15 = arith.constant 0 : index
    %c0_16 = arith.constant 0 : index
    %c0_17 = arith.constant 0 : index
    %31 = vector.load %arg5[%c0_15, %c0_16, %c0_17] : memref<8x32x8xf32, #tpu.memory_space<vmem>>, vector<1x32x8xf32>
    %32 = vector.shape_cast %31 : vector<1x32x8xf32> to vector<32x8xf32>
    %cst_18 = arith.constant dense<0.000000e+00> : vector<32x8xf32>
    %33 = tpu.matmul %29, %32, %cst_18 {dimension_numbers = #tpu.dot_dimension_numbers<[1], [0], [0], [1], [0, 0, 1, 1], [], []>} : vector<32x32xf32>, vector<32x8xf32>, vector<32x8xf32> -> vector<32x8xf32>
    %c0_19 = arith.constant 0 : index
    %c0_20 = arith.constant 0 : index
    %c0_21 = arith.constant 0 : index
    %34 = vector.load %arg6[%c0_19, %c0_20, %c0_21] : memref<8x1x8xf32, #tpu.memory_space<vmem>>, vector<1x1x8xf32>
    %35 = vector.shape_cast %34 : vector<1x1x8xf32> to vector<1x8xf32>
    %36 = vector.broadcast %35 : vector<1x8xf32> to vector<32x8xf32>
    %37 = arith.addf %33, %36 : vector<32x8xf32>
    %38 = vector.shape_cast %37 : vector<32x8xf32> to vector<4x8x8xf32>
    %c0_22 = arith.constant 0 : index
    %c0_23 = arith.constant 0 : index
    %c0_24 = arith.constant 0 : index
    %39 = vector.load %arg7[%c0_22, %c0_23, %c0_24] : memref<8x32x8xf32, #tpu.memory_space<vmem>>, vector<1x32x8xf32>
    %40 = vector.shape_cast %39 : vector<1x32x8xf32> to vector<32x8xf32>
    %cst_25 = arith.constant dense<0.000000e+00> : vector<32x8xf32>
    %41 = tpu.matmul %29, %40, %cst_25 {dimension_numbers = #tpu.dot_dimension_numbers<[1], [0], [0], [1], [0, 0, 1, 1], [], []>} : vector<32x32xf32>, vector<32x8xf32>, vector<32x8xf32> -> vector<32x8xf32>
    %c0_26 = arith.constant 0 : index
    %c0_27 = arith.constant 0 : index
    %c0_28 = arith.constant 0 : index
    %42 = vector.load %arg8[%c0_26, %c0_27, %c0_28] : memref<8x1x8xf32, #tpu.memory_space<vmem>>, vector<1x1x8xf32>
    %43 = vector.shape_cast %42 : vector<1x1x8xf32> to vector<1x8xf32>
    %44 = vector.broadcast %43 : vector<1x8xf32> to vector<32x8xf32>
    %45 = arith.addf %41, %44 : vector<32x8xf32>
    %46 = vector.shape_cast %45 : vector<32x8xf32> to vector<4x8x8xf32>
    %c0_29 = arith.constant 0 : index
    %c0_30 = arith.constant 0 : index
    %c0_31 = arith.constant 0 : index
    %47 = vector.load %arg9[%c0_29, %c0_30, %c0_31] : memref<8x32x8xf32, #tpu.memory_space<vmem>>, vector<1x32x8xf32>
    %48 = vector.shape_cast %47 : vector<1x32x8xf32> to vector<32x8xf32>
    %cst_32 = arith.constant dense<0.000000e+00> : vector<32x8xf32>
    %49 = tpu.matmul %29, %48, %cst_32 {dimension_numbers = #tpu.dot_dimension_numbers<[1], [0], [0], [1], [0, 0, 1, 1], [], []>} : vector<32x32xf32>, vector<32x8xf32>, vector<32x8xf32> -> vector<32x8xf32>
    %c0_33 = arith.constant 0 : index
    %c0_34 = arith.constant 0 : index
    %c0_35 = arith.constant 0 : index
    %50 = vector.load %arg10[%c0_33, %c0_34, %c0_35] : memref<8x1x8xf32, #tpu.memory_space<vmem>>, vector<1x1x8xf32>
    %51 = vector.shape_cast %50 : vector<1x1x8xf32> to vector<1x8xf32>
    %52 = vector.broadcast %51 : vector<1x8xf32> to vector<32x8xf32>
    %53 = arith.addf %49, %52 : vector<32x8xf32>
    %54 = vector.shape_cast %53 : vector<32x8xf32> to vector<4x8x8xf32>
    "tpu.trace_start"() <{level = 10 : i32, message = "bqd,bkd->bqk"}> : () -> ()
    %cst_36 = arith.constant dense<0.000000e+00> : vector<4x8x8xf32>
    %55 = tpu.matmul %38, %46, %cst_36 {dimension_numbers = #tpu.dot_dimension_numbers<[2], [2], [1], [1], [0, 0, 0, 1, 1, 1], [0], [0]>} : vector<4x8x8xf32>, vector<4x8x8xf32>, vector<4x8x8xf32> -> vector<4x8x8xf32>
    "tpu.trace_stop"() : () -> ()
    %56 = vector.broadcast %3 : vector<1x8x8xf32> to vector<4x8x8xf32>
    %57 = arith.addf %55, %56 : vector<4x8x8xf32>
    %cst_37 = arith.constant dense<0xFF800000> : vector<4x8xf32>
    %58 = vector.multi_reduction <maximumf>, %57, %cst_37 [2] : vector<4x8x8xf32> to vector<4x8xf32>
    %59 = vector.shape_cast %58 : vector<4x8xf32> to vector<4x8x1xf32>
    %60 = vector.broadcast %59 : vector<4x8x1xf32> to vector<4x8x8xf32>
    %61 = arith.subf %57, %60 : vector<4x8x8xf32>
    %62 = math.exp %61 : vector<4x8x8xf32>
    %cst_38 = arith.constant dense<0.000000e+00> : vector<4x8xf32>
    %63 = vector.multi_reduction <add>, %62, %cst_38 [2] : vector<4x8x8xf32> to vector<4x8xf32>
    %64 = vector.shape_cast %63 : vector<4x8xf32> to vector<4x8x1xf32>
    %65 = vector.broadcast %64 : vector<4x8x1xf32> to vector<4x8x8xf32>
    %66 = arith.divf %62, %65 : vector<4x8x8xf32>
    "tpu.trace_start"() <{level = 10 : i32, message = "bqk,bkd->bqd"}> : () -> ()
    %cst_39 = arith.constant dense<0.000000e+00> : vector<4x8x8xf32>
    %67 = tpu.matmul %66, %54, %cst_39 {dimension_numbers = #tpu.dot_dimension_numbers<[2], [1], [1], [2], [0, 0, 0, 1, 1, 2], [0], [0]>} : vector<4x8x8xf32>, vector<4x8x8xf32>, vector<4x8x8xf32> -> vector<4x8x8xf32>
    "tpu.trace_stop"() : () -> ()
    %68 = vector.shape_cast %67 : vector<4x8x8xf32> to vector<32x8xf32>
    %c0_40 = arith.constant 0 : index
    %c0_41 = arith.constant 0 : index
    %c0_42 = arith.constant 0 : index
    %69 = vector.load %arg11[%c0_40, %c0_41, %c0_42] : memref<8x8x32xf32, #tpu.memory_space<vmem>>, vector<1x8x32xf32>
    %70 = vector.shape_cast %69 : vector<1x8x32xf32> to vector<8x32xf32>
    %cst_43 = arith.constant dense<0.000000e+00> : vector<32x32xf32>
    %71 = tpu.matmul %68, %70, %cst_43 {dimension_numbers = #tpu.dot_dimension_numbers<[1], [0], [0], [1], [0, 0, 1, 1], [], []>} : vector<32x8xf32>, vector<8x32xf32>, vector<32x32xf32> -> vector<32x32xf32>
    %72 = arith.addf %30, %71 : vector<32x32xf32>
    %c1 = arith.constant 1 : index
    %c0_44 = arith.constant 0 : index
    %c0_45 = arith.constant 0 : index
    %73 = vector.load %arg5[%c1, %c0_44, %c0_45] : memref<8x32x8xf32, #tpu.memory_space<vmem>>, vector<1x32x8xf32>
    %74 = vector.shape_cast %73 : vector<1x32x8xf32> to vector<32x8xf32>
    %cst_46 = arith.constant dense<0.000000e+00> : vector<32x8xf32>
    %75 = tpu.matmul %29, %74, %cst_46 {dimension_numbers = #tpu.dot_dimension_numbers<[1], [0], [0], [1], [0, 0, 1, 1], [], []>} : vector<32x32xf32>, vector<32x8xf32>, vector<32x8xf32> -> vector<32x8xf32>
    %c1_47 = arith.constant 1 : index
    %c0_48 = arith.constant 0 : index
    %c0_49 = arith.constant 0 : index
    %76 = vector.load %arg6[%c1_47, %c0_48, %c0_49] : memref<8x1x8xf32, #tpu.memory_space<vmem>>, vector<1x1x8xf32>
    %77 = vector.shape_cast %76 : vector<1x1x8xf32> to vector<1x8xf32>
    %78 = vector.broadcast %77 : vector<1x8xf32> to vector<32x8xf32>
    %79 = arith.addf %75, %78 : vector<32x8xf32>
    %80 = vector.shape_cast %79 : vector<32x8xf32> to vector<4x8x8xf32>
    %c1_50 = arith.constant 1 : index
    %c0_51 = arith.constant 0 : index
    %c0_52 = arith.constant 0 : index
    %81 = vector.load %arg7[%c1_50, %c0_51, %c0_52] : memref<8x32x8xf32, #tpu.memory_space<vmem>>, vector<1x32x8xf32>
    %82 = vector.shape_cast %81 : vector<1x32x8xf32> to vector<32x8xf32>
    %cst_53 = arith.constant dense<0.000000e+00> : vector<32x8xf32>
    %83 = tpu.matmul %29, %82, %cst_53 {dimension_numbers = #tpu.dot_dimension_numbers<[1], [0], [0], [1], [0, 0, 1, 1], [], []>} : vector<32x32xf32>, vector<32x8xf32>, vector<32x8xf32> -> vector<32x8xf32>
    %c1_54 = arith.constant 1 : index
    %c0_55 = arith.constant 0 : index
    %c0_56 = arith.constant 0 : index
    %84 = vector.load %arg8[%c1_54, %c0_55, %c0_56] : memref<8x1x8xf32, #tpu.memory_space<vmem>>, vector<1x1x8xf32>
    %85 = vector.shape_cast %84 : vector<1x1x8xf32> to vector<1x8xf32>
    %86 = vector.broadcast %85 : vector<1x8xf32> to vector<32x8xf32>
    %87 = arith.addf %83, %86 : vector<32x8xf32>
    %88 = vector.shape_cast %87 : vector<32x8xf32> to vector<4x8x8xf32>
    %c1_57 = arith.constant 1 : index
    %c0_58 = arith.constant 0 : index
    %c0_59 = arith.constant 0 : index
    %89 = vector.load %arg9[%c1_57, %c0_58, %c0_59] : memref<8x32x8xf32, #tpu.memory_space<vmem>>, vector<1x32x8xf32>
    %90 = vector.shape_cast %89 : vector<1x32x8xf32> to vector<32x8xf32>
    %cst_60 = arith.constant dense<0.000000e+00> : vector<32x8xf32>
    %91 = tpu.matmul %29, %90, %cst_60 {dimension_numbers = #tpu.dot_dimension_numbers<[1], [0], [0], [1], [0, 0, 1, 1], [], []>} : vector<32x32xf32>, vector<32x8xf32>, vector<32x8xf32> -> vector<32x8xf32>
    %c1_61 = arith.constant 1 : index
    %c0_62 = arith.constant 0 : index
    %c0_63 = arith.constant 0 : index
    %92 = vector.load %arg10[%c1_61, %c0_62, %c0_63] : memref<8x1x8xf32, #tpu.memory_space<vmem>>, vector<1x1x8xf32>
    %93 = vector.shape_cast %92 : vector<1x1x8xf32> to vector<1x8xf32>
    %94 = vector.broadcast %93 : vector<1x8xf32> to vector<32x8xf32>
    %95 = arith.addf %91, %94 : vector<32x8xf32>
    %96 = vector.shape_cast %95 : vector<32x8xf32> to vector<4x8x8xf32>
    "tpu.trace_start"() <{level = 10 : i32, message = "bqd,bkd->bqk"}> : () -> ()
    %cst_64 = arith.constant dense<0.000000e+00> : vector<4x8x8xf32>
    %97 = tpu.matmul %80, %88, %cst_64 {dimension_numbers = #tpu.dot_dimension_numbers<[2], [2], [1], [1], [0, 0, 0, 1, 1, 1], [0], [0]>} : vector<4x8x8xf32>, vector<4x8x8xf32>, vector<4x8x8xf32> -> vector<4x8x8xf32>
    "tpu.trace_stop"() : () -> ()
    %98 = vector.broadcast %3 : vector<1x8x8xf32> to vector<4x8x8xf32>
    %99 = arith.addf %97, %98 : vector<4x8x8xf32>
    %cst_65 = arith.constant dense<0xFF800000> : vector<4x8xf32>
    %100 = vector.multi_reduction <maximumf>, %99, %cst_65 [2] : vector<4x8x8xf32> to vector<4x8xf32>
    %101 = vector.shape_cast %100 : vector<4x8xf32> to vector<4x8x1xf32>
    %102 = vector.broadcast %101 : vector<4x8x1xf32> to vector<4x8x8xf32>
    %103 = arith.subf %99, %102 : vector<4x8x8xf32>
    %104 = math.exp %103 : vector<4x8x8xf32>
    %cst_66 = arith.constant dense<0.000000e+00> : vector<4x8xf32>
    %105 = vector.multi_reduction <add>, %104, %cst_66 [2] : vector<4x8x8xf32> to vector<4x8xf32>
    %106 = vector.shape_cast %105 : vector<4x8xf32> to vector<4x8x1xf32>
    %107 = vector.broadcast %106 : vector<4x8x1xf32> to vector<4x8x8xf32>
    %108 = arith.divf %104, %107 : vector<4x8x8xf32>
    "tpu.trace_start"() <{level = 10 : i32, message = "bqk,bkd->bqd"}> : () -> ()
    %cst_67 = arith.constant dense<0.000000e+00> : vector<4x8x8xf32>
    %109 = tpu.matmul %108, %96, %cst_67 {dimension_numbers = #tpu.dot_dimension_numbers<[2], [1], [1], [2], [0, 0, 0, 1, 1, 2], [0], [0]>} : vector<4x8x8xf32>, vector<4x8x8xf32>, vector<4x8x8xf32> -> vector<4x8x8xf32>
    "tpu.trace_stop"() : () -> ()
    %110 = vector.shape_cast %109 : vector<4x8x8xf32> to vector<32x8xf32>
    %c1_68 = arith.constant 1 : index
    %c0_69 = arith.constant 0 : index
    %c0_70 = arith.constant 0 : index
    %111 = vector.load %arg11[%c1_68, %c0_69, %c0_70] : memref<8x8x32xf32, #tpu.memory_space<vmem>>, vector<1x8x32xf32>
    %112 = vector.shape_cast %111 : vector<1x8x32xf32> to vector<8x32xf32>
    %cst_71 = arith.constant dense<0.000000e+00> : vector<32x32xf32>
    %113 = tpu.matmul %110, %112, %cst_71 {dimension_numbers = #tpu.dot_dimension_numbers<[1], [0], [0], [1], [0, 0, 1, 1], [], []>} : vector<32x8xf32>, vector<8x32xf32>, vector<32x32xf32> -> vector<32x32xf32>
    %114 = arith.addf %72, %113 : vector<32x32xf32>
    %c2 = arith.constant 2 : index
    %c0_72 = arith.constant 0 : index
    %c0_73 = arith.constant 0 : index
    %115 = vector.load %arg5[%c2, %c0_72, %c0_73] : memref<8x32x8xf32, #tpu.memory_space<vmem>>, vector<1x32x8xf32>
    %116 = vector.shape_cast %115 : vector<1x32x8xf32> to vector<32x8xf32>
    %cst_74 = arith.constant dense<0.000000e+00> : vector<32x8xf32>
    %117 = tpu.matmul %29, %116, %cst_74 {dimension_numbers = #tpu.dot_dimension_numbers<[1], [0], [0], [1], [0, 0, 1, 1], [], []>} : vector<32x32xf32>, vector<32x8xf32>, vector<32x8xf32> -> vector<32x8xf32>
    %c2_75 = arith.constant 2 : index
    %c0_76 = arith.constant 0 : index
    %c0_77 = arith.constant 0 : index
    %118 = vector.load %arg6[%c2_75, %c0_76, %c0_77] : memref<8x1x8xf32, #tpu.memory_space<vmem>>, vector<1x1x8xf32>
    %119 = vector.shape_cast %118 : vector<1x1x8xf32> to vector<1x8xf32>
    %120 = vector.broadcast %119 : vector<1x8xf32> to vector<32x8xf32>
    %121 = arith.addf %117, %120 : vector<32x8xf32>
    %122 = vector.shape_cast %121 : vector<32x8xf32> to vector<4x8x8xf32>
    %c2_78 = arith.constant 2 : index
    %c0_79 = arith.constant 0 : index
    %c0_80 = arith.constant 0 : index
    %123 = vector.load %arg7[%c2_78, %c0_79, %c0_80] : memref<8x32x8xf32, #tpu.memory_space<vmem>>, vector<1x32x8xf32>
    %124 = vector.shape_cast %123 : vector<1x32x8xf32> to vector<32x8xf32>
    %cst_81 = arith.constant dense<0.000000e+00> : vector<32x8xf32>
    %125 = tpu.matmul %29, %124, %cst_81 {dimension_numbers = #tpu.dot_dimension_numbers<[1], [0], [0], [1], [0, 0, 1, 1], [], []>} : vector<32x32xf32>, vector<32x8xf32>, vector<32x8xf32> -> vector<32x8xf32>
    %c2_82 = arith.constant 2 : index
    %c0_83 = arith.constant 0 : index
    %c0_84 = arith.constant 0 : index
    %126 = vector.load %arg8[%c2_82, %c0_83, %c0_84] : memref<8x1x8xf32, #tpu.memory_space<vmem>>, vector<1x1x8xf32>
    %127 = vector.shape_cast %126 : vector<1x1x8xf32> to vector<1x8xf32>
    %128 = vector.broadcast %127 : vector<1x8xf32> to vector<32x8xf32>
    %129 = arith.addf %125, %128 : vector<32x8xf32>
    %130 = vector.shape_cast %129 : vector<32x8xf32> to vector<4x8x8xf32>
    %c2_85 = arith.constant 2 : index
    %c0_86 = arith.constant 0 : index
    %c0_87 = arith.constant 0 : index
    %131 = vector.load %arg9[%c2_85, %c0_86, %c0_87] : memref<8x32x8xf32, #tpu.memory_space<vmem>>, vector<1x32x8xf32>
    %132 = vector.shape_cast %131 : vector<1x32x8xf32> to vector<32x8xf32>
    %cst_88 = arith.constant dense<0.000000e+00> : vector<32x8xf32>
    %133 = tpu.matmul %29, %132, %cst_88 {dimension_numbers = #tpu.dot_dimension_numbers<[1], [0], [0], [1], [0, 0, 1, 1], [], []>} : vector<32x32xf32>, vector<32x8xf32>, vector<32x8xf32> -> vector<32x8xf32>
    %c2_89 = arith.constant 2 : index
    %c0_90 = arith.constant 0 : index
    %c0_91 = arith.constant 0 : index
    %134 = vector.load %arg10[%c2_89, %c0_90, %c0_91] : memref<8x1x8xf32, #tpu.memory_space<vmem>>, vector<1x1x8xf32>
    %135 = vector.shape_cast %134 : vector<1x1x8xf32> to vector<1x8xf32>
    %136 = vector.broadcast %135 : vector<1x8xf32> to vector<32x8xf32>
    %137 = arith.addf %133, %136 : vector<32x8xf32>
    %138 = vector.shape_cast %137 : vector<32x8xf32> to vector<4x8x8xf32>
    "tpu.trace_start"() <{level = 10 : i32, message = "bqd,bkd->bqk"}> : () -> ()
    %cst_92 = arith.constant dense<0.000000e+00> : vector<4x8x8xf32>
    %139 = tpu.matmul %122, %130, %cst_92 {dimension_numbers = #tpu.dot_dimension_numbers<[2], [2], [1], [1], [0, 0, 0, 1, 1, 1], [0], [0]>} : vector<4x8x8xf32>, vector<4x8x8xf32>, vector<4x8x8xf32> -> vector<4x8x8xf32>
    "tpu.trace_stop"() : () -> ()
    %140 = vector.broadcast %3 : vector<1x8x8xf32> to vector<4x8x8xf32>
    %141 = arith.addf %139, %140 : vector<4x8x8xf32>
    %cst_93 = arith.constant dense<0xFF800000> : vector<4x8xf32>
    %142 = vector.multi_reduction <maximumf>, %141, %cst_93 [2] : vector<4x8x8xf32> to vector<4x8xf32>
    %143 = vector.shape_cast %142 : vector<4x8xf32> to vector<4x8x1xf32>
    %144 = vector.broadcast %143 : vector<4x8x1xf32> to vector<4x8x8xf32>
    %145 = arith.subf %141, %144 : vector<4x8x8xf32>
    %146 = math.exp %145 : vector<4x8x8xf32>
    %cst_94 = arith.constant dense<0.000000e+00> : vector<4x8xf32>
    %147 = vector.multi_reduction <add>, %146, %cst_94 [2] : vector<4x8x8xf32> to vector<4x8xf32>
    %148 = vector.shape_cast %147 : vector<4x8xf32> to vector<4x8x1xf32>
    %149 = vector.broadcast %148 : vector<4x8x1xf32> to vector<4x8x8xf32>
    %150 = arith.divf %146, %149 : vector<4x8x8xf32>
    "tpu.trace_start"() <{level = 10 : i32, message = "bqk,bkd->bqd"}> : () -> ()
    %cst_95 = arith.constant dense<0.000000e+00> : vector<4x8x8xf32>
    %151 = tpu.matmul %150, %138, %cst_95 {dimension_numbers = #tpu.dot_dimension_numbers<[2], [1], [1], [2], [0, 0, 0, 1, 1, 2], [0], [0]>} : vector<4x8x8xf32>, vector<4x8x8xf32>, vector<4x8x8xf32> -> vector<4x8x8xf32>
    "tpu.trace_stop"() : () -> ()
    %152 = vector.shape_cast %151 : vector<4x8x8xf32> to vector<32x8xf32>
    %c2_96 = arith.constant 2 : index
    %c0_97 = arith.constant 0 : index
    %c0_98 = arith.constant 0 : index
    %153 = vector.load %arg11[%c2_96, %c0_97, %c0_98] : memref<8x8x32xf32, #tpu.memory_space<vmem>>, vector<1x8x32xf32>
    %154 = vector.shape_cast %153 : vector<1x8x32xf32> to vector<8x32xf32>
    %cst_99 = arith.constant dense<0.000000e+00> : vector<32x32xf32>
    %155 = tpu.matmul %152, %154, %cst_99 {dimension_numbers = #tpu.dot_dimension_numbers<[1], [0], [0], [1], [0, 0, 1, 1], [], []>} : vector<32x8xf32>, vector<8x32xf32>, vector<32x32xf32> -> vector<32x32xf32>
    %156 = arith.addf %114, %155 : vector<32x32xf32>
    %c3 = arith.constant 3 : index
    %c0_100 = arith.constant 0 : index
    %c0_101 = arith.constant 0 : index
    %157 = vector.load %arg5[%c3, %c0_100, %c0_101] : memref<8x32x8xf32, #tpu.memory_space<vmem>>, vector<1x32x8xf32>
    %158 = vector.shape_cast %157 : vector<1x32x8xf32> to vector<32x8xf32>
    %cst_102 = arith.constant dense<0.000000e+00> : vector<32x8xf32>
    %159 = tpu.matmul %29, %158, %cst_102 {dimension_numbers = #tpu.dot_dimension_numbers<[1], [0], [0], [1], [0, 0, 1, 1], [], []>} : vector<32x32xf32>, vector<32x8xf32>, vector<32x8xf32> -> vector<32x8xf32>
    %c3_103 = arith.constant 3 : index
    %c0_104 = arith.constant 0 : index
    %c0_105 = arith.constant 0 : index
    %160 = vector.load %arg6[%c3_103, %c0_104, %c0_105] : memref<8x1x8xf32, #tpu.memory_space<vmem>>, vector<1x1x8xf32>
    %161 = vector.shape_cast %160 : vector<1x1x8xf32> to vector<1x8xf32>
    %162 = vector.broadcast %161 : vector<1x8xf32> to vector<32x8xf32>
    %163 = arith.addf %159, %162 : vector<32x8xf32>
    %164 = vector.shape_cast %163 : vector<32x8xf32> to vector<4x8x8xf32>
    %c3_106 = arith.constant 3 : index
    %c0_107 = arith.constant 0 : index
    %c0_108 = arith.constant 0 : index
    %165 = vector.load %arg7[%c3_106, %c0_107, %c0_108] : memref<8x32x8xf32, #tpu.memory_space<vmem>>, vector<1x32x8xf32>
    %166 = vector.shape_cast %165 : vector<1x32x8xf32> to vector<32x8xf32>
    %cst_109 = arith.constant dense<0.000000e+00> : vector<32x8xf32>
    %167 = tpu.matmul %29, %166, %cst_109 {dimension_numbers = #tpu.dot_dimension_numbers<[1], [0], [0], [1], [0, 0, 1, 1], [], []>} : vector<32x32xf32>, vector<32x8xf32>, vector<32x8xf32> -> vector<32x8xf32>
    %c3_110 = arith.constant 3 : index
    %c0_111 = arith.constant 0 : index
    %c0_112 = arith.constant 0 : index
    %168 = vector.load %arg8[%c3_110, %c0_111, %c0_112] : memref<8x1x8xf32, #tpu.memory_space<vmem>>, vector<1x1x8xf32>
    %169 = vector.shape_cast %168 : vector<1x1x8xf32> to vector<1x8xf32>
    %170 = vector.broadcast %169 : vector<1x8xf32> to vector<32x8xf32>
    %171 = arith.addf %167, %170 : vector<32x8xf32>
    %172 = vector.shape_cast %171 : vector<32x8xf32> to vector<4x8x8xf32>
    %c3_113 = arith.constant 3 : index
    %c0_114 = arith.constant 0 : index
    %c0_115 = arith.constant 0 : index
    %173 = vector.load %arg9[%c3_113, %c0_114, %c0_115] : memref<8x32x8xf32, #tpu.memory_space<vmem>>, vector<1x32x8xf32>
    %174 = vector.shape_cast %173 : vector<1x32x8xf32> to vector<32x8xf32>
    %cst_116 = arith.constant dense<0.000000e+00> : vector<32x8xf32>
    %175 = tpu.matmul %29, %174, %cst_116 {dimension_numbers = #tpu.dot_dimension_numbers<[1], [0], [0], [1], [0, 0, 1, 1], [], []>} : vector<32x32xf32>, vector<32x8xf32>, vector<32x8xf32> -> vector<32x8xf32>
    %c3_117 = arith.constant 3 : index
    %c0_118 = arith.constant 0 : index
    %c0_119 = arith.constant 0 : index
    %176 = vector.load %arg10[%c3_117, %c0_118, %c0_119] : memref<8x1x8xf32, #tpu.memory_space<vmem>>, vector<1x1x8xf32>
    %177 = vector.shape_cast %176 : vector<1x1x8xf32> to vector<1x8xf32>
    %178 = vector.broadcast %177 : vector<1x8xf32> to vector<32x8xf32>
    %179 = arith.addf %175, %178 : vector<32x8xf32>
    %180 = vector.shape_cast %179 : vector<32x8xf32> to vector<4x8x8xf32>
    "tpu.trace_start"() <{level = 10 : i32, message = "bqd,bkd->bqk"}> : () -> ()
    %cst_120 = arith.constant dense<0.000000e+00> : vector<4x8x8xf32>
    %181 = tpu.matmul %164, %172, %cst_120 {dimension_numbers = #tpu.dot_dimension_numbers<[2], [2], [1], [1], [0, 0, 0, 1, 1, 1], [0], [0]>} : vector<4x8x8xf32>, vector<4x8x8xf32>, vector<4x8x8xf32> -> vector<4x8x8xf32>
    "tpu.trace_stop"() : () -> ()
    %182 = vector.broadcast %3 : vector<1x8x8xf32> to vector<4x8x8xf32>
    %183 = arith.addf %181, %182 : vector<4x8x8xf32>
    %cst_121 = arith.constant dense<0xFF800000> : vector<4x8xf32>
    %184 = vector.multi_reduction <maximumf>, %183, %cst_121 [2] : vector<4x8x8xf32> to vector<4x8xf32>
    %185 = vector.shape_cast %184 : vector<4x8xf32> to vector<4x8x1xf32>
    %186 = vector.broadcast %185 : vector<4x8x1xf32> to vector<4x8x8xf32>
    %187 = arith.subf %183, %186 : vector<4x8x8xf32>
    %188 = math.exp %187 : vector<4x8x8xf32>
    %cst_122 = arith.constant dense<0.000000e+00> : vector<4x8xf32>
    %189 = vector.multi_reduction <add>, %188, %cst_122 [2] : vector<4x8x8xf32> to vector<4x8xf32>
    %190 = vector.shape_cast %189 : vector<4x8xf32> to vector<4x8x1xf32>
    %191 = vector.broadcast %190 : vector<4x8x1xf32> to vector<4x8x8xf32>
    %192 = arith.divf %188, %191 : vector<4x8x8xf32>
    "tpu.trace_start"() <{level = 10 : i32, message = "bqk,bkd->bqd"}> : () -> ()
    %cst_123 = arith.constant dense<0.000000e+00> : vector<4x8x8xf32>
    %193 = tpu.matmul %192, %180, %cst_123 {dimension_numbers = #tpu.dot_dimension_numbers<[2], [1], [1], [2], [0, 0, 0, 1, 1, 2], [0], [0]>} : vector<4x8x8xf32>, vector<4x8x8xf32>, vector<4x8x8xf32> -> vector<4x8x8xf32>
    "tpu.trace_stop"() : () -> ()
    %194 = vector.shape_cast %193 : vector<4x8x8xf32> to vector<32x8xf32>
    %c3_124 = arith.constant 3 : index
    %c0_125 = arith.constant 0 : index
    %c0_126 = arith.constant 0 : index
    %195 = vector.load %arg11[%c3_124, %c0_125, %c0_126] : memref<8x8x32xf32, #tpu.memory_space<vmem>>, vector<1x8x32xf32>
    %196 = vector.shape_cast %195 : vector<1x8x32xf32> to vector<8x32xf32>
    %cst_127 = arith.constant dense<0.000000e+00> : vector<32x32xf32>
    %197 = tpu.matmul %194, %196, %cst_127 {dimension_numbers = #tpu.dot_dimension_numbers<[1], [0], [0], [1], [0, 0, 1, 1], [], []>} : vector<32x8xf32>, vector<8x32xf32>, vector<32x32xf32> -> vector<32x32xf32>
    %198 = arith.addf %156, %197 : vector<32x32xf32>
    %199 = arith.addf %1, %198 : vector<32x32xf32>
    %c0_128 = arith.constant 0 : index
    %c0_129 = arith.constant 0 : index
    %c0_130 = arith.constant 0 : index
    %200 = vector.load %arg12[%c0_128, %c0_129, %c0_130] : memref<2x1x32xf32, #tpu.memory_space<vmem>>, vector<1x1x32xf32>
    %201 = vector.shape_cast %200 : vector<1x1x32xf32> to vector<1x32xf32>
    %202 = vector.broadcast %201 : vector<1x32xf32> to vector<32x32xf32>
    %203 = arith.addf %199, %202 : vector<32x32xf32>
    %c0_131 = arith.constant 0 : index
    %c0_132 = arith.constant 0 : index
    %c0_133 = arith.constant 0 : index
    %204 = vector.load %arg13[%c0_131, %c0_132, %c0_133] : memref<2x1x32xf32, #tpu.memory_space<vmem>>, vector<1x1x32xf32>
    %205 = vector.shape_cast %204 : vector<1x1x32xf32> to vector<1x32xf32>
    %c0_134 = arith.constant 0 : index
    %c0_135 = arith.constant 0 : index
    %c0_136 = arith.constant 0 : index
    %206 = vector.load %arg14[%c0_134, %c0_135, %c0_136] : memref<2x1x32xf32, #tpu.memory_space<vmem>>, vector<1x1x32xf32>
    %207 = vector.shape_cast %206 : vector<1x1x32xf32> to vector<1x32xf32>
    %cst_137 = arith.constant dense<0.000000e+00> : vector<32xf32>
    %208 = vector.multi_reduction <add>, %203, %cst_137 [1] : vector<32x32xf32> to vector<32xf32>
    %209 = vector.shape_cast %208 : vector<32xf32> to vector<32x1xf32>
    %cst_138 = arith.constant 3.200000e+01 : f32
    %210 = vector.broadcast %cst_138 : f32 to vector<32x1xf32>
    %211 = arith.divf %209, %210 : vector<32x1xf32>
    %212 = vector.broadcast %211 : vector<32x1xf32> to vector<32x32xf32>
    %213 = arith.subf %203, %212 : vector<32x32xf32>
    %214 = arith.mulf %213, %213 : vector<32x32xf32>
    %cst_139 = arith.constant dense<0.000000e+00> : vector<32xf32>
    %215 = vector.multi_reduction <add>, %214, %cst_139 [1] : vector<32x32xf32> to vector<32xf32>
    %216 = vector.shape_cast %215 : vector<32xf32> to vector<32x1xf32>
    %cst_140 = arith.constant 3.200000e+01 : f32
    %217 = vector.broadcast %cst_140 : f32 to vector<32x1xf32>
    %218 = arith.divf %216, %217 : vector<32x1xf32>
    %219 = vector.broadcast %211 : vector<32x1xf32> to vector<32x32xf32>
    %220 = arith.subf %203, %219 : vector<32x32xf32>
    %cst_141 = arith.constant 9.99999974E-6 : f32
    %221 = vector.broadcast %cst_141 : f32 to vector<32x1xf32>
    %222 = arith.addf %218, %221 : vector<32x1xf32>
    %223 = math.rsqrt %222 : vector<32x1xf32>
    %224 = vector.broadcast %223 : vector<32x1xf32> to vector<32x32xf32>
    %225 = arith.mulf %220, %224 : vector<32x32xf32>
    %226 = vector.broadcast %205 : vector<1x32xf32> to vector<32x32xf32>
    %227 = arith.mulf %225, %226 : vector<32x32xf32>
    %228 = vector.broadcast %207 : vector<1x32xf32> to vector<32x32xf32>
    %229 = arith.addf %227, %228 : vector<32x32xf32>
    %c0_142 = arith.constant 0 : index
    %c0_143 = arith.constant 0 : index
    %c0_144 = arith.constant 0 : index
    %230 = vector.load %arg15[%c0_142, %c0_143, %c0_144] : memref<2x32x128xf32, #tpu.memory_space<vmem>>, vector<1x32x128xf32>
    %231 = vector.shape_cast %230 : vector<1x32x128xf32> to vector<32x128xf32>
    %cst_145 = arith.constant dense<0.000000e+00> : vector<32x128xf32>
    %232 = tpu.matmul %229, %231, %cst_145 {dimension_numbers = #tpu.dot_dimension_numbers<[1], [0], [0], [1], [0, 0, 1, 1], [], []>} : vector<32x32xf32>, vector<32x128xf32>, vector<32x128xf32> -> vector<32x128xf32>
    %c0_146 = arith.constant 0 : index
    %c0_147 = arith.constant 0 : index
    %c0_148 = arith.constant 0 : index
    %233 = vector.load %arg16[%c0_146, %c0_147, %c0_148] : memref<2x1x128xf32, #tpu.memory_space<vmem>>, vector<1x1x128xf32>
    %234 = vector.shape_cast %233 : vector<1x1x128xf32> to vector<1x128xf32>
    %235 = vector.broadcast %234 : vector<1x128xf32> to vector<32x128xf32>
    %236 = arith.addf %232, %235 : vector<32x128xf32>
    %cst_149 = arith.constant -1.702000e+00 : f32
    %237 = vector.broadcast %cst_149 : f32 to vector<32x128xf32>
    %238 = arith.mulf %237, %236 : vector<32x128xf32>
    %239 = math.exp %238 : vector<32x128xf32>
    %cst_150 = arith.constant 1.000000e+00 : f32
    %240 = vector.broadcast %cst_150 : f32 to vector<32x128xf32>
    %241 = arith.addf %240, %239 : vector<32x128xf32>
    %242 = arith.divf %236, %241 : vector<32x128xf32>
    %c0_151 = arith.constant 0 : index
    %c0_152 = arith.constant 0 : index
    %c0_153 = arith.constant 0 : index
    %243 = vector.load %arg17[%c0_151, %c0_152, %c0_153] : memref<2x128x32xf32, #tpu.memory_space<vmem>>, vector<1x128x32xf32>
    %244 = vector.shape_cast %243 : vector<1x128x32xf32> to vector<128x32xf32>
    %cst_154 = arith.constant dense<0.000000e+00> : vector<32x32xf32>
    %245 = tpu.matmul %242, %244, %cst_154 {dimension_numbers = #tpu.dot_dimension_numbers<[1], [0], [0], [1], [0, 0, 1, 1], [], []>} : vector<32x128xf32>, vector<128x32xf32>, vector<32x32xf32> -> vector<32x32xf32>
    %246 = arith.addf %203, %245 : vector<32x32xf32>
    %c0_155 = arith.constant 0 : index
    %c0_156 = arith.constant 0 : index
    %c0_157 = arith.constant 0 : index
    %247 = vector.load %arg18[%c0_155, %c0_156, %c0_157] : memref<2x1x32xf32, #tpu.memory_space<vmem>>, vector<1x1x32xf32>
    %248 = vector.shape_cast %247 : vector<1x1x32xf32> to vector<1x32xf32>
    %249 = vector.broadcast %248 : vector<1x32xf32> to vector<32x32xf32>
    %250 = arith.addf %246, %249 : vector<32x32xf32>
    %c1_158 = arith.constant 1 : index
    %c0_159 = arith.constant 0 : index
    %c0_160 = arith.constant 0 : index
    %251 = vector.load %arg3[%c1_158, %c0_159, %c0_160] : memref<2x1x32xf32, #tpu.memory_space<vmem>>, vector<1x1x32xf32>
    %252 = vector.shape_cast %251 : vector<1x1x32xf32> to vector<1x32xf32>
    %c1_161 = arith.constant 1 : index
    %c0_162 = arith.constant 0 : index
    %c0_163 = arith.constant 0 : index
    %253 = vector.load %arg4[%c1_161, %c0_162, %c0_163] : memref<2x1x32xf32, #tpu.memory_space<vmem>>, vector<1x1x32xf32>
    %254 = vector.shape_cast %253 : vector<1x1x32xf32> to vector<1x32xf32>
    %cst_164 = arith.constant dense<0.000000e+00> : vector<32xf32>
    %255 = vector.multi_reduction <add>, %250, %cst_164 [1] : vector<32x32xf32> to vector<32xf32>
    %256 = vector.shape_cast %255 : vector<32xf32> to vector<32x1xf32>
    %cst_165 = arith.constant 3.200000e+01 : f32
    %257 = vector.broadcast %cst_165 : f32 to vector<32x1xf32>
    %258 = arith.divf %256, %257 : vector<32x1xf32>
    %259 = vector.broadcast %258 : vector<32x1xf32> to vector<32x32xf32>
    %260 = arith.subf %250, %259 : vector<32x32xf32>
    %261 = arith.mulf %260, %260 : vector<32x32xf32>
    %cst_166 = arith.constant dense<0.000000e+00> : vector<32xf32>
    %262 = vector.multi_reduction <add>, %261, %cst_166 [1] : vector<32x32xf32> to vector<32xf32>
    %263 = vector.shape_cast %262 : vector<32xf32> to vector<32x1xf32>
    %cst_167 = arith.constant 3.200000e+01 : f32
    %264 = vector.broadcast %cst_167 : f32 to vector<32x1xf32>
    %265 = arith.divf %263, %264 : vector<32x1xf32>
    %266 = vector.broadcast %258 : vector<32x1xf32> to vector<32x32xf32>
    %267 = arith.subf %250, %266 : vector<32x32xf32>
    %cst_168 = arith.constant 9.99999974E-6 : f32
    %268 = vector.broadcast %cst_168 : f32 to vector<32x1xf32>
    %269 = arith.addf %265, %268 : vector<32x1xf32>
    %270 = math.rsqrt %269 : vector<32x1xf32>
    %271 = vector.broadcast %270 : vector<32x1xf32> to vector<32x32xf32>
    %272 = arith.mulf %267, %271 : vector<32x32xf32>
    %273 = vector.broadcast %252 : vector<1x32xf32> to vector<32x32xf32>
    %274 = arith.mulf %272, %273 : vector<32x32xf32>
    %275 = vector.broadcast %254 : vector<1x32xf32> to vector<32x32xf32>
    %276 = arith.addf %274, %275 : vector<32x32xf32>
    %cst_169 = arith.constant 0.000000e+00 : f32
    %277 = vector.broadcast %cst_169 : f32 to vector<32x32xf32>
    %c4 = arith.constant 4 : index
    %c0_170 = arith.constant 0 : index
    %c0_171 = arith.constant 0 : index
    %278 = vector.load %arg5[%c4, %c0_170, %c0_171] : memref<8x32x8xf32, #tpu.memory_space<vmem>>, vector<1x32x8xf32>
    %279 = vector.shape_cast %278 : vector<1x32x8xf32> to vector<32x8xf32>
    %cst_172 = arith.constant dense<0.000000e+00> : vector<32x8xf32>
    %280 = tpu.matmul %276, %279, %cst_172 {dimension_numbers = #tpu.dot_dimension_numbers<[1], [0], [0], [1], [0, 0, 1, 1], [], []>} : vector<32x32xf32>, vector<32x8xf32>, vector<32x8xf32> -> vector<32x8xf32>
    %c4_173 = arith.constant 4 : index
    %c0_174 = arith.constant 0 : index
    %c0_175 = arith.constant 0 : index
    %281 = vector.load %arg6[%c4_173, %c0_174, %c0_175] : memref<8x1x8xf32, #tpu.memory_space<vmem>>, vector<1x1x8xf32>
    %282 = vector.shape_cast %281 : vector<1x1x8xf32> to vector<1x8xf32>
    %283 = vector.broadcast %282 : vector<1x8xf32> to vector<32x8xf32>
    %284 = arith.addf %280, %283 : vector<32x8xf32>
    %285 = vector.shape_cast %284 : vector<32x8xf32> to vector<4x8x8xf32>
    %c4_176 = arith.constant 4 : index
    %c0_177 = arith.constant 0 : index
    %c0_178 = arith.constant 0 : index
    %286 = vector.load %arg7[%c4_176, %c0_177, %c0_178] : memref<8x32x8xf32, #tpu.memory_space<vmem>>, vector<1x32x8xf32>
    %287 = vector.shape_cast %286 : vector<1x32x8xf32> to vector<32x8xf32>
    %cst_179 = arith.constant dense<0.000000e+00> : vector<32x8xf32>
    %288 = tpu.matmul %276, %287, %cst_179 {dimension_numbers = #tpu.dot_dimension_numbers<[1], [0], [0], [1], [0, 0, 1, 1], [], []>} : vector<32x32xf32>, vector<32x8xf32>, vector<32x8xf32> -> vector<32x8xf32>
    %c4_180 = arith.constant 4 : index
    %c0_181 = arith.constant 0 : index
    %c0_182 = arith.constant 0 : index
    %289 = vector.load %arg8[%c4_180, %c0_181, %c0_182] : memref<8x1x8xf32, #tpu.memory_space<vmem>>, vector<1x1x8xf32>
    %290 = vector.shape_cast %289 : vector<1x1x8xf32> to vector<1x8xf32>
    %291 = vector.broadcast %290 : vector<1x8xf32> to vector<32x8xf32>
    %292 = arith.addf %288, %291 : vector<32x8xf32>
    %293 = vector.shape_cast %292 : vector<32x8xf32> to vector<4x8x8xf32>
    %c4_183 = arith.constant 4 : index
    %c0_184 = arith.constant 0 : index
    %c0_185 = arith.constant 0 : index
    %294 = vector.load %arg9[%c4_183, %c0_184, %c0_185] : memref<8x32x8xf32, #tpu.memory_space<vmem>>, vector<1x32x8xf32>
    %295 = vector.shape_cast %294 : vector<1x32x8xf32> to vector<32x8xf32>
    %cst_186 = arith.constant dense<0.000000e+00> : vector<32x8xf32>
    %296 = tpu.matmul %276, %295, %cst_186 {dimension_numbers = #tpu.dot_dimension_numbers<[1], [0], [0], [1], [0, 0, 1, 1], [], []>} : vector<32x32xf32>, vector<32x8xf32>, vector<32x8xf32> -> vector<32x8xf32>
    %c4_187 = arith.constant 4 : index
    %c0_188 = arith.constant 0 : index
    %c0_189 = arith.constant 0 : index
    %297 = vector.load %arg10[%c4_187, %c0_188, %c0_189] : memref<8x1x8xf32, #tpu.memory_space<vmem>>, vector<1x1x8xf32>
    %298 = vector.shape_cast %297 : vector<1x1x8xf32> to vector<1x8xf32>
    %299 = vector.broadcast %298 : vector<1x8xf32> to vector<32x8xf32>
    %300 = arith.addf %296, %299 : vector<32x8xf32>
    %301 = vector.shape_cast %300 : vector<32x8xf32> to vector<4x8x8xf32>
    "tpu.trace_start"() <{level = 10 : i32, message = "bqd,bkd->bqk"}> : () -> ()
    %cst_190 = arith.constant dense<0.000000e+00> : vector<4x8x8xf32>
    %302 = tpu.matmul %285, %293, %cst_190 {dimension_numbers = #tpu.dot_dimension_numbers<[2], [2], [1], [1], [0, 0, 0, 1, 1, 1], [0], [0]>} : vector<4x8x8xf32>, vector<4x8x8xf32>, vector<4x8x8xf32> -> vector<4x8x8xf32>
    "tpu.trace_stop"() : () -> ()
    %303 = vector.broadcast %3 : vector<1x8x8xf32> to vector<4x8x8xf32>
    %304 = arith.addf %302, %303 : vector<4x8x8xf32>
    %cst_191 = arith.constant dense<0xFF800000> : vector<4x8xf32>
    %305 = vector.multi_reduction <maximumf>, %304, %cst_191 [2] : vector<4x8x8xf32> to vector<4x8xf32>
    %306 = vector.shape_cast %305 : vector<4x8xf32> to vector<4x8x1xf32>
    %307 = vector.broadcast %306 : vector<4x8x1xf32> to vector<4x8x8xf32>
    %308 = arith.subf %304, %307 : vector<4x8x8xf32>
    %309 = math.exp %308 : vector<4x8x8xf32>
    %cst_192 = arith.constant dense<0.000000e+00> : vector<4x8xf32>
    %310 = vector.multi_reduction <add>, %309, %cst_192 [2] : vector<4x8x8xf32> to vector<4x8xf32>
    %311 = vector.shape_cast %310 : vector<4x8xf32> to vector<4x8x1xf32>
    %312 = vector.broadcast %311 : vector<4x8x1xf32> to vector<4x8x8xf32>
    %313 = arith.divf %309, %312 : vector<4x8x8xf32>
    "tpu.trace_start"() <{level = 10 : i32, message = "bqk,bkd->bqd"}> : () -> ()
    %cst_193 = arith.constant dense<0.000000e+00> : vector<4x8x8xf32>
    %314 = tpu.matmul %313, %301, %cst_193 {dimension_numbers = #tpu.dot_dimension_numbers<[2], [1], [1], [2], [0, 0, 0, 1, 1, 2], [0], [0]>} : vector<4x8x8xf32>, vector<4x8x8xf32>, vector<4x8x8xf32> -> vector<4x8x8xf32>
    "tpu.trace_stop"() : () -> ()
    %315 = vector.shape_cast %314 : vector<4x8x8xf32> to vector<32x8xf32>
    %c4_194 = arith.constant 4 : index
    %c0_195 = arith.constant 0 : index
    %c0_196 = arith.constant 0 : index
    %316 = vector.load %arg11[%c4_194, %c0_195, %c0_196] : memref<8x8x32xf32, #tpu.memory_space<vmem>>, vector<1x8x32xf32>
    %317 = vector.shape_cast %316 : vector<1x8x32xf32> to vector<8x32xf32>
    %cst_197 = arith.constant dense<0.000000e+00> : vector<32x32xf32>
    %318 = tpu.matmul %315, %317, %cst_197 {dimension_numbers = #tpu.dot_dimension_numbers<[1], [0], [0], [1], [0, 0, 1, 1], [], []>} : vector<32x8xf32>, vector<8x32xf32>, vector<32x32xf32> -> vector<32x32xf32>
    %319 = arith.addf %277, %318 : vector<32x32xf32>
    %c5 = arith.constant 5 : index
    %c0_198 = arith.constant 0 : index
    %c0_199 = arith.constant 0 : index
    %320 = vector.load %arg5[%c5, %c0_198, %c0_199] : memref<8x32x8xf32, #tpu.memory_space<vmem>>, vector<1x32x8xf32>
    %321 = vector.shape_cast %320 : vector<1x32x8xf32> to vector<32x8xf32>
    %cst_200 = arith.constant dense<0.000000e+00> : vector<32x8xf32>
    %322 = tpu.matmul %276, %321, %cst_200 {dimension_numbers = #tpu.dot_dimension_numbers<[1], [0], [0], [1], [0, 0, 1, 1], [], []>} : vector<32x32xf32>, vector<32x8xf32>, vector<32x8xf32> -> vector<32x8xf32>
    %c5_201 = arith.constant 5 : index
    %c0_202 = arith.constant 0 : index
    %c0_203 = arith.constant 0 : index
    %323 = vector.load %arg6[%c5_201, %c0_202, %c0_203] : memref<8x1x8xf32, #tpu.memory_space<vmem>>, vector<1x1x8xf32>
    %324 = vector.shape_cast %323 : vector<1x1x8xf32> to vector<1x8xf32>
    %325 = vector.broadcast %324 : vector<1x8xf32> to vector<32x8xf32>
    %326 = arith.addf %322, %325 : vector<32x8xf32>
    %327 = vector.shape_cast %326 : vector<32x8xf32> to vector<4x8x8xf32>
    %c5_204 = arith.constant 5 : index
    %c0_205 = arith.constant 0 : index
    %c0_206 = arith.constant 0 : index
    %328 = vector.load %arg7[%c5_204, %c0_205, %c0_206] : memref<8x32x8xf32, #tpu.memory_space<vmem>>, vector<1x32x8xf32>
    %329 = vector.shape_cast %328 : vector<1x32x8xf32> to vector<32x8xf32>
    %cst_207 = arith.constant dense<0.000000e+00> : vector<32x8xf32>
    %330 = tpu.matmul %276, %329, %cst_207 {dimension_numbers = #tpu.dot_dimension_numbers<[1], [0], [0], [1], [0, 0, 1, 1], [], []>} : vector<32x32xf32>, vector<32x8xf32>, vector<32x8xf32> -> vector<32x8xf32>
    %c5_208 = arith.constant 5 : index
    %c0_209 = arith.constant 0 : index
    %c0_210 = arith.constant 0 : index
    %331 = vector.load %arg8[%c5_208, %c0_209, %c0_210] : memref<8x1x8xf32, #tpu.memory_space<vmem>>, vector<1x1x8xf32>
    %332 = vector.shape_cast %331 : vector<1x1x8xf32> to vector<1x8xf32>
    %333 = vector.broadcast %332 : vector<1x8xf32> to vector<32x8xf32>
    %334 = arith.addf %330, %333 : vector<32x8xf32>
    %335 = vector.shape_cast %334 : vector<32x8xf32> to vector<4x8x8xf32>
    %c5_211 = arith.constant 5 : index
    %c0_212 = arith.constant 0 : index
    %c0_213 = arith.constant 0 : index
    %336 = vector.load %arg9[%c5_211, %c0_212, %c0_213] : memref<8x32x8xf32, #tpu.memory_space<vmem>>, vector<1x32x8xf32>
    %337 = vector.shape_cast %336 : vector<1x32x8xf32> to vector<32x8xf32>
    %cst_214 = arith.constant dense<0.000000e+00> : vector<32x8xf32>
    %338 = tpu.matmul %276, %337, %cst_214 {dimension_numbers = #tpu.dot_dimension_numbers<[1], [0], [0], [1], [0, 0, 1, 1], [], []>} : vector<32x32xf32>, vector<32x8xf32>, vector<32x8xf32> -> vector<32x8xf32>
    %c5_215 = arith.constant 5 : index
    %c0_216 = arith.constant 0 : index
    %c0_217 = arith.constant 0 : index
    %339 = vector.load %arg10[%c5_215, %c0_216, %c0_217] : memref<8x1x8xf32, #tpu.memory_space<vmem>>, vector<1x1x8xf32>
    %340 = vector.shape_cast %339 : vector<1x1x8xf32> to vector<1x8xf32>
    %341 = vector.broadcast %340 : vector<1x8xf32> to vector<32x8xf32>
    %342 = arith.addf %338, %341 : vector<32x8xf32>
    %343 = vector.shape_cast %342 : vector<32x8xf32> to vector<4x8x8xf32>
    "tpu.trace_start"() <{level = 10 : i32, message = "bqd,bkd->bqk"}> : () -> ()
    %cst_218 = arith.constant dense<0.000000e+00> : vector<4x8x8xf32>
    %344 = tpu.matmul %327, %335, %cst_218 {dimension_numbers = #tpu.dot_dimension_numbers<[2], [2], [1], [1], [0, 0, 0, 1, 1, 1], [0], [0]>} : vector<4x8x8xf32>, vector<4x8x8xf32>, vector<4x8x8xf32> -> vector<4x8x8xf32>
    "tpu.trace_stop"() : () -> ()
    %345 = vector.broadcast %3 : vector<1x8x8xf32> to vector<4x8x8xf32>
    %346 = arith.addf %344, %345 : vector<4x8x8xf32>
    %cst_219 = arith.constant dense<0xFF800000> : vector<4x8xf32>
    %347 = vector.multi_reduction <maximumf>, %346, %cst_219 [2] : vector<4x8x8xf32> to vector<4x8xf32>
    %348 = vector.shape_cast %347 : vector<4x8xf32> to vector<4x8x1xf32>
    %349 = vector.broadcast %348 : vector<4x8x1xf32> to vector<4x8x8xf32>
    %350 = arith.subf %346, %349 : vector<4x8x8xf32>
    %351 = math.exp %350 : vector<4x8x8xf32>
    %cst_220 = arith.constant dense<0.000000e+00> : vector<4x8xf32>
    %352 = vector.multi_reduction <add>, %351, %cst_220 [2] : vector<4x8x8xf32> to vector<4x8xf32>
    %353 = vector.shape_cast %352 : vector<4x8xf32> to vector<4x8x1xf32>
    %354 = vector.broadcast %353 : vector<4x8x1xf32> to vector<4x8x8xf32>
    %355 = arith.divf %351, %354 : vector<4x8x8xf32>
    "tpu.trace_start"() <{level = 10 : i32, message = "bqk,bkd->bqd"}> : () -> ()
    %cst_221 = arith.constant dense<0.000000e+00> : vector<4x8x8xf32>
    %356 = tpu.matmul %355, %343, %cst_221 {dimension_numbers = #tpu.dot_dimension_numbers<[2], [1], [1], [2], [0, 0, 0, 1, 1, 2], [0], [0]>} : vector<4x8x8xf32>, vector<4x8x8xf32>, vector<4x8x8xf32> -> vector<4x8x8xf32>
    "tpu.trace_stop"() : () -> ()
    %357 = vector.shape_cast %356 : vector<4x8x8xf32> to vector<32x8xf32>
    %c5_222 = arith.constant 5 : index
    %c0_223 = arith.constant 0 : index
    %c0_224 = arith.constant 0 : index
    %358 = vector.load %arg11[%c5_222, %c0_223, %c0_224] : memref<8x8x32xf32, #tpu.memory_space<vmem>>, vector<1x8x32xf32>
    %359 = vector.shape_cast %358 : vector<1x8x32xf32> to vector<8x32xf32>
    %cst_225 = arith.constant dense<0.000000e+00> : vector<32x32xf32>
    %360 = tpu.matmul %357, %359, %cst_225 {dimension_numbers = #tpu.dot_dimension_numbers<[1], [0], [0], [1], [0, 0, 1, 1], [], []>} : vector<32x8xf32>, vector<8x32xf32>, vector<32x32xf32> -> vector<32x32xf32>
    %361 = arith.addf %319, %360 : vector<32x32xf32>
    %c6 = arith.constant 6 : index
    %c0_226 = arith.constant 0 : index
    %c0_227 = arith.constant 0 : index
    %362 = vector.load %arg5[%c6, %c0_226, %c0_227] : memref<8x32x8xf32, #tpu.memory_space<vmem>>, vector<1x32x8xf32>
    %363 = vector.shape_cast %362 : vector<1x32x8xf32> to vector<32x8xf32>
    %cst_228 = arith.constant dense<0.000000e+00> : vector<32x8xf32>
    %364 = tpu.matmul %276, %363, %cst_228 {dimension_numbers = #tpu.dot_dimension_numbers<[1], [0], [0], [1], [0, 0, 1, 1], [], []>} : vector<32x32xf32>, vector<32x8xf32>, vector<32x8xf32> -> vector<32x8xf32>
    %c6_229 = arith.constant 6 : index
    %c0_230 = arith.constant 0 : index
    %c0_231 = arith.constant 0 : index
    %365 = vector.load %arg6[%c6_229, %c0_230, %c0_231] : memref<8x1x8xf32, #tpu.memory_space<vmem>>, vector<1x1x8xf32>
    %366 = vector.shape_cast %365 : vector<1x1x8xf32> to vector<1x8xf32>
    %367 = vector.broadcast %366 : vector<1x8xf32> to vector<32x8xf32>
    %368 = arith.addf %364, %367 : vector<32x8xf32>
    %369 = vector.shape_cast %368 : vector<32x8xf32> to vector<4x8x8xf32>
    %c6_232 = arith.constant 6 : index
    %c0_233 = arith.constant 0 : index
    %c0_234 = arith.constant 0 : index
    %370 = vector.load %arg7[%c6_232, %c0_233, %c0_234] : memref<8x32x8xf32, #tpu.memory_space<vmem>>, vector<1x32x8xf32>
    %371 = vector.shape_cast %370 : vector<1x32x8xf32> to vector<32x8xf32>
    %cst_235 = arith.constant dense<0.000000e+00> : vector<32x8xf32>
    %372 = tpu.matmul %276, %371, %cst_235 {dimension_numbers = #tpu.dot_dimension_numbers<[1], [0], [0], [1], [0, 0, 1, 1], [], []>} : vector<32x32xf32>, vector<32x8xf32>, vector<32x8xf32> -> vector<32x8xf32>
    %c6_236 = arith.constant 6 : index
    %c0_237 = arith.constant 0 : index
    %c0_238 = arith.constant 0 : index
    %373 = vector.load %arg8[%c6_236, %c0_237, %c0_238] : memref<8x1x8xf32, #tpu.memory_space<vmem>>, vector<1x1x8xf32>
    %374 = vector.shape_cast %373 : vector<1x1x8xf32> to vector<1x8xf32>
    %375 = vector.broadcast %374 : vector<1x8xf32> to vector<32x8xf32>
    %376 = arith.addf %372, %375 : vector<32x8xf32>
    %377 = vector.shape_cast %376 : vector<32x8xf32> to vector<4x8x8xf32>
    %c6_239 = arith.constant 6 : index
    %c0_240 = arith.constant 0 : index
    %c0_241 = arith.constant 0 : index
    %378 = vector.load %arg9[%c6_239, %c0_240, %c0_241] : memref<8x32x8xf32, #tpu.memory_space<vmem>>, vector<1x32x8xf32>
    %379 = vector.shape_cast %378 : vector<1x32x8xf32> to vector<32x8xf32>
    %cst_242 = arith.constant dense<0.000000e+00> : vector<32x8xf32>
    %380 = tpu.matmul %276, %379, %cst_242 {dimension_numbers = #tpu.dot_dimension_numbers<[1], [0], [0], [1], [0, 0, 1, 1], [], []>} : vector<32x32xf32>, vector<32x8xf32>, vector<32x8xf32> -> vector<32x8xf32>
    %c6_243 = arith.constant 6 : index
    %c0_244 = arith.constant 0 : index
    %c0_245 = arith.constant 0 : index
    %381 = vector.load %arg10[%c6_243, %c0_244, %c0_245] : memref<8x1x8xf32, #tpu.memory_space<vmem>>, vector<1x1x8xf32>
    %382 = vector.shape_cast %381 : vector<1x1x8xf32> to vector<1x8xf32>
    %383 = vector.broadcast %382 : vector<1x8xf32> to vector<32x8xf32>
    %384 = arith.addf %380, %383 : vector<32x8xf32>
    %385 = vector.shape_cast %384 : vector<32x8xf32> to vector<4x8x8xf32>
    "tpu.trace_start"() <{level = 10 : i32, message = "bqd,bkd->bqk"}> : () -> ()
    %cst_246 = arith.constant dense<0.000000e+00> : vector<4x8x8xf32>
    %386 = tpu.matmul %369, %377, %cst_246 {dimension_numbers = #tpu.dot_dimension_numbers<[2], [2], [1], [1], [0, 0, 0, 1, 1, 1], [0], [0]>} : vector<4x8x8xf32>, vector<4x8x8xf32>, vector<4x8x8xf32> -> vector<4x8x8xf32>
    "tpu.trace_stop"() : () -> ()
    %387 = vector.broadcast %3 : vector<1x8x8xf32> to vector<4x8x8xf32>
    %388 = arith.addf %386, %387 : vector<4x8x8xf32>
    %cst_247 = arith.constant dense<0xFF800000> : vector<4x8xf32>
    %389 = vector.multi_reduction <maximumf>, %388, %cst_247 [2] : vector<4x8x8xf32> to vector<4x8xf32>
    %390 = vector.shape_cast %389 : vector<4x8xf32> to vector<4x8x1xf32>
    %391 = vector.broadcast %390 : vector<4x8x1xf32> to vector<4x8x8xf32>
    %392 = arith.subf %388, %391 : vector<4x8x8xf32>
    %393 = math.exp %392 : vector<4x8x8xf32>
    %cst_248 = arith.constant dense<0.000000e+00> : vector<4x8xf32>
    %394 = vector.multi_reduction <add>, %393, %cst_248 [2] : vector<4x8x8xf32> to vector<4x8xf32>
    %395 = vector.shape_cast %394 : vector<4x8xf32> to vector<4x8x1xf32>
    %396 = vector.broadcast %395 : vector<4x8x1xf32> to vector<4x8x8xf32>
    %397 = arith.divf %393, %396 : vector<4x8x8xf32>
    "tpu.trace_start"() <{level = 10 : i32, message = "bqk,bkd->bqd"}> : () -> ()
    %cst_249 = arith.constant dense<0.000000e+00> : vector<4x8x8xf32>
    %398 = tpu.matmul %397, %385, %cst_249 {dimension_numbers = #tpu.dot_dimension_numbers<[2], [1], [1], [2], [0, 0, 0, 1, 1, 2], [0], [0]>} : vector<4x8x8xf32>, vector<4x8x8xf32>, vector<4x8x8xf32> -> vector<4x8x8xf32>
    "tpu.trace_stop"() : () -> ()
    %399 = vector.shape_cast %398 : vector<4x8x8xf32> to vector<32x8xf32>
    %c6_250 = arith.constant 6 : index
    %c0_251 = arith.constant 0 : index
    %c0_252 = arith.constant 0 : index
    %400 = vector.load %arg11[%c6_250, %c0_251, %c0_252] : memref<8x8x32xf32, #tpu.memory_space<vmem>>, vector<1x8x32xf32>
    %401 = vector.shape_cast %400 : vector<1x8x32xf32> to vector<8x32xf32>
    %cst_253 = arith.constant dense<0.000000e+00> : vector<32x32xf32>
    %402 = tpu.matmul %399, %401, %cst_253 {dimension_numbers = #tpu.dot_dimension_numbers<[1], [0], [0], [1], [0, 0, 1, 1], [], []>} : vector<32x8xf32>, vector<8x32xf32>, vector<32x32xf32> -> vector<32x32xf32>
    %403 = arith.addf %361, %402 : vector<32x32xf32>
    %c7 = arith.constant 7 : index
    %c0_254 = arith.constant 0 : index
    %c0_255 = arith.constant 0 : index
    %404 = vector.load %arg5[%c7, %c0_254, %c0_255] : memref<8x32x8xf32, #tpu.memory_space<vmem>>, vector<1x32x8xf32>
    %405 = vector.shape_cast %404 : vector<1x32x8xf32> to vector<32x8xf32>
    %cst_256 = arith.constant dense<0.000000e+00> : vector<32x8xf32>
    %406 = tpu.matmul %276, %405, %cst_256 {dimension_numbers = #tpu.dot_dimension_numbers<[1], [0], [0], [1], [0, 0, 1, 1], [], []>} : vector<32x32xf32>, vector<32x8xf32>, vector<32x8xf32> -> vector<32x8xf32>
    %c7_257 = arith.constant 7 : index
    %c0_258 = arith.constant 0 : index
    %c0_259 = arith.constant 0 : index
    %407 = vector.load %arg6[%c7_257, %c0_258, %c0_259] : memref<8x1x8xf32, #tpu.memory_space<vmem>>, vector<1x1x8xf32>
    %408 = vector.shape_cast %407 : vector<1x1x8xf32> to vector<1x8xf32>
    %409 = vector.broadcast %408 : vector<1x8xf32> to vector<32x8xf32>
    %410 = arith.addf %406, %409 : vector<32x8xf32>
    %411 = vector.shape_cast %410 : vector<32x8xf32> to vector<4x8x8xf32>
    %c7_260 = arith.constant 7 : index
    %c0_261 = arith.constant 0 : index
    %c0_262 = arith.constant 0 : index
    %412 = vector.load %arg7[%c7_260, %c0_261, %c0_262] : memref<8x32x8xf32, #tpu.memory_space<vmem>>, vector<1x32x8xf32>
    %413 = vector.shape_cast %412 : vector<1x32x8xf32> to vector<32x8xf32>
    %cst_263 = arith.constant dense<0.000000e+00> : vector<32x8xf32>
    %414 = tpu.matmul %276, %413, %cst_263 {dimension_numbers = #tpu.dot_dimension_numbers<[1], [0], [0], [1], [0, 0, 1, 1], [], []>} : vector<32x32xf32>, vector<32x8xf32>, vector<32x8xf32> -> vector<32x8xf32>
    %c7_264 = arith.constant 7 : index
    %c0_265 = arith.constant 0 : index
    %c0_266 = arith.constant 0 : index
    %415 = vector.load %arg8[%c7_264, %c0_265, %c0_266] : memref<8x1x8xf32, #tpu.memory_space<vmem>>, vector<1x1x8xf32>
    %416 = vector.shape_cast %415 : vector<1x1x8xf32> to vector<1x8xf32>
    %417 = vector.broadcast %416 : vector<1x8xf32> to vector<32x8xf32>
    %418 = arith.addf %414, %417 : vector<32x8xf32>
    %419 = vector.shape_cast %418 : vector<32x8xf32> to vector<4x8x8xf32>
    %c7_267 = arith.constant 7 : index
    %c0_268 = arith.constant 0 : index
    %c0_269 = arith.constant 0 : index
    %420 = vector.load %arg9[%c7_267, %c0_268, %c0_269] : memref<8x32x8xf32, #tpu.memory_space<vmem>>, vector<1x32x8xf32>
    %421 = vector.shape_cast %420 : vector<1x32x8xf32> to vector<32x8xf32>
    %cst_270 = arith.constant dense<0.000000e+00> : vector<32x8xf32>
    %422 = tpu.matmul %276, %421, %cst_270 {dimension_numbers = #tpu.dot_dimension_numbers<[1], [0], [0], [1], [0, 0, 1, 1], [], []>} : vector<32x32xf32>, vector<32x8xf32>, vector<32x8xf32> -> vector<32x8xf32>
    %c7_271 = arith.constant 7 : index
    %c0_272 = arith.constant 0 : index
    %c0_273 = arith.constant 0 : index
    %423 = vector.load %arg10[%c7_271, %c0_272, %c0_273] : memref<8x1x8xf32, #tpu.memory_space<vmem>>, vector<1x1x8xf32>
    %424 = vector.shape_cast %423 : vector<1x1x8xf32> to vector<1x8xf32>
    %425 = vector.broadcast %424 : vector<1x8xf32> to vector<32x8xf32>
    %426 = arith.addf %422, %425 : vector<32x8xf32>
    %427 = vector.shape_cast %426 : vector<32x8xf32> to vector<4x8x8xf32>
    "tpu.trace_start"() <{level = 10 : i32, message = "bqd,bkd->bqk"}> : () -> ()
    %cst_274 = arith.constant dense<0.000000e+00> : vector<4x8x8xf32>
    %428 = tpu.matmul %411, %419, %cst_274 {dimension_numbers = #tpu.dot_dimension_numbers<[2], [2], [1], [1], [0, 0, 0, 1, 1, 1], [0], [0]>} : vector<4x8x8xf32>, vector<4x8x8xf32>, vector<4x8x8xf32> -> vector<4x8x8xf32>
    "tpu.trace_stop"() : () -> ()
    %429 = vector.broadcast %3 : vector<1x8x8xf32> to vector<4x8x8xf32>
    %430 = arith.addf %428, %429 : vector<4x8x8xf32>
    %cst_275 = arith.constant dense<0xFF800000> : vector<4x8xf32>
    %431 = vector.multi_reduction <maximumf>, %430, %cst_275 [2] : vector<4x8x8xf32> to vector<4x8xf32>
    %432 = vector.shape_cast %431 : vector<4x8xf32> to vector<4x8x1xf32>
    %433 = vector.broadcast %432 : vector<4x8x1xf32> to vector<4x8x8xf32>
    %434 = arith.subf %430, %433 : vector<4x8x8xf32>
    %435 = math.exp %434 : vector<4x8x8xf32>
    %cst_276 = arith.constant dense<0.000000e+00> : vector<4x8xf32>
    %436 = vector.multi_reduction <add>, %435, %cst_276 [2] : vector<4x8x8xf32> to vector<4x8xf32>
    %437 = vector.shape_cast %436 : vector<4x8xf32> to vector<4x8x1xf32>
    %438 = vector.broadcast %437 : vector<4x8x1xf32> to vector<4x8x8xf32>
    %439 = arith.divf %435, %438 : vector<4x8x8xf32>
    "tpu.trace_start"() <{level = 10 : i32, message = "bqk,bkd->bqd"}> : () -> ()
    %cst_277 = arith.constant dense<0.000000e+00> : vector<4x8x8xf32>
    %440 = tpu.matmul %439, %427, %cst_277 {dimension_numbers = #tpu.dot_dimension_numbers<[2], [1], [1], [2], [0, 0, 0, 1, 1, 2], [0], [0]>} : vector<4x8x8xf32>, vector<4x8x8xf32>, vector<4x8x8xf32> -> vector<4x8x8xf32>
    "tpu.trace_stop"() : () -> ()
    %441 = vector.shape_cast %440 : vector<4x8x8xf32> to vector<32x8xf32>
    %c7_278 = arith.constant 7 : index
    %c0_279 = arith.constant 0 : index
    %c0_280 = arith.constant 0 : index
    %442 = vector.load %arg11[%c7_278, %c0_279, %c0_280] : memref<8x8x32xf32, #tpu.memory_space<vmem>>, vector<1x8x32xf32>
    %443 = vector.shape_cast %442 : vector<1x8x32xf32> to vector<8x32xf32>
    %cst_281 = arith.constant dense<0.000000e+00> : vector<32x32xf32>
    %444 = tpu.matmul %441, %443, %cst_281 {dimension_numbers = #tpu.dot_dimension_numbers<[1], [0], [0], [1], [0, 0, 1, 1], [], []>} : vector<32x8xf32>, vector<8x32xf32>, vector<32x32xf32> -> vector<32x32xf32>
    %445 = arith.addf %403, %444 : vector<32x32xf32>
    %446 = arith.addf %250, %445 : vector<32x32xf32>
    %c1_282 = arith.constant 1 : index
    %c0_283 = arith.constant 0 : index
    %c0_284 = arith.constant 0 : index
    %447 = vector.load %arg12[%c1_282, %c0_283, %c0_284] : memref<2x1x32xf32, #tpu.memory_space<vmem>>, vector<1x1x32xf32>
    %448 = vector.shape_cast %447 : vector<1x1x32xf32> to vector<1x32xf32>
    %449 = vector.broadcast %448 : vector<1x32xf32> to vector<32x32xf32>
    %450 = arith.addf %446, %449 : vector<32x32xf32>
    %c1_285 = arith.constant 1 : index
    %c0_286 = arith.constant 0 : index
    %c0_287 = arith.constant 0 : index
    %451 = vector.load %arg13[%c1_285, %c0_286, %c0_287] : memref<2x1x32xf32, #tpu.memory_space<vmem>>, vector<1x1x32xf32>
    %452 = vector.shape_cast %451 : vector<1x1x32xf32> to vector<1x32xf32>
    %c1_288 = arith.constant 1 : index
    %c0_289 = arith.constant 0 : index
    %c0_290 = arith.constant 0 : index
    %453 = vector.load %arg14[%c1_288, %c0_289, %c0_290] : memref<2x1x32xf32, #tpu.memory_space<vmem>>, vector<1x1x32xf32>
    %454 = vector.shape_cast %453 : vector<1x1x32xf32> to vector<1x32xf32>
    %cst_291 = arith.constant dense<0.000000e+00> : vector<32xf32>
    %455 = vector.multi_reduction <add>, %450, %cst_291 [1] : vector<32x32xf32> to vector<32xf32>
    %456 = vector.shape_cast %455 : vector<32xf32> to vector<32x1xf32>
    %cst_292 = arith.constant 3.200000e+01 : f32
    %457 = vector.broadcast %cst_292 : f32 to vector<32x1xf32>
    %458 = arith.divf %456, %457 : vector<32x1xf32>
    %459 = vector.broadcast %458 : vector<32x1xf32> to vector<32x32xf32>
    %460 = arith.subf %450, %459 : vector<32x32xf32>
    %461 = arith.mulf %460, %460 : vector<32x32xf32>
    %cst_293 = arith.constant dense<0.000000e+00> : vector<32xf32>
    %462 = vector.multi_reduction <add>, %461, %cst_293 [1] : vector<32x32xf32> to vector<32xf32>
    %463 = vector.shape_cast %462 : vector<32xf32> to vector<32x1xf32>
    %cst_294 = arith.constant 3.200000e+01 : f32
    %464 = vector.broadcast %cst_294 : f32 to vector<32x1xf32>
    %465 = arith.divf %463, %464 : vector<32x1xf32>
    %466 = vector.broadcast %458 : vector<32x1xf32> to vector<32x32xf32>
    %467 = arith.subf %450, %466 : vector<32x32xf32>
    %cst_295 = arith.constant 9.99999974E-6 : f32
    %468 = vector.broadcast %cst_295 : f32 to vector<32x1xf32>
    %469 = arith.addf %465, %468 : vector<32x1xf32>
    %470 = math.rsqrt %469 : vector<32x1xf32>
    %471 = vector.broadcast %470 : vector<32x1xf32> to vector<32x32xf32>
    %472 = arith.mulf %467, %471 : vector<32x32xf32>
    %473 = vector.broadcast %452 : vector<1x32xf32> to vector<32x32xf32>
    %474 = arith.mulf %472, %473 : vector<32x32xf32>
    %475 = vector.broadcast %454 : vector<1x32xf32> to vector<32x32xf32>
    %476 = arith.addf %474, %475 : vector<32x32xf32>
    %c1_296 = arith.constant 1 : index
    %c0_297 = arith.constant 0 : index
    %c0_298 = arith.constant 0 : index
    %477 = vector.load %arg15[%c1_296, %c0_297, %c0_298] : memref<2x32x128xf32, #tpu.memory_space<vmem>>, vector<1x32x128xf32>
    %478 = vector.shape_cast %477 : vector<1x32x128xf32> to vector<32x128xf32>
    %cst_299 = arith.constant dense<0.000000e+00> : vector<32x128xf32>
    %479 = tpu.matmul %476, %478, %cst_299 {dimension_numbers = #tpu.dot_dimension_numbers<[1], [0], [0], [1], [0, 0, 1, 1], [], []>} : vector<32x32xf32>, vector<32x128xf32>, vector<32x128xf32> -> vector<32x128xf32>
    %c1_300 = arith.constant 1 : index
    %c0_301 = arith.constant 0 : index
    %c0_302 = arith.constant 0 : index
    %480 = vector.load %arg16[%c1_300, %c0_301, %c0_302] : memref<2x1x128xf32, #tpu.memory_space<vmem>>, vector<1x1x128xf32>
    %481 = vector.shape_cast %480 : vector<1x1x128xf32> to vector<1x128xf32>
    %482 = vector.broadcast %481 : vector<1x128xf32> to vector<32x128xf32>
    %483 = arith.addf %479, %482 : vector<32x128xf32>
    %cst_303 = arith.constant -1.702000e+00 : f32
    %484 = vector.broadcast %cst_303 : f32 to vector<32x128xf32>
    %485 = arith.mulf %484, %483 : vector<32x128xf32>
    %486 = math.exp %485 : vector<32x128xf32>
    %cst_304 = arith.constant 1.000000e+00 : f32
    %487 = vector.broadcast %cst_304 : f32 to vector<32x128xf32>
    %488 = arith.addf %487, %486 : vector<32x128xf32>
    %489 = arith.divf %483, %488 : vector<32x128xf32>
    %c1_305 = arith.constant 1 : index
    %c0_306 = arith.constant 0 : index
    %c0_307 = arith.constant 0 : index
    %490 = vector.load %arg17[%c1_305, %c0_306, %c0_307] : memref<2x128x32xf32, #tpu.memory_space<vmem>>, vector<1x128x32xf32>
    %491 = vector.shape_cast %490 : vector<1x128x32xf32> to vector<128x32xf32>
    %cst_308 = arith.constant dense<0.000000e+00> : vector<32x32xf32>
    %492 = tpu.matmul %489, %491, %cst_308 {dimension_numbers = #tpu.dot_dimension_numbers<[1], [0], [0], [1], [0, 0, 1, 1], [], []>} : vector<32x128xf32>, vector<128x32xf32>, vector<32x32xf32> -> vector<32x32xf32>
    %493 = arith.addf %450, %492 : vector<32x32xf32>
    %c1_309 = arith.constant 1 : index
    %c0_310 = arith.constant 0 : index
    %c0_311 = arith.constant 0 : index
    %494 = vector.load %arg18[%c1_309, %c0_310, %c0_311] : memref<2x1x32xf32, #tpu.memory_space<vmem>>, vector<1x1x32xf32>
    %495 = vector.shape_cast %494 : vector<1x1x32xf32> to vector<1x32xf32>
    %496 = vector.broadcast %495 : vector<1x32xf32> to vector<32x32xf32>
    %497 = arith.addf %493, %496 : vector<32x32xf32>
    %c0_312 = arith.constant 0 : index
    %c0_313 = arith.constant 0 : index
    %498 = vector.load %arg19[%c0_312, %c0_313] : memref<1x32xf32, #tpu.memory_space<vmem>>, vector<1x32xf32>
    %c0_314 = arith.constant 0 : index
    %c0_315 = arith.constant 0 : index
    %499 = vector.load %arg20[%c0_314, %c0_315] : memref<1x32xf32, #tpu.memory_space<vmem>>, vector<1x32xf32>
    %cst_316 = arith.constant dense<0.000000e+00> : vector<32xf32>
    %500 = vector.multi_reduction <add>, %497, %cst_316 [1] : vector<32x32xf32> to vector<32xf32>
    %501 = vector.shape_cast %500 : vector<32xf32> to vector<32x1xf32>
    %cst_317 = arith.constant 3.200000e+01 : f32
    %502 = vector.broadcast %cst_317 : f32 to vector<32x1xf32>
    %503 = arith.divf %501, %502 : vector<32x1xf32>
    %504 = vector.broadcast %503 : vector<32x1xf32> to vector<32x32xf32>
    %505 = arith.subf %497, %504 : vector<32x32xf32>
    %506 = arith.mulf %505, %505 : vector<32x32xf32>
    %cst_318 = arith.constant dense<0.000000e+00> : vector<32xf32>
    %507 = vector.multi_reduction <add>, %506, %cst_318 [1] : vector<32x32xf32> to vector<32xf32>
    %508 = vector.shape_cast %507 : vector<32xf32> to vector<32x1xf32>
    %cst_319 = arith.constant 3.200000e+01 : f32
    %509 = vector.broadcast %cst_319 : f32 to vector<32x1xf32>
    %510 = arith.divf %508, %509 : vector<32x1xf32>
    %511 = vector.broadcast %503 : vector<32x1xf32> to vector<32x32xf32>
    %512 = arith.subf %497, %511 : vector<32x32xf32>
    %cst_320 = arith.constant 9.99999974E-6 : f32
    %513 = vector.broadcast %cst_320 : f32 to vector<32x1xf32>
    %514 = arith.addf %510, %513 : vector<32x1xf32>
    %515 = math.rsqrt %514 : vector<32x1xf32>
    %516 = vector.broadcast %515 : vector<32x1xf32> to vector<32x32xf32>
    %517 = arith.mulf %512, %516 : vector<32x32xf32>
    %518 = vector.broadcast %498 : vector<1x32xf32> to vector<32x32xf32>
    %519 = arith.mulf %517, %518 : vector<32x32xf32>
    %520 = vector.broadcast %499 : vector<1x32xf32> to vector<32x32xf32>
    %521 = arith.addf %519, %520 : vector<32x32xf32>
    %522 = vector.shape_cast %521 : vector<32x32xf32> to vector<4x8x32xf32>
    %c0_321 = arith.constant 0 : index
    %c0_322 = arith.constant 0 : index
    %523 = vector.load %arg2[%c0_321, %c0_322] : memref<4x8xf32, #tpu.memory_space<vmem>>, vector<4x8xf32>
    %524 = vector.shape_cast %523 : vector<4x8xf32> to vector<4x8x1xf32>
    %525 = vector.broadcast %524 : vector<4x8x1xf32> to vector<4x8x32xf32>
    %526 = arith.mulf %525, %522 : vector<4x8x32xf32>
    %cst_323 = arith.constant dense<0.000000e+00> : vector<4x32xf32>
    %527 = vector.multi_reduction <add>, %526, %cst_323 [1] : vector<4x8x32xf32> to vector<4x32xf32>
    %c0_324 = arith.constant 0 : index
    %c0_325 = arith.constant 0 : index
    %528 = vector.load %arg30[%c0_324, %c0_325] : memref<4x32xf32, #tpu.memory_space<vmem>>, vector<4x32xf32>
    tpu.vector_store %arg30[%c0_324, %c0_325], %527 {strides = array<i32>} : memref<4x32xf32, #tpu.memory_space<vmem>>, vector<4x32xf32>,
    %c0_326 = arith.constant 0 : index
    %c0_327 = arith.constant 0 : index
    %529 = vector.load %arg21[%c0_326, %c0_327] : memref<32x16xf32, #tpu.memory_space<vmem>>, vector<32x16xf32>
    %cst_328 = arith.constant dense<0.000000e+00> : vector<4x16xf32>
    %530 = tpu.matmul %527, %529, %cst_328 {dimension_numbers = #tpu.dot_dimension_numbers<[1], [0], [0], [1], [0, 0, 1, 1], [], []>} : vector<4x32xf32>, vector<32x16xf32>, vector<4x16xf32> -> vector<4x16xf32>
    %c0_329 = arith.constant 0 : index
    %c0_330 = arith.constant 0 : index
    %531 = vector.load %arg31[%c0_329, %c0_330] : memref<4x16xf32, #tpu.memory_space<vmem>>, vector<4x16xf32>
    tpu.vector_store %arg31[%c0_329, %c0_330], %530 {strides = array<i32>} : memref<4x16xf32, #tpu.memory_space<vmem>>, vector<4x16xf32>,
    %c0_331 = arith.constant 0 : index
    %c0_332 = arith.constant 0 : index
    %532 = vector.load %arg22[%c0_331, %c0_332] : memref<32x32xf32, #tpu.memory_space<vmem>>, vector<32x32xf32>
    %c0_333 = arith.constant 0 : index
    %c0_334 = arith.constant 0 : index
    %533 = vector.load %arg23[%c0_333, %c0_334] : memref<1x32xf32, #tpu.memory_space<vmem>>, vector<1x32xf32>
    %c0_335 = arith.constant 0 : index
    %c0_336 = arith.constant 0 : index
    %534 = vector.load %arg24[%c0_335, %c0_336] : memref<32x16xf32, #tpu.memory_space<vmem>>, vector<32x16xf32>
    %c0_337 = arith.constant 0 : index
    %c0_338 = arith.constant 0 : index
    %535 = vector.load %arg25[%c0_337, %c0_338] : memref<1x16xf32, #tpu.memory_space<vmem>>, vector<1x16xf32>
    %c0_339 = arith.constant 0 : index
    %c0_340 = arith.constant 0 : index
    %536 = vector.load %arg26[%c0_339, %c0_340] : memref<16x32xf32, #tpu.memory_space<vmem>>, vector<16x32xf32>
    %c0_341 = arith.constant 0 : index
    %c0_342 = arith.constant 0 : index
    %537 = vector.load %arg27[%c0_341, %c0_342] : memref<1x32xf32, #tpu.memory_space<vmem>>, vector<1x32xf32>
    %c0_343 = arith.constant 0 : index
    %c0_344 = arith.constant 0 : index
    %538 = vector.load %arg28[%c0_343, %c0_344] : memref<32x16xf32, #tpu.memory_space<vmem>>, vector<32x16xf32>
    %c0_345 = arith.constant 0 : index
    %c0_346 = arith.constant 0 : index
    %539 = vector.load %arg29[%c0_345, %c0_346] : memref<1x16xf32, #tpu.memory_space<vmem>>, vector<1x16xf32>
    %cst_347 = arith.constant dense<0.000000e+00> : vector<4x32xf32>
    %540 = tpu.matmul %527, %532, %cst_347 {dimension_numbers = #tpu.dot_dimension_numbers<[1], [0], [0], [1], [0, 0, 1, 1], [], []>} : vector<4x32xf32>, vector<32x32xf32>, vector<4x32xf32> -> vector<4x32xf32>
    %541 = vector.broadcast %533 : vector<1x32xf32> to vector<4x32xf32>
    %542 = arith.addf %540, %541 : vector<4x32xf32>
    %cst_348 = arith.constant 0.000000e+00 : f32
    %543 = vector.broadcast %cst_348 : f32 to vector<4x32xf32>
    %544 = arith.maximumf %542, %543 : vector<4x32xf32>
    %cst_349 = arith.constant dense<0.000000e+00> : vector<4x16xf32>
    %545 = tpu.matmul %544, %534, %cst_349 {dimension_numbers = #tpu.dot_dimension_numbers<[1], [0], [0], [1], [0, 0, 1, 1], [], []>} : vector<4x32xf32>, vector<32x16xf32>, vector<4x16xf32> -> vector<4x16xf32>
    %546 = vector.broadcast %535 : vector<1x16xf32> to vector<4x16xf32>
    %547 = arith.addf %545, %546 : vector<4x16xf32>
    %cst_350 = arith.constant dense<0.000000e+00> : vector<4x32xf32>
    %548 = tpu.matmul %547, %536, %cst_350 {dimension_numbers = #tpu.dot_dimension_numbers<[1], [0], [0], [1], [0, 0, 1, 1], [], []>} : vector<4x16xf32>, vector<16x32xf32>, vector<4x32xf32> -> vector<4x32xf32>
    %549 = vector.broadcast %537 : vector<1x32xf32> to vector<4x32xf32>
    %550 = arith.addf %548, %549 : vector<4x32xf32>
    %cst_351 = arith.constant 0.000000e+00 : f32
    %551 = vector.broadcast %cst_351 : f32 to vector<4x32xf32>
    %552 = arith.maximumf %550, %551 : vector<4x32xf32>
    %cst_352 = arith.constant dense<0.000000e+00> : vector<4x16xf32>
    %553 = tpu.matmul %552, %538, %cst_352 {dimension_numbers = #tpu.dot_dimension_numbers<[1], [0], [0], [1], [0, 0, 1, 1], [], []>} : vector<4x32xf32>, vector<32x16xf32>, vector<4x16xf32> -> vector<4x16xf32>
    %554 = vector.broadcast %539 : vector<1x16xf32> to vector<4x16xf32>
    %555 = arith.addf %553, %554 : vector<4x16xf32>
    %c0_353 = arith.constant 0 : index
    %c0_354 = arith.constant 0 : index
    %556 = vector.load %arg32[%c0_353, %c0_354] : memref<4x16xf32, #tpu.memory_space<vmem>>, vector<4x16xf32>
    tpu.vector_store %arg32[%c0_353, %c0_354], %547 {strides = array<i32>} : memref<4x16xf32, #tpu.memory_space<vmem>>, vector<4x16xf32>,
    %c0_355 = arith.constant 0 : index
    %c0_356 = arith.constant 0 : index
    %557 = vector.load %arg33[%c0_355, %c0_356] : memref<4x16xf32, #tpu.memory_space<vmem>>, vector<4x16xf32>
    tpu.vector_store %arg33[%c0_355, %c0_356], %555 {strides = array<i32>} : memref<4x16xf32, #tpu.memory_space<vmem>>, vector<4x16xf32>,
    return
  }
}

</mosaic_0001>

<bundles_post_ra>
// kernel: siamlip_forward.2
= control target key start
LH: loop header
LB: loop body
LE: loop exit
PB: predicated region body
PF: predicated region fallthrough
CT: control target
= control target key end

     0   :  { %vm1123_vm0 = vmmov 0   ;;  %vm370_vm1 = vcmask 257024   ;;  %vm376_vm2 = vcmask 261120   ;;  %vm450_vm3 = vcmask 125952   ;;  %s1609_s1 = inlined_call_operand.vmem [shape: f32[768,32], index: 1, kind: input, shape index: {}]   ;;  %s1610_s0 = inlined_call_operand.vmem [shape: f32[4,768], index: 0, kind: input, shape index: {}]   ;;  %s1611_s3 = inlined_call_operand.vmem [shape: f32[32,16], index: 3, kind: input, shape index: {}]   ;;  %s1612_s2 = inlined_call_operand.vmem [shape: f32[1,32], index: 2, kind: input, shape index: {}]   ;;  %s1613_s4 = inlined_call_operand.vmem [shape: f32[32,32], index: 4, kind: input, shape index: {}]   ;;  %s1614_s12 = inlined_call_operand.vmem [shape: f32[4,32], index: 12, kind: output, shape index: {0}]   ;;  %s1615_s6 = inlined_call_operand.vmem [shape: f32[32,16], index: 6, kind: input, shape index: {}]   ;;  %s1616_s13 = inlined_call_operand.vmem [shape: f32[4,16], index: 13, kind: output, shape index: {1}]   ;;  %s1617_s5 = inlined_call_operand.vmem [shape: f32[1,32], index: 5, kind: input, shape index: {}]   ;;  %s1618_s8 = inlined_call_operand.vmem [shape: f32[16,32], index: 8, kind: input, shape index: {}]   ;;  %s1619_s10 = inlined_call_operand.vmem [shape: f32[32,16], index: 10, kind: input, shape index: {}]   ;;  %s1620_s7 = inlined_call_operand.vmem [shape: f32[1,16], index: 7, kind: input, shape index: {}]   ;;  %s1621_s14 = inlined_call_operand.vmem [shape: f32[4,16], index: 14, kind: output, shape index: {2}]   ;;  %s1622_s9 = inlined_call_operand.vmem [shape: f32[1,32], index: 9, kind: input, shape index: {}]   ;;  %s1623_s11 = inlined_call_operand.vmem [shape: f32[1,16], index: 11, kind: input, shape index: {}]   ;;  %s1624_s15 = inlined_call_operand.vmem [shape: f32[4,16], index: 15, kind: output, shape index: {3}]  }
   0x1   :  { %v64_v0 = vld [vmem:[%s1609_s1 + $0x80] sm:$0xff]  ;;  %v65_v1 = vld [vmem:[%s1609_s1 + $0x88] sm:$0xff]  ;;  %v66_v11 = vld [vmem:[%s1609_s1 + $0x90] sm:$0xff]  ;;  %vm632_vm4 = vcmask 130048  }
   0x2   :  { %v48_v2 = vld [vmem:[%s1609_s1] sm:$0xff]  ;;  %v993_v3 = vpack.c.bf16 %v65_v1, %v64_v0  ;;  %v49_v4 = vld [vmem:[%s1609_s1 + $0x8] sm:$0xff]  ;;  %v67_v13 = vld [vmem:[%s1609_s1 + $0x98] sm:$0xff] }
   0x3   :  { %v96_v5 = vld [vmem:[%s1609_s1 + $0x180] sm:$0xff]  ;;  %v97_v6 = vld [vmem:[%s1609_s1 + $0x188] sm:$0xff]  ;;  %v995_v7 = vpack.c.bf16 %v49_v4, %v48_v2  ;;  %v50_v14 = vld [vmem:[%s1609_s1 + $0x10] sm:$0xff]  ;;  %v997_v16 = vpack.c.bf16 %v67_v13, %v66_v11 }
   0x4   :  { %v1025_v8 = vpack.c.bf16 %v97_v6, %v96_v5  ;;  %v80_v9 = vld [vmem:[%s1609_s1 + $0x100] sm:$0xff]  ;;  %v81_v10 = vld [vmem:[%s1609_s1 + $0x108] sm:$0xff]  ;;  %994 = vmatprep.subr.bf16.mxu0 %v993_v3  ;;  %v51_v15 = vld [vmem:[%s1609_s1 + $0x18] sm:$0xff] }
   0x5   :  { %v1027_v12 = vpack.c.bf16 %v81_v10, %v80_v9  ;;  %996 = vmatpush3.bf16.msra.mxu0 %v995_v7  ;;  %v999_v17 = vpack.c.bf16 %v51_v15, %v50_v14  ;;  %v98_v18 = vld [vmem:[%s1609_s1 + $0x190] sm:$0xff]  ;;  %v99_v19 = vld [vmem:[%s1609_s1 + $0x198] sm:$0xff]  ;;  %v68_v23 = vld [vmem:[%s1609_s1 + $0xa0] sm:$0xff] }
   0x6   :  { %1026 = vmatprep.subr.bf16.mxu1 %v1025_v8  ;;  %v82_v20 = vld [vmem:[%s1609_s1 + $0x110] sm:$0xff]  ;;  %v1029_v21 = vpack.c.bf16 %v99_v19, %v98_v18  ;;  %v83_v22 = vld [vmem:[%s1609_s1 + $0x118] sm:$0xff]  ;;  %v69_v24 = vld [vmem:[%s1609_s1 + $0xa8] sm:$0xff]  ;;  %998 = vmatprep.subr.bf16.mxu0 %v997_v16 }
   0x7   :  { %1028 = vmatpush3.bf16.msra.mxu1 %v1027_v12  ;;  %v1031_v25 = vpack.c.bf16 %v83_v22, %v82_v20  ;;  %v1001_v26 = vpack.c.bf16 %v69_v24, %v68_v23  ;;  %v52_v27 = vld [vmem:[%s1609_s1 + $0x20] sm:$0xff]  ;;  %v53_v28 = vld [vmem:[%s1609_s1 + $0x28] sm:$0xff]  ;;  %v70_v35 = vld [vmem:[%s1609_s1 + $0xb0] sm:$0xff] }
   0x8   :  { %v100_v29 = vld [vmem:[%s1609_s1 + $0x1a0] sm:$0xff]  ;;  %1030 = vmatprep.subr.bf16.mxu1 %v1029_v21  ;;  %v101_v30 = vld [vmem:[%s1609_s1 + $0x1a8] sm:$0xff]  ;;  %v1003_v33 = vpack.c.bf16 %v53_v28, %v52_v27  ;;  %v71_v36 = vld [vmem:[%s1609_s1 + $0xb8] sm:$0xff] }
   0x9   :  { %v84_v31 = vld [vmem:[%s1609_s1 + $0x120] sm:$0xff]  ;;  %v85_v32 = vld [vmem:[%s1609_s1 + $0x128] sm:$0xff]  ;;  %1000 = vmatpush3.bf16.msra.mxu0 %v999_v17  ;;  %v1033_v34 = vpack.c.bf16 %v101_v30, %v100_v29  ;;  %v54_v37 = vld [vmem:[%s1609_s1 + $0x30] sm:$0xff]  ;;  %v1005_v39 = vpack.c.bf16 %v71_v36, %v70_v35 }
   0xa   :  { %1002 = vmatprep.subr.bf16.mxu0 %v1001_v26  ;;  %v1035_v38 = vpack.c.bf16 %v85_v32, %v84_v31  ;;  %v55_v40 = vld [vmem:[%s1609_s1 + $0x38] sm:$0xff]  ;;  %v102_v41 = vld [vmem:[%s1609_s1 + $0x1b0] sm:$0xff]  ;;  %v72_v46 = vld [vmem:[%s1609_s1 + $0xc0] sm:$0xff] }
   0xb   :  { %1032 = vmatpush3.bf16.msra.mxu1 %v1031_v25  ;;  %v103_v42 = vld [vmem:[%s1609_s1 + $0x1b8] sm:$0xff]  ;;  %v86_v44 = vld [vmem:[%s1609_s1 + $0x130] sm:$0xff]  ;;  %v73_v47 = vld [vmem:[%s1609_s1 + $0xc8] sm:$0xff]  ;;  %v1007_v48 = vpack.c.bf16 %v55_v40, %v54_v37 }
   0xc   :  { %1034 = vmatprep.subr.bf16.mxu1 %v1033_v34  ;;  %v1037_v43 = vpack.c.bf16 %v103_v42, %v102_v41  ;;  %v87_v45 = vld [vmem:[%s1609_s1 + $0x138] sm:$0xff]  ;;  %v104_v49 = vld [vmem:[%s1609_s1 + $0x1c0] sm:$0xff]  ;;  %v105_v50 = vld [vmem:[%s1609_s1 + $0x1c8] sm:$0xff]  ;;  %v1009_v52 = vpack.c.bf16 %v73_v47, %v72_v46 }
   0xd   :  { %1004 = vmatpush3.bf16.msra.mxu0 %v1003_v33  ;;  %v1039_v51 = vpack.c.bf16 %v87_v45, %v86_v44  ;;  %v56_v53 = vld [vmem:[%s1609_s1 + $0x40] sm:$0xff]  ;;  %v57_v54 = vld [vmem:[%s1609_s1 + $0x48] sm:$0xff]  ;;  %v1041_v56 = vpack.c.bf16 %v105_v50, %v104_v49  ;;  %v74_v58 = vld [vmem:[%s1609_s1 + $0xd0] sm:$0xff] }
   0xe   :  { %1006 = vmatprep.subr.bf16.mxu0 %v1005_v39  ;;  %v88_v55 = vld [vmem:[%s1609_s1 + $0x140] sm:$0xff]  ;;  %v89_v57 = vld [vmem:[%s1609_s1 + $0x148] sm:$0xff]  ;;  %v75_v59 = vld [vmem:[%s1609_s1 + $0xd8] sm:$0xff]  ;;  %v1011_v62 = vpack.c.bf16 %v57_v54, %v56_v53 }
   0xf   :  { %1036 = vmatpush3.bf16.msra.mxu1 %v1035_v38  ;;  %v106_v60 = vld [vmem:[%s1609_s1 + $0x1d0] sm:$0xff]  ;;  %v107_v61 = vld [vmem:[%s1609_s1 + $0x1d8] sm:$0xff]  ;;  %v1043_v63 = vpack.c.bf16 %v89_v57, %v88_v55  ;;  %v1013_v0 = vpack.c.bf16 %v75_v59, %v74_v58  ;;  %v76_v6 = vld [vmem:[%s1609_s1 + $0xe0] sm:$0xff] }
  0x10   :  { %1038 = vmatprep.subr.bf16.mxu1 %v1037_v43  ;;  %v58_v1 = vld [vmem:[%s1609_s1 + $0x50] sm:$0xff]  ;;  %v59_v2 = vld [vmem:[%s1609_s1 + $0x58] sm:$0xff]  ;;  %v1045_v4 = vpack.c.bf16 %v107_v61, %v106_v60  ;;  %v77_v7 = vld [vmem:[%s1609_s1 + $0xe8] sm:$0xff] }
  0x11   :  { %1008 = vmatpush3.bf16.msra.mxu0 %v1007_v48  ;;  %v90_v3 = vld [vmem:[%s1609_s1 + $0x150] sm:$0xff]  ;;  %v91_v5 = vld [vmem:[%s1609_s1 + $0x158] sm:$0xff]  ;;  %v108_v8 = vld [vmem:[%s1609_s1 + $0x1e0] sm:$0xff]  ;;  %v1015_v10 = vpack.c.bf16 %v59_v2, %v58_v1  ;;  %v1017_v14 = vpack.c.bf16 %v77_v7, %v76_v6 }
  0x12   :  { %1010 = vmatprep.subr.bf16.mxu0 %v1009_v52  ;;  %v109_v9 = vld [vmem:[%s1609_s1 + $0x1e8] sm:$0xff]  ;;  %v60_v11 = vld [vmem:[%s1609_s1 + $0x60] sm:$0xff]  ;;  %v1047_v13 = vpack.c.bf16 %v91_v5, %v90_v3  ;;  %v78_v20 = vld [vmem:[%s1609_s1 + $0xf0] sm:$0xff] }
  0x13   :  { %1040 = vmatpush3.bf16.msra.mxu1 %v1039_v51  ;;  %v45_v12 = vld [vmem:[%s1610_s0] sm:$0xff]  ;;  %v61_v15 = vld [vmem:[%s1609_s1 + $0x68] sm:$0xff]  ;;  %v1049_v19 = vpack.c.bf16 %v109_v9, %v108_v8  ;;  %v79_v21 = vld [vmem:[%s1609_s1 + $0xf8] sm:$0xff] }
  0x14   :  { %1042 = vmatprep.subr.bf16.mxu1 %v1041_v56  ;;  %v92_v16 = vld [vmem:[%s1609_s1 + $0x160] sm:$0xff]  ;;  %v93_v17 = vld [vmem:[%s1609_s1 + $0x168] sm:$0xff]  ;;  %v154_v18 = vcombine.high %v45_v12, %v45_v12  ;;  %v110_v23 = vld [vmem:[%s1609_s1 + $0x1f0] sm:$0xff]  ;;  %v1019_v26 = vpack.c.bf16 %v61_v15, %v60_v11  ;;  %v1021_v28 = vpack.c.bf16 %v79_v21, %v78_v20 }
  0x15   :  { %1012 = vmatpush3.bf16.msra.mxu0 %v1011_v62  ;;  %v46_v22 = vld [vmem:[%s1610_s0 + $0x8] sm:$0xff]  ;;  %v111_v24 = vld [vmem:[%s1609_s1 + $0x1f8] sm:$0xff]  ;;  %v1051_v27 = vpack.c.bf16 %v93_v17, %v92_v16  ;;  %v62_v29 = vld [vmem:[%s1609_s1 + $0x70] sm:$0xff] }
  0x16   :  { %1014 = vmatprep.subr.bf16.mxu0 %v1013_v0  ;;  %224 = vmatprep.mubr.f32.mxu0 %v154_v18  ;;  %v155_v25 = vcombine.high %v46_v22, %v46_v22  ;;  %v63_v30 = vld [vmem:[%s1609_s1 + $0x78] sm:$0xff]  ;;  %v94_v31 = vld [vmem:[%s1609_s1 + $0x170] sm:$0xff]  ;;  %v1053_v32 = vpack.c.bf16 %v111_v24, %v110_v23  ;;  %v128_v34 = vld [vmem:[%s1609_s1 + $0x280] sm:$0xff] }
  0x17   :  { %1044 = vmatpush3.bf16.msra.mxu1 %v1043_v63  ;;  %v95_v33 = vld [vmem:[%s1609_s1 + $0x178] sm:$0xff]  ;;  %v129_v35 = vld [vmem:[%s1609_s1 + $0x288] sm:$0xff]  ;;  %v1023_v36 = vpack.c.bf16 %v63_v30, %v62_v29  ;;  %v112_v39 = vld [vmem:[%s1609_s1 + $0x200] sm:$0xff]  ;;  %v1124_v29 = vmov 0.0  }
  0x18   :  { %1046 = vmatprep.subr.bf16.mxu1 %v1045_v4  ;;  %294 = vmatprep.mubr.f32.mxu1 %v155_v25  ;;  %v1055_v37 = vpack.c.bf16 %v95_v33, %v94_v31  ;;  %v1057_v38 = vpack.c.bf16 %v129_v35, %v128_v34  ;;  %v113_v40 = vld [vmem:[%s1609_s1 + $0x208] sm:$0xff]  ;;  %v130_v41 = vld [vmem:[%s1609_s1 + $0x290] sm:$0xff]  ;;  %v131_v42 = vld [vmem:[%s1609_s1 + $0x298] sm:$0xff] }
  0x19   :  { %1016 = vmatpush3.bf16.msra.mxu0 %v1015_v10  ;;  %v1059_v43 = vpack.c.bf16 %v113_v40, %v112_v39  ;;  %v47_v44 = vld [vmem:[%s1610_s0 + $0x10] sm:$0xff]  ;;  %v1061_v45 = vpack.c.bf16 %v131_v42, %v130_v41  ;;  %v115_v47 = vld [vmem:[%s1609_s1 + $0x218] sm:$0xff]  ;;  %v132_v49 = vld [vmem:[%s1609_s1 + $0x2a0] sm:$0xff] }
  0x1a   :  { %1018 = vmatprep.subr.bf16.mxu0 %v1017_v14  ;;  %v114_v46 = vld [vmem:[%s1609_s1 + $0x210] sm:$0xff]  ;;  %v156_v48 = vcombine.high %v47_v44, %v47_v44  ;;  %v133_v50 = vld [vmem:[%s1609_s1 + $0x2a8] sm:$0xff]  ;;  %v116_v53 = vld [vmem:[%s1609_s1 + $0x220] sm:$0xff] }
  0x1b   :  { %1048 = vmatpush3.bf16.msra.mxu1 %v1047_v13  ;;  %v1063_v51 = vpack.c.bf16 %v115_v47, %v114_v46  ;;  %v1065_v52 = vpack.c.bf16 %v133_v50, %v132_v49  ;;  %v117_v54 = vld [vmem:[%s1609_s1 + $0x228] sm:$0xff]  ;;  %v134_v55 = vld [vmem:[%s1609_s1 + $0x2b0] sm:$0xff]  ;;  %v135_v56 = vld [vmem:[%s1609_s1 + $0x2b8] sm:$0xff] }
  0x1c   :  { %1050 = vmatprep.subr.bf16.mxu1 %v1049_v19  ;;  %v1067_v57 = vpack.c.bf16 %v117_v54, %v116_v53  ;;  %v1069_v58 = vpack.c.bf16 %v135_v56, %v134_v55  ;;  %v118_v59 = vld [vmem:[%s1609_s1 + $0x230] sm:$0xff]  ;;  %v119_v60 = vld [vmem:[%s1609_s1 + $0x238] sm:$0xff]  ;;  %v136_v61 = vld [vmem:[%s1609_s1 + $0x2c0] sm:$0xff] }
  0x1d   :  { %1020 = vmatpush3.bf16.msra.mxu0 %v1019_v26  ;;  %v137_v62 = vld [vmem:[%s1609_s1 + $0x2c8] sm:$0xff]  ;;  %v1071_v63 = vpack.c.bf16 %v119_v60, %v118_v59  ;;  %v120_v1 = vld [vmem:[%s1609_s1 + $0x240] sm:$0xff]  ;;  %v138_v3 = vld [vmem:[%s1609_s1 + $0x2d0] sm:$0xff] }
  0x1e   :  { %1022 = vmatprep.subr.bf16.mxu0 %v1021_v28  ;;  %v1073_v0 = vpack.c.bf16 %v137_v62, %v136_v61  ;;  %v121_v2 = vld [vmem:[%s1609_s1 + $0x248] sm:$0xff]  ;;  %v139_v4 = vld [vmem:[%s1609_s1 + $0x2d8] sm:$0xff]  ;;  %v122_v7 = vld [vmem:[%s1609_s1 + $0x250] sm:$0xff] }
  0x1f   :  { %1052 = vmatpush3.bf16.msra.mxu1 %v1051_v27  ;;  %v1075_v5 = vpack.c.bf16 %v121_v2, %v120_v1  ;;  %v1077_v6 = vpack.c.bf16 %v139_v4, %v138_v3  ;;  %v123_v8 = vld [vmem:[%s1609_s1 + $0x258] sm:$0xff]  ;;  %v140_v9 = vld [vmem:[%s1609_s1 + $0x2e0] sm:$0xff]  ;;  %v141_v10 = vld [vmem:[%s1609_s1 + $0x2e8] sm:$0xff] }
  0x20   :  { %1054 = vmatprep.subr.bf16.mxu1 %v1053_v32  ;;  %v1079_v11 = vpack.c.bf16 %v123_v8, %v122_v7  ;;  %v124_v13 = vld [vmem:[%s1609_s1 + $0x260] sm:$0xff]  ;;  %v125_v14 = vld [vmem:[%s1609_s1 + $0x268] sm:$0xff]  ;;  %v142_v15 = vld [vmem:[%s1609_s1 + $0x2f0] sm:$0xff] }
  0x21   :  { %1024 = vmatpush3.bf16.msra.mxu0 %v1023_v36  ;;  %v143_v16 = vld [vmem:[%s1609_s1 + $0x2f8] sm:$0xff]  ;;  %v1083_v17 = vpack.c.bf16 %v125_v14, %v124_v13  ;;  %v126_v19 = vld [vmem:[%s1609_s1 + $0x270] sm:$0xff]  ;;  %v372_v23 = vld [vmem:[%s1611_s3] sm:$0xff] }
  0x22   :  { %1058 = vmatprep.subr.bf16.mxu0 %v1057_v38  ;;  %v1085_v18 = vpack.c.bf16 %v143_v16, %v142_v15  ;;  %v127_v20 = vld [vmem:[%s1609_s1 + $0x278] sm:$0xff]  ;;  %v373_v24 = vld [vmem:[%s1611_s3 + $0x8] sm:$0xff]  ;;  %v374_v26 = vld [vmem:[%s1611_s3 + $0x10] sm:$0xff] }
  0x23   :  { %1056 = vmatpush3.bf16.msra.mxu1 %v1055_v37  ;;  %v1087_v21 = vpack.c.bf16 %v127_v20, %v126_v19  ;;  %v1090_v25 = vpack.c.bf16 %v373_v24, %v372_v23  ;;  %v375_v27 = vld [vmem:[%s1611_s3 + $0x18] sm:$0xff]  ;;  %v804_v31 = vld [vmem:[%s1612_s2] ss:$0 sm:$0xff]  ;;  %v453_v41 = vld [vmem:[%s1613_s4 + $0x8] sm:$0xff] }
  0x24   :  { %225 = vmatmul.mubr.f32.vlgmr.msra.gmra.mrb[0].mxu0 %v45_v12  ;;  %v1081_v12 = vpack.c.bf16 %v141_v10, %v140_v9  ;;  %v1093_v28 = vpack.c.bf16 %v375_v27, %v374_v26  ;;  %v452_v40 = vld [vmem:[%s1613_s4] sm:$0xff]  ;;  %v454_v46 = vld [vmem:[%s1613_s4 + $0x10] sm:$0xff]  ;;  %v455_v47 = vld [vmem:[%s1613_s4 + $0x18] sm:$0xff] }
  0x25   :  { %1060 = vmatpush3.bf16.msra.mxu0 %v1059_v43  ;;  %364 = vmatprep.mubr.f32.mxu0 %v156_v48  ;;  %v1099_v48 = vpack.c.bf16 %v455_v47, %v454_v46  ;;  %v457_v49 = vld [vmem:[%s1615_s6] sm:$0xff]  ;;  %v458_v50 = vld [vmem:[%s1615_s6 + $0x8] sm:$0xff]  ;;  %v460_v53 = vld [vmem:[%s1615_s6 + $0x18] sm:$0xff] }
  0x26   :  { %295 = vmatmul.mubr.f32.vlgmr.msra.gmra.mrb[0].mxu1 %v46_v22  ;;  %1062 = vmatprep.subr.bf16.mxu0 %v1061_v45  ;;  %v1122_v22 = vmov 0.0|0.0   ;;  %v463_v59 = vld [vmem:[%s1618_s8 + $0x8] sm:$0xff]  ;;  %v465_v1 = vld [vmem:[%s1619_s10] sm:$0xff]  ;;  %v467_v8 = vld [vmem:[%s1619_s10 + $0x10] sm:$0xff] }
  0x27   :  { %1089 = vmatprep.subr.bf16.mxu1 %v1122_v22  ;;  %950 = vmatprep.mubr.msk.f32.mxu1 %vm1123_vm0, %v1124_v29  ;;  %v466_v2 = vld [vmem:[%s1619_s10 + $0x8] sm:$0xff]  ;;  %v808_v3 = vld [vmem:[%s1620_s7] ss:$0 sm:$0xff]  ;;  %v468_v9 = vld [vmem:[%s1619_s10 + $0x18] sm:$0xff] }
  0x28   :  { %1091 = vmatpush3.bf16.msra.mxu1 %v1090_v25  ;;  %v1114_v10 = vpack.c.bf16 %v468_v9, %v467_v8  ;;  %v812_v16 = vld [vmem:[%s1623_s11] ss:$0 sm:$0xff] }
  0x29   :  { %1064 = vmatpush3.bf16.msra.mxu0 %v1063_v51  ;;  %1092 = vmatprep.subr.bf16.mxu1 %v1122_v22  ;;  %v1102_v51 = vpack.c.bf16 %v458_v50, %v457_v49 }
  0x2a   :  { %1066 = vmatprep.subr.bf16.mxu0 %v1065_v52  ;;  %v459_v52 = vld [vmem:[%s1615_s6 + $0x10] sm:$0xff] }
  0x2b   :  { %v1105_v54 = vpack.c.bf16 %v460_v53, %v459_v52 }
  0x2c   :  { %1094 = vmatpush3.bf16.msra.mxu1 %v1093_v28 }
  0x2d   :  { %1068 = vmatpush3.bf16.msra.mxu0 %v1067_v57  ;;  %1095 = vmatprep.subr.bf16.mxu1 %v1122_v22  ;;  %v806_v57 = vld [vmem:[%s1617_s5] ss:$0 sm:$0xff] }
  0x2e   :  { %1070 = vmatprep.subr.bf16.mxu0 %v1069_v58  ;;  %v462_v58 = vld [vmem:[%s1618_s8] sm:$0xff] }
  0x31   :  { %1072 = vmatpush3.bf16.msra.mxu0 %v1071_v63  ;;  %v1108_v63 = vpack.c.bf16 %v463_v59, %v462_v58 }
  0x32   :  { %1074 = vmatprep.subr.bf16.mxu0 %v1073_v0 }
  0x35   :  { %1076 = vmatpush3.bf16.msra.mxu0 %v1075_v5  ;;  %v1111_v5 = vpack.c.bf16 %v466_v2, %v465_v1 }
  0x36   :  { %1078 = vmatprep.subr.bf16.mxu0 %v1077_v6 }
  0x39   :  { %1080 = vmatpush3.bf16.msra.mxu0 %v1079_v11  ;;  %v810_v11 = vld [vmem:[%s1622_s9] ss:$0 sm:$0xff] }
  0x3a   :  { %1082 = vmatprep.subr.bf16.mxu0 %v1081_v12 }
  0x3d   :  { %1084 = vmatpush3.bf16.msra.mxu0 %v1083_v17 }
  0x3e   :  { %1086 = vmatprep.subr.bf16.mxu0 %v1085_v18 }
  0x41   :  { %1088 = vmatpush3.bf16.msra.mxu0 %v1087_v21 }
  0x44   :  { %365 = vmatmul.mubr.f32.vlgmr.msra.gmra.mrb[2].mxu0 %v47_v44  ;;  %v1096_v44 = vpack.c.bf16 %v453_v41, %v452_v40 }
  0xf7   :  { %v846_v30 = vpop.f32.mrb[0].mxu0 }
  0xf8   :  { %v847_v32 = vpop.f32.mrb[1].mxu0 }
  0xf9   :  { %v881_v33 = vpop.f32.mrb[0].mxu1  ;;  %v848_v34 = vadd.f32 %v847_v32, %v846_v30 }
  0xfa   :  { %v882_v35 = vpop.f32.mrb[1].mxu1 }
  0xfb   :  { %v883_v36 = vadd.f32 %v882_v35, %v881_v33  ;;  %v227_v37 = vadd.f32 %v848_v34, %v804_v31 }
  0xfd   :  { %v297_v38 = vadd.f32 %v883_v36, %v227_v37 }
 0x117   :  { %v916_v39 = vpop.f32.mrb[2].mxu0 }
 0x118   :  { %v917_v42 = vpop.f32.mrb[3].mxu0 }
 0x119   :  { %v918_v43 = vadd.f32 %v917_v42, %v916_v39 }
 0x11b   :  { %v367_v45 = vadd.f32 %v918_v43, %v297_v38 }
 0x11d   :  { %371 = vst.msk [vmem:[%s1614_s12] sm:$0xf] %vm370_vm1, %v367_v45  ;;  %951 = vmatmul.mubr.msk.f32.vlgmr.msra.gmra.mrb[2].mxu1 %vm376_vm2, %v367_v45 }
 0x11e   :  { %1097 = vmatpush3.bf16.msra.mxu1 %v1096_v44  ;;  %961 = vmatprep.mubr.msk.f32.mxu1 %vm1123_vm0, %v1124_v29 }
 0x11f   :  { %1098 = vmatprep.subr.bf16.mxu1 %v1122_v22 }
 0x122   :  { %1100 = vmatpush3.bf16.msra.mxu1 %v1099_v48 }
 0x123   :  { %1101 = vmatprep.subr.bf16.mxu1 %v1122_v22 }
 0x125   :  { %962 = vmatmul.mubr.msk.f32.vlgmr.msra.gmra.mrb[4].mxu1 %vm376_vm2, %v367_v45 }
 0x126   :  { %972 = vmatprep.mubr.msk.f32.mxu1 %vm1123_vm0, %v1124_v29  ;;  %1103 = vmatpush3.bf16.msra.mxu1 %v1102_v51 }
 0x127   :  { %1104 = vmatprep.subr.bf16.mxu1 %v1122_v22 }
 0x12a   :  { %1106 = vmatpush3.bf16.msra.mxu1 %v1105_v54 }
 0x12b   :  { %1107 = vmatprep.subr.bf16.mxu1 %v1122_v22 }
 0x1f0   :  { %v446_v55 = vpop.f32.mrb[2].mxu1 }
 0x1f1   :  { %451 = vst.msk [vmem:[%s1616_s13] sm:$0xf] %vm450_vm3, %v446_v55  ;;  %v952_v56 = vpop.f32.mrb[3].mxu1 }
 0x1f8   :  { %v542_v60 = vpop.f32.mrb[4].mxu1 }
 0x1f9   :  { %v543_v61 = vadd.f32 %v806_v57, %v542_v60  ;;  %v963_v62 = vpop.f32.mrb[5].mxu1 }
 0x1fb   :  { %v546_v0 = vmax.f32 %v543_v61, 0.0 }
 0x1fd   :  { %973 = vmatmul.mubr.msk.f32.vlgmr.msra.gmra.mrb[6].mxu1 %vm376_vm2, %v546_v0 }
 0x1fe   :  { %1109 = vmatpush3.bf16.msra.mxu1 %v1108_v63  ;;  %979 = vmatprep.mubr.msk.f32.mxu1 %vm1123_vm0, %v1124_v29 }
 0x1ff   :  { %1110 = vmatprep.subr.bf16.mxu1 %v1122_v22 }
 0x2d0   :  { %v622_v4 = vpop.f32.mrb[6].mxu1 }
 0x2d1   :  { %v623_v6 = vadd.f32 %v808_v3, %v622_v4  ;;  %v974_v7 = vpop.f32.mrb[7].mxu1 }
 0x2d3   :  { %786 = vst.msk [vmem:[%s1621_s14] sm:$0xf] %vm450_vm3, %v623_v6  ;;  %980 = vmatmul.mubr.msk.f32.vlgmr.msra.gmra.mrb[8].mxu1 %vm632_vm4, %v623_v6 }
 0x2d4   :  { %1112 = vmatpush3.bf16.msra.mxu1 %v1111_v5  ;;  %990 = vmatprep.mubr.msk.f32.mxu1 %vm1123_vm0, %v1124_v29 }
 0x2d5   :  { %1113 = vmatprep.subr.bf16.mxu1 %v1122_v22 }
 0x2d8   :  { %1115 = vmatpush3.bf16.msra.mxu1 %v1114_v10 }
 0x3a6   :  { %v702_v12 = vpop.f32.mrb[8].mxu1 }
 0x3a7   :  { %v703_v13 = vadd.f32 %v810_v11, %v702_v12  ;;  %v981_v14 = vpop.f32.mrb[9].mxu1 }
 0x3a9   :  { %v706_v15 = vmax.f32 %v703_v13, 0.0 }
 0x3ab   :  { %991 = vmatmul.mubr.msk.f32.vlgmr.msra.gmra.mrb[10].mxu1 %vm376_vm2, %v706_v15 }
 0x47e   :  { %v782_v17 = vpop.f32.mrb[10].mxu1 }
 0x47f   :  { %v783_v18 = vadd.f32 %v812_v16, %v782_v17  ;;  %v992_v19 = vpop.f32.mrb[11].mxu1 }
 0x481   :  { %787 = vst.msk [vmem:[%s1624_s15] sm:$0xf] %vm450_vm3, %v783_v18 }

// kernel: siamlip_forward.3
= control target key start
LH: loop header
LB: loop body
LE: loop exit
PB: predicated region body
PF: predicated region fallthrough
CT: control target
= control target key end

     0   :  { %vm140_vm0 = vcmask 261120   ;;  %s12179_s6 = smov 5   ;;  %s12180_s10 = smov 7   ;;  %vm12185_vm1 = vmmov 0   ;;  %vm514_vm2 = vcmask 64512   ;;  %vm9408_vm3 = vcmask 1041409   ;;  %s13431_s0 = inlined_call_operand.smem [shape: u32[34], index: -1, kind: input, shape index: {}] }
   0x1   :  { %s12223_s5 = sld [smem:[%s13431_s0]]   ;;  %s12181_s14 = smov 9   ;;  %vm9410_vm4 = vcmask 1042434   ;;  %vm9412_vm5 = vcmask 1043459   ;;  %vm9415_vm6 = vcmask 257024   ;;  %vm9493_vm7 = vcmask 125952  }
   0x2   :  { %s12256_s9 = sld [smem:[%s13431_s0 + %s12179_s6]]   ;;  %s12182_s18 = smov 3   ;;  %vm9675_vm8 = vcmask 130048  }
   0x3   :  { %s12261_s13 = sld [smem:[%s13431_s0 + %s12180_s10]]   ;;  %s12183_s22 = smov 4  }
   0x4   :  { %s12270_s17 = sld [smem:[%s13431_s0 + %s12181_s14]]   ;;  %s12186_s26 = smov 8  }
   0x5   :  { %s12281_s21 = sld [smem:[%s13431_s0 + %s12182_s18]]   ;;  %s12187_s30 = smov 6  }
   0x6   :  { %s12286_s25 = sld [smem:[%s13431_s0 + %s12183_s22]]   ;;  %s12188_s4 = smov 10  }
   0x7   :  { %v133_v0 = vld [vmem:[%s12223_s5] sm:$0xff]  ;;  %v135_v1 = vld [vmem:[%s12223_s5 + $0x10] sm:$0xff]  ;;  %v134_v2 = vld [vmem:[%s12223_s5 + $0x8] sm:$0xff]  ;;  %s12337_s29 = sld [smem:[%s13431_s0 + %s12186_s26]]   ;;  %s12189_s10 = smov 1  }
   0x8   :  { %v141_v3 = vsel %vm140_vm0, %v133_v0, 0.0  ;;  %v147_v4 = vsel %vm140_vm0, %v135_v1, 0.0  ;;  %v136_v5 = vld [vmem:[%s12223_s5 + $0x18] sm:$0xff]  ;;  %v144_v6 = vsel %vm140_vm0, %v134_v2, 0.0  ;;  %v214_v28 = vld [vmem:[%s12256_s9] sm:$0xff]  ;;  %v215_v29 = vld [vmem:[%s12256_s9 + $0x8] sm:$0xff]  ;;  %s12342_s3 = sld [smem:[%s13431_s0 + %s12187_s30]]  }
   0x9   :  { %142 = vadd.xlane.f32.xlu0 %v141_v3  ;;  %148 = vadd.xlane.f32.xlu1 %v147_v4  ;;  %v150_v7 = vsel %vm140_vm0, %v136_v5, 0.0  ;;  %v322_v30 = vld [vmem:[%s12261_s13] sm:$0xff]  ;;  %v11614_v31 = vpack.c.bf16 %v215_v29, %v214_v28  ;;  %v323_v32 = vld [vmem:[%s12261_s13 + $0x8] sm:$0xff]  ;;  %v216_v34 = vld [vmem:[%s12256_s9 + $0x10] sm:$0xff]  ;;  %s12348_s8 = sld [smem:[%s13431_s0 + %s12188_s4]]   ;;  %s12190_s15 = smov 11  }
   0xa   :  { %v11622_v33 = vpack.c.bf16 %v323_v32, %v322_v30  ;;  %v217_v35 = vld [vmem:[%s12256_s9 + $0x18] sm:$0xff]  ;;  %v324_v36 = vld [vmem:[%s12261_s13 + $0x10] sm:$0xff]  ;;  %v418_v40 = vld [vmem:[%s12270_s17] sm:$0xff]  ;;  %s12381_s14 = sld [smem:[%s13431_s0 + %s12189_s10]]   ;;  %s12191_s20 = smov 12  }
   0xb   :  { %11615 = vmatprep.subr.bf16.mxu0 %v11614_v31  ;;  %v11618_v37 = vpack.c.bf16 %v217_v35, %v216_v34  ;;  %v325_v38 = vld [vmem:[%s12261_s13 + $0x18] sm:$0xff]  ;;  %v419_v41 = vld [vmem:[%s12270_s17 + $0x8] sm:$0xff]  ;;  %v9880_v56 = vld [vmem:[%s12281_s21] ss:$0 sm:$0xff]  ;;  %s12539_s19 = sld [smem:[%s13431_s0 + %s12190_s15]]   ;;  %s12193_s30 = smov 13  }
   0xc   :  { %11623 = vmatprep.subr.bf16.mxu1 %v11622_v33  ;;  %11617 = vmatpush3.bf16.msra.mxu0 %v11614_v31  ;;  %v11626_v39 = vpack.c.bf16 %v325_v38, %v324_v36  ;;  %v11630_v42 = vpack.c.bf16 %v419_v41, %v418_v40  ;;  %v9881_v58 = vld [vmem:[%s12286_s25] ss:$0 sm:$0xff]  ;;  %v421_v3 = vld [vmem:[%s12270_s17 + $0x18] sm:$0xff]  ;;  %s12730_s24 = sld [smem:[%s13431_s0 + %s12191_s20]]   ;;  %s12194_s6 = smov 14  }
   0xd   :  { %145 = vadd.xlane.f32.xlu0 %v144_v6  ;;  %151 = vadd.xlane.f32.xlu1 %v150_v7  ;;  %s12773_s4 = sld [smem:[%s13431_s0 + %s12193_s30]]   ;;  %s12195_s12 = smov 17  }
   0xe   :  { %11625 = vmatpush3.bf16.msra.mxu1 %v11622_v33  ;;  %11619 = vmatprep.subr.bf16.mxu0 %v11618_v37  ;;  %s12778_s11 = sld [smem:[%s13431_s0 + %s12194_s6]]   ;;  %s12196_s20 = smov 16  }
   0xf   :  { %11627 = vmatprep.subr.bf16.mxu1 %v11626_v39  ;;  %s12789_s18 = sld [smem:[%s13431_s0 + %s12195_s12]]   ;;  %s12197_s26 = smov 18  }
  0x10   :  { %11621 = vmatpush3.bf16.msra.mxu0 %v11618_v37  ;;  %v12384_v40 = vld [vmem:[%s12381_s14] sm:$0xff]  ;;  %s12819_s1 = sld [smem:[%s13431_s0 + %s12197_s26]]   ;;  %s12202_s2 = smov 20  }
  0x11   :  { %11631 = vmatprep.subr.bf16.mxu0 %v11630_v42  ;;  %s9866_s7 = sld [smem:[%s13431_s0 + %s12202_s2]]   ;;  %s12203_s10 = smov 22  }
  0x12   :  { %11629 = vmatpush3.bf16.msra.mxu1 %v11626_v39  ;;  %s9868_s15 = sld [smem:[%s13431_s0 + %s12203_s10]]   ;;  %s12204_s16 = smov 30  }
  0x13   :  { %s9876_s22 = sld [smem:[%s13431_s0 + %s12204_s16]]   ;;  %s12205_s23 = smov 24  }
  0x14   :  { %s9870_s27 = sld [smem:[%s13431_s0 + %s12205_s23]]   ;;  %s12206_s30 = smov 31  }
  0x15   :  { %s12210_s6 = smov 25   ;;  %s12211_s12 = smov 32  }
  0x16   :  { %s12213_s26 = smov 29  }
  0x96   :  { %v143_v8 = vpop.xlane.xlu0 %142  ;;  %v149_v9 = vpop.xlane.xlu1 %148 }
  0x97   :  { %v154_v10 = vmul.f32 0.03125, %v143_v8  ;;  %v156_v11 = vmul.f32 0.03125, %v149_v9 }
  0x99   :  { %v12233_v12 = vsub.f32 %v133_v0, %v154_v10  ;;  %v12235_v13 = vsub.f32 %v135_v1, %v156_v11 }
  0x9a   :  { %v146_v14 = vpop.xlane.xlu0 %145  ;;  %v152_v15 = vpop.xlane.xlu1 %151 }
  0x9b   :  { %v155_v16 = vmul.f32 0.03125, %v146_v14  ;;  %v157_v17 = vmul.f32 0.03125, %v152_v15  ;;  %v162_v18 = vmul.f32 %v12233_v12, %v12233_v12  ;;  %v164_v19 = vmul.f32 %v12235_v13, %v12235_v13 }
  0x9d   :  { %v12241_v20 = vsub.f32 %v134_v2, %v155_v16  ;;  %v12243_v21 = vsub.f32 %v136_v5, %v157_v17  ;;  %v166_v22 = vsel %vm140_vm0, %v162_v18, 0.0  ;;  %v172_v23 = vsel %vm140_vm0, %v164_v19, 0.0  ;;  %v420_v2 = vld [vmem:[%s12270_s17 + $0x10] sm:$0xff]  ;;  %v9882_v18 = vld [vmem:[%s12342_s3] ss:$0 sm:$0xff] }
  0x9e   :  { %167 = vadd.xlane.f32.xlu0 %v166_v22  ;;  %v11634_v9 = vpack.c.bf16 %v421_v3, %v420_v2 }
  0x9f   :  { %v163_v24 = vmul.f32 %v12241_v20, %v12241_v20  ;;  %v165_v25 = vmul.f32 %v12243_v21, %v12243_v21 }
  0xa1   :  { %v169_v26 = vsel %vm140_vm0, %v163_v24, 0.0  ;;  %v175_v27 = vsel %vm140_vm0, %v165_v25, 0.0 }
  0xa2   :  { %173 = vadd.xlane.f32.xlu0 %v172_v23  ;;  %170 = vadd.xlane.f32.xlu1 %v169_v26 }
  0xa6   :  { %176 = vadd.xlane.f32.xlu1 %v175_v27  ;;  %v9892_v27 = vld [vmem:[%s12348_s8] ss:$0 sm:$0xff] }
 0x12b   :  { %v168_v43 = vpop.xlane.xlu0 %167 }
 0x12c   :  { %v178_v44 = vmul.f32 0.03125, %v168_v43 }
 0x12e   :  { %v182_v45 = vadd.f32 1e-05, %v178_v44 }
 0x12f   :  { %v171_v46 = vpop.xlane.xlu1 %170  ;;  %v174_v47 = vpop.xlane.xlu0 %173 }
 0x130   :  { %11973 = vrsqrt.f32 %v182_v45  ;;  %v179_v48 = vmul.f32 0.03125, %v171_v46  ;;  %v180_v49 = vmul.f32 0.03125, %v174_v47 }
 0x132   :  { %v183_v50 = vadd.f32 1e-05, %v179_v48  ;;  %v184_v51 = vadd.f32 1e-05, %v180_v49 }
 0x133   :  { %v177_v52 = vpop.xlane.xlu1 %176 }
 0x134   :  { %11975 = vrsqrt.f32 %v183_v50  ;;  %v181_v53 = vmul.f32 0.03125, %v177_v52 }
 0x135   :  { %11977 = vrsqrt.f32 %v184_v51 }
 0x136   :  { %v185_v54 = vadd.f32 1e-05, %v181_v53 }
 0x138   :  { %11979 = vrsqrt.f32 %v185_v54 }
 0x13a   :  { %v11974_v55 = vpop.eup %11973 }
 0x13b   :  { %v190_v57 = vmul.f32 %v11974_v55, %v12233_v12  ;;  %v12184_v12 = vmov 0.0  }
 0x13c   :  { %10781 = vmatprep.subr.mxu1 %v12184_v12 }
 0x13d   :  { %v200_v59 = vmul.f32 %v9880_v56, %v190_v57 }
 0x13e   :  { %v11976_v60 = vpop.eup %11975 }
 0x13f   :  { %v11978_v61 = vpop.eup %11977  ;;  %v12291_v62 = vadd.f32 %v9881_v58, %v200_v59  ;;  %v191_v63 = vmul.f32 %v11976_v60, %v12241_v20 }
 0x140   :  { %v192_v0 = vmul.f32 %v11978_v61, %v12235_v13  ;;  %v9887_v13 = vld [vmem:[%s12337_s29] ss:$0 sm:$0xff] }
 0x141   :  { %v201_v1 = vmul.f32 %v9880_v56, %v191_v63  ;;  %10747 = vmatprep.mubr.msk.f32.mxu0 %vm140_vm0, %v12291_v62  ;;  %10761 = vmatprep.mubr.msk.f32.mxu1 %vm140_vm0, %v12291_v62 }
 0x142   :  { %v11980_v4 = vpop.eup %11979  ;;  %v202_v5 = vmul.f32 %v9880_v56, %v192_v0 }
 0x143   :  { %v12301_v6 = vadd.f32 %v9881_v58, %v201_v1  ;;  %v193_v7 = vmul.f32 %v11980_v4, %v12243_v21 }
 0x144   :  { %v12304_v8 = vadd.f32 %v9881_v58, %v202_v5 }
 0x145   :  { %v203_v10 = vmul.f32 %v9880_v56, %v193_v7  ;;  %10748 = vmatmul.mubr.msk.f32.vlgmr.msra.gmra.mrb[0].mxu0 %vm140_vm0, %v12301_v6  ;;  %10762 = vmatmul.mubr.msk.f32.vlgmr.msra.gmra.mrb[0].mxu1 %vm140_vm0, %v12301_v6 }
 0x146   :  { %10750 = vmatprep.mubr.msk.f32.mxu0 %vm140_vm0, %v12304_v8  ;;  %10764 = vmatprep.mubr.msk.f32.mxu1 %vm140_vm0, %v12304_v8 }
 0x147   :  { %v12314_v11 = vadd.f32 %v9881_v58, %v203_v10  ;;  %11633 = vmatpush3.bf16.msra.mxu0 %v11630_v42 }
 0x148   :  { %11635 = vmatprep.subr.bf16.mxu0 %v11634_v9 }
 0x149   :  { %10751 = vmatmul.mubr.msk.f32.gmra.mrb[2].mxu0 %vm140_vm0, %v12314_v11  ;;  %10765 = vmatmul.mubr.msk.f32.gmra.mrb[2].mxu1 %vm140_vm0, %v12314_v11 }
 0x14a   :  { %10775 = vmatprep.mubr.msk.f32.mxu0 %vm140_vm0, %v12291_v62  ;;  %10783 = vmatprep.mubr.msk.f32.mxu1 %vm12185_vm1, %v12184_v12 }
 0x14b   :  { %11637 = vmatpush3.bf16.msra.mxu0 %v11634_v9 }
 0x14c   :  { %10791 = vmatprep.subr.mxu0 %v12184_v12 }
 0x14e   :  { %10776 = vmatmul.mubr.msk.f32.vlgmr.msra.gmra.mrb[4].mxu0 %vm140_vm0, %v12301_v6 }
 0x14f   :  { %10778 = vmatprep.mubr.msk.f32.mxu0 %vm140_vm0, %v12304_v8 }
 0x152   :  { %10779 = vmatmul.mubr.msk.f32.gmra.mrb[6].mxu0 %vm140_vm0, %v12314_v11 }
 0x153   :  { %10793 = vmatprep.mubr.msk.f32.mxu0 %vm12185_vm1, %v12184_v12 }
 0x218   :  { %v10749_v14 = vpop.f32.mrb[0].mxu0  ;;  %v10763_v15 = vpop.f32.mrb[0].mxu1 }
 0x219   :  { %v303_v16 = vpop.f32.mrb[1].mxu0  ;;  %v399_v17 = vpop.f32.mrb[1].mxu1  ;;  %v405_v25 = vadd.f32 %v10763_v15, %v9887_v13  ;;  %v309_v28 = vadd.f32 %v10749_v14, %v9882_v18 }
 0x21a   :  { %v400_v19 = vadd.f32 %v9887_v13, %v399_v17  ;;  %v304_v22 = vadd.f32 %v9882_v18, %v303_v16 }
 0x21c   :  { %v10752_v20 = vpop.f32.mrb[2].mxu0  ;;  %v10766_v21 = vpop.f32.mrb[2].mxu1  ;;  %10782 = vmatpush3.xpose.msk.msra.mxu1 %vm514_vm2, %v400_v19 }
 0x21d   :  { %v313_v23 = vpop.f32.mrb[3].mxu0  ;;  %v409_v24 = vpop.f32.mrb[3].mxu1  ;;  %10786 = vmatprep.subr.mxu1 %v12184_v12  ;;  %v415_v31 = vadd.f32 %v10766_v21, %v9887_v13  ;;  %v319_v34 = vadd.f32 %v10752_v20, %v9882_v18 }
 0x21e   :  { %v410_v26 = vadd.f32 %v9887_v13, %v409_v24  ;;  %v314_v29 = vadd.f32 %v9882_v18, %v313_v23  ;;  %v9910_v23 = vld [vmem:[%s12256_s9 + $0x28] sm:$0xff] }
 0x21f   :  { %10784 = vmatmul.mubr.msk.f32.vlgmr.msra.gmra.mrb[4].mxu1 %vm514_vm2, %v304_v22  ;;  %v9909_v22 = vld [vmem:[%s12256_s9 + $0x20] sm:$0xff] }
 0x220   :  { %10787 = vmatpush3.xpose.msk.msra.mxu1 %vm514_vm2, %v405_v25  ;;  %10792 = vmatpush3.xpose.msk.msra.mxu0 %vm514_vm2, %v410_v26  ;;  %v11638_v26 = vpack.c.bf16 %v9910_v23, %v9909_v22 }
 0x221   :  { %v10777_v30 = vpop.f32.mrb[4].mxu0  ;;  %10788 = vmatprep.mubr.msk.f32.mxu1 %vm12185_vm1, %v12184_v12  ;;  %10796 = vmatprep.subr.mxu1 %v12184_v12 }
 0x222   :  { %v495_v32 = vpop.f32.mrb[5].mxu0  ;;  %10801 = vmatprep.subr.mxu0 %v12184_v12  ;;  %v501_v36 = vadd.f32 %v10777_v30, %v9892_v27  ;;  %v9919_v30 = vld [vmem:[%s12261_s13 + $0x20] sm:$0xff] }
 0x223   :  { %v496_v33 = vadd.f32 %v9892_v27, %v495_v32  ;;  %10789 = vmatmul.mubr.msk.f32.vlgmr.msra.gmra.mrb[6].mxu1 %vm514_vm2, %v309_v28  ;;  %10794 = vmatmul.mubr.msk.f32.vlgmr.msra.gmra.mrb[8].mxu0 %vm514_vm2, %v314_v29  ;;  %v9912_v28 = vld [vmem:[%s12256_s9 + $0x38] sm:$0xff] }
 0x224   :  { %10797 = vmatpush3.xpose.msk.msra.mxu1 %vm514_vm2, %v415_v31  ;;  %10798 = vmatprep.mubr.msk.f32.mxu1 %vm12185_vm1, %v12184_v12  ;;  %v9920_v31 = vld [vmem:[%s12261_s13 + $0x28] sm:$0xff] }
 0x225   :  { %v10780_v35 = vpop.f32.mrb[6].mxu0  ;;  %10802 = vmatpush3.msra.mxu0 %v496_v33  ;;  %10806 = vmatprep.subr.mxu1 %v12184_v12 }
 0x226   :  { %v12367_v37 = vadd.f32 %v10780_v35, %v9892_v27  ;;  %v505_v38 = vpop.f32.mrb[7].mxu0  ;;  %10803 = vmatprep.mubr.msk.f32.mxu0 %vm12185_vm1, %v12184_v12  ;;  %10811 = vmatprep.subr.mxu0 %v12184_v12 }
 0x227   :  { %v12372_v39 = vadd.f32 %v9892_v27, %v505_v38  ;;  %10799 = vmatmul.mubr.msk.f32.vlgmr.msra.gmra.mrb[8].mxu1 %vm514_vm2, %v319_v34  ;;  %v9911_v27 = vld [vmem:[%s12256_s9 + $0x30] sm:$0xff]  ;;  %v9922_v38 = vld [vmem:[%s12261_s13 + $0x38] sm:$0xff] }
 0x228   :  { %10807 = vmatpush3.msra.mxu1 %v501_v36  ;;  %10808 = vmatprep.mubr.msk.f32.mxu1 %vm12185_vm1, %v12184_v12  ;;  %v11642_v35 = vpack.c.bf16 %v9912_v28, %v9911_v27  ;;  %v9921_v36 = vld [vmem:[%s12261_s13 + $0x30] sm:$0xff] }
 0x229   :  { %10816 = vmatprep.subr.mxu1 %v12184_v12 }
 0x2f2   :  { %v587_v41 = vpop.f32.mrb[4].mxu1 }
 0x2f3   :  { %v588_v42 = vadd.f32 %v587_v41, %v12384_v40  ;;  %v10785_v43 = vpop.f32.mrb[5].mxu1  ;;  %v11646_v41 = vpack.c.bf16 %v9920_v31, %v9919_v30 }
 0x2f4   :  { %v9930_v43 = vld [vmem:[%s12270_s17 + $0x28] sm:$0xff] }
 0x2f5   :  { %v819_v44 = vsel %vm514_vm2, %v588_v42, -inf }
 0x2f6   :  { %820 = vmax.xlane.f32.xlu1 %v819_v44  ;;  %v663_v45 = vpop.f32.mrb[6].mxu1  ;;  %v739_v46 = vpop.f32.mrb[8].mxu0 }
 0x2f7   :  { %v664_v47 = vadd.f32 %v663_v45, %v12384_v40  ;;  %v740_v48 = vadd.f32 %v739_v46, %v12384_v40  ;;  %v10790_v49 = vpop.f32.mrb[7].mxu1  ;;  %v10795_v50 = vpop.f32.mrb[9].mxu0  ;;  %v11650_v45 = vpack.c.bf16 %v9922_v38, %v9921_v36 }
 0x2f9   :  { %v822_v51 = vsel %vm514_vm2, %v664_v47, -inf  ;;  %v825_v52 = vsel %vm514_vm2, %v740_v48, -inf }
 0x2fa   :  { %823 = vmax.xlane.f32.xlu0 %v822_v51  ;;  %v815_v53 = vpop.f32.mrb[8].mxu1  ;;  %826 = vmax.xlane.f32.xlu1 %v825_v52 }
 0x2fb   :  { %v816_v54 = vadd.f32 %v815_v53, %v12384_v40  ;;  %v10800_v55 = vpop.f32.mrb[9].mxu1 }
 0x2fd   :  { %v828_v56 = vsel %vm514_vm2, %v816_v54, -inf }
 0x2fe   :  { %829 = vmax.xlane.f32.xlu0 %v828_v56 }
 0x383   :  { %v821_v57 = vpop.xlane.xlu1 %820 }
 0x384   :  { %v831_v58 = vsub.f32 %v588_v42, %v821_v57  ;;  %v9929_v42 = vld [vmem:[%s12270_s17 + $0x20] sm:$0xff] }
 0x385   :  { %v11654_v46 = vpack.c.bf16 %v9930_v43, %v9929_v42 }
 0x386   :  { %v835_v59 = vmul.f32 1.442695, %v831_v58 }
 0x387   :  { %v824_v60 = vpop.xlane.xlu0 %823  ;;  %v827_v61 = vpop.xlane.xlu1 %826 }
 0x388   :  { %11981 = vpow2.f32 %v835_v59  ;;  %v832_v63 = vsub.f32 %v664_v47, %v824_v60  ;;  %v833_v0 = vsub.f32 %v740_v48, %v827_v61  ;;  %v9931_v47 = vld [vmem:[%s12270_s17 + $0x30] sm:$0xff]  ;;  %v9932_v48 = vld [vmem:[%s12270_s17 + $0x38] sm:$0xff]  ;;  %v9924_v59 = vld [vmem:[%s12337_s29 + $0x1] ss:$0 sm:$0xff] }
 0x38a   :  { %v837_v1 = vmul.f32 1.442695, %v832_v63  ;;  %v839_v2 = vmul.f32 1.442695, %v833_v0  ;;  %v9914_v0 = vld [vmem:[%s12342_s3 + $0x1] ss:$0 sm:$0xff] }
 0x38b   :  { %v830_v3 = vpop.xlane.xlu0 %829 }
 0x38c   :  { %11983 = vpow2.f32 %v837_v1  ;;  %v834_v4 = vsub.f32 %v816_v54, %v830_v3 }
 0x38d   :  { %11985 = vpow2.f32 %v839_v2 }
 0x38e   :  { %v841_v5 = vmul.f32 1.442695, %v834_v4 }
 0x390   :  { %11987 = vpow2.f32 %v841_v5 }
 0x392   :  { %v11982_v7 = vpop.eup %11981 }
 0x393   :  { %v843_v9 = vsel %vm514_vm2, %v11982_v7, 0.0 }
 0x394   :  { %844 = vadd.xlane.f32.xlu1 %v843_v9 }
 0x396   :  { %v11984_v10 = vpop.eup %11983 }
 0x397   :  { %v11986_v13 = vpop.eup %11985  ;;  %v846_v14 = vsel %vm514_vm2, %v11984_v10, 0.0 }
 0x398   :  { %847 = vadd.xlane.f32.xlu0 %v846_v14  ;;  %v849_v15 = vsel %vm514_vm2, %v11986_v13, 0.0  ;;  %v9934_v14 = vld [vmem:[%s12348_s8 + $0x1] ss:$0 sm:$0xff] }
 0x399   :  { %850 = vadd.xlane.f32.xlu1 %v849_v15 }
 0x39a   :  { %v11988_v16 = vpop.eup %11987 }
 0x39b   :  { %v852_v17 = vsel %vm514_vm2, %v11988_v16, 0.0 }
 0x39c   :  { %853 = vadd.xlane.f32.xlu0 %v852_v17 }
 0x421   :  { %v845_v18 = vpop.xlane.xlu1 %844 }
 0x422   :  { %11989 = vrcp.f32 %v845_v18 }
 0x425   :  { %v848_v19 = vpop.xlane.xlu0 %847 }
 0x426   :  { %11991 = vrcp.f32 %v848_v19  ;;  %v851_v20 = vpop.xlane.xlu1 %850 }
 0x427   :  { %11993 = vrcp.f32 %v851_v20 }
 0x429   :  { %v854_v21 = vpop.xlane.xlu0 %853 }
 0x42a   :  { %11995 = vrcp.f32 %v854_v21 }
 0x42c   :  { %v11990_v24 = vpop.eup %11989 }
 0x42d   :  { %v856_v25 = vmul.f32 %v11990_v24, %v11982_v7 }
 0x42f   :  { %10804 = vmatmul.mubr.msk.f32.vlgmr.msra.gmra.mrb[10].mxu0 %vm514_vm2, %v856_v25 }
 0x430   :  { %v11992_v29 = vpop.eup %11991  ;;  %10812 = vmatpush3.msra.mxu0 %v12372_v39  ;;  %10813 = vmatprep.mubr.msk.f32.mxu0 %vm12185_vm1, %v12184_v12 }
 0x431   :  { %v11994_v32 = vpop.eup %11993  ;;  %v858_v33 = vmul.f32 %v11992_v29, %v11984_v10  ;;  %11639 = vmatprep.subr.bf16.mxu0 %v11638_v26 }
 0x432   :  { %v860_v34 = vmul.f32 %v11994_v32, %v11986_v13 }
 0x433   :  { %10809 = vmatmul.mubr.msk.f32.vlgmr.msra.gmra.mrb[10].mxu1 %vm514_vm2, %v858_v33 }
 0x434   :  { %v11996_v39 = vpop.eup %11995  ;;  %10814 = vmatmul.mubr.msk.f32.vlgmr.msra.gmra.mrb[12].mxu0 %vm514_vm2, %v860_v34  ;;  %10817 = vmatpush3.msra.mxu1 %v12367_v37  ;;  %v11658_v37 = vpack.c.bf16 %v9932_v48, %v9931_v47 }
 0x435   :  { %v862_v44 = vmul.f32 %v11996_v39, %v11988_v16  ;;  %11641 = vmatpush3.bf16.msra.mxu0 %v11638_v26  ;;  %10829 = vmatprep.mubr.msk.f32.mxu0 %vm140_vm0, %v12291_v62 }
 0x436   :  { %10818 = vmatprep.mubr.msk.f32.mxu1 %vm12185_vm1, %v12184_v12  ;;  %11643 = vmatprep.subr.bf16.mxu0 %v11642_v35 }
 0x437   :  { %11647 = vmatprep.subr.bf16.mxu1 %v11646_v41  ;;  %10819 = vmatmul.mubr.msk.f32.vlgmr.msra.gmra.mrb[12].mxu1 %vm514_vm2, %v862_v44 }
 0x438   :  { %11649 = vmatpush3.bf16.msra.mxu1 %v11646_v41  ;;  %10843 = vmatprep.mubr.msk.f32.mxu1 %vm140_vm0, %v12291_v62 }
 0x439   :  { %11645 = vmatpush3.bf16.msra.mxu0 %v11642_v35  ;;  %11651 = vmatprep.subr.bf16.mxu1 %v11650_v45 }
 0x43a   :  { %11655 = vmatprep.subr.bf16.mxu0 %v11654_v46 }
 0x43c   :  { %10830 = vmatmul.mubr.msk.f32.vlgmr.msra.gmra.mrb[14].mxu0 %vm140_vm0, %v12301_v6  ;;  %11653 = vmatpush3.bf16.msra.mxu1 %v11650_v45 }
 0x43d   :  { %10832 = vmatprep.mubr.msk.f32.mxu0 %vm140_vm0, %v12304_v8  ;;  %11657 = vmatpush3.bf16.msra.mxu0 %v11654_v46 }
 0x43e   :  { %11659 = vmatprep.subr.bf16.mxu0 %v11658_v37  ;;  %10863 = vmatprep.subr.mxu1 %v12184_v12 }
 0x43f   :  { %10844 = vmatmul.mubr.msk.f32.vlgmr.msra.gmra.mrb[14].mxu1 %vm140_vm0, %v12301_v6 }
 0x440   :  { %10833 = vmatmul.mubr.msk.f32.gmra.mrb[16].mxu0 %vm140_vm0, %v12314_v11  ;;  %10846 = vmatprep.mubr.msk.f32.mxu1 %vm140_vm0, %v12304_v8 }
 0x441   :  { %11661 = vmatpush3.bf16.msra.mxu0 %v11658_v37  ;;  %10857 = vmatprep.mubr.msk.f32.mxu0 %vm140_vm0, %v12291_v62 }
 0x442   :  { %10873 = vmatprep.subr.mxu0 %v12184_v12 }
 0x443   :  { %10847 = vmatmul.mubr.msk.f32.gmra.mrb[16].mxu1 %vm140_vm0, %v12314_v11 }
 0x444   :  { %10858 = vmatmul.mubr.msk.f32.vlgmr.msra.gmra.mrb[18].mxu0 %vm140_vm0, %v12301_v6  ;;  %10865 = vmatprep.mubr.msk.f32.mxu1 %vm12185_vm1, %v12184_v12 }
 0x445   :  { %10860 = vmatprep.mubr.msk.f32.mxu0 %vm140_vm0, %v12304_v8 }
 0x448   :  { %10861 = vmatmul.mubr.msk.f32.gmra.mrb[20].mxu0 %vm140_vm0, %v12314_v11 }
 0x449   :  { %10875 = vmatprep.mubr.msk.f32.mxu0 %vm12185_vm1, %v12184_v12 }
 0x502   :  { %v12450_v49 = vpop.f32.mrb[10].mxu0 }
 0x503   :  { %v10805_v50 = vpop.f32.mrb[11].mxu0 }
 0x506   :  { %v12452_v51 = vpop.f32.mrb[10].mxu1 }
 0x507   :  { %v12454_v52 = vpop.f32.mrb[12].mxu0  ;;  %v10810_v53 = vpop.f32.mrb[11].mxu1 }
 0x508   :  { %v10815_v54 = vpop.f32.mrb[13].mxu0 }
 0x50a   :  { %v12456_v55 = vpop.f32.mrb[12].mxu1 }
 0x50b   :  { %v10820_v56 = vpop.f32.mrb[13].mxu1 }
 0x50f   :  { %v10831_v57 = vpop.f32.mrb[14].mxu0 }
 0x510   :  { %v1235_v58 = vpop.f32.mrb[15].mxu0  ;;  %v1241_v15 = vadd.f32 %v10831_v57, %v9914_v0 }
 0x511   :  { %v1236_v4 = vadd.f32 %v9914_v0, %v1235_v58 }
 0x512   :  { %v10845_v60 = vpop.f32.mrb[14].mxu1 }
 0x513   :  { %v10834_v61 = vpop.f32.mrb[16].mxu0  ;;  %v1333_v63 = vpop.f32.mrb[15].mxu1  ;;  %v1339_v9 = vadd.f32 %v10845_v60, %v9924_v59 }
 0x514   :  { %v1245_v1 = vpop.f32.mrb[17].mxu0  ;;  %v1334_v2 = vadd.f32 %v9924_v59, %v1333_v63  ;;  %v1251_v23 = vadd.f32 %v10834_v61, %v9914_v0 }
 0x515   :  { %v1246_v16 = vadd.f32 %v9914_v0, %v1245_v1 }
 0x516   :  { %v10848_v3 = vpop.f32.mrb[16].mxu1  ;;  %10864 = vmatpush3.xpose.msk.msra.mxu1 %vm514_vm2, %v1334_v2 }
 0x517   :  { %v10859_v5 = vpop.f32.mrb[18].mxu0  ;;  %v1343_v7 = vpop.f32.mrb[17].mxu1  ;;  %10868 = vmatprep.subr.mxu1 %v12184_v12  ;;  %v1349_v18 = vadd.f32 %v10848_v3, %v9924_v59 }
 0x518   :  { %v1344_v10 = vadd.f32 %v9924_v59, %v1343_v7  ;;  %v1431_v13 = vpop.f32.mrb[19].mxu0  ;;  %v1437_v24 = vadd.f32 %v10859_v5, %v9934_v14 }
 0x519   :  { %10866 = vmatmul.mubr.msk.f32.vlgmr.msra.gmra.mrb[18].mxu1 %vm514_vm2, %v1236_v4  ;;  %v1432_v19 = vadd.f32 %v9934_v14, %v1431_v13  ;;  %v9960_v13 = vld [vmem:[%s12256_s9 + $0x40] sm:$0xff] }
 0x51a   :  { %10869 = vmatpush3.xpose.msk.msra.mxu1 %vm514_vm2, %v1339_v9  ;;  %10874 = vmatpush3.xpose.msk.msra.mxu0 %vm514_vm2, %v1344_v10 }
 0x51b   :  { %v10862_v17 = vpop.f32.mrb[20].mxu0  ;;  %10870 = vmatprep.mubr.msk.f32.mxu1 %vm12185_vm1, %v12184_v12  ;;  %10878 = vmatprep.subr.mxu1 %v12184_v12 }
 0x51c   :  { %v12469_v20 = vadd.f32 %v10862_v17, %v9934_v14  ;;  %v1441_v21 = vpop.f32.mrb[21].mxu0  ;;  %10883 = vmatprep.subr.mxu0 %v12184_v12 }
 0x51d   :  { %v12472_v22 = vadd.f32 %v9934_v14, %v1441_v21  ;;  %10871 = vmatmul.mubr.msk.f32.vlgmr.msra.gmra.mrb[20].mxu1 %vm514_vm2, %v1241_v15  ;;  %10876 = vmatmul.mubr.msk.f32.vlgmr.msra.gmra.mrb[22].mxu0 %vm514_vm2, %v1246_v16  ;;  %v9961_v14 = vld [vmem:[%s12256_s9 + $0x48] sm:$0xff]  ;;  %v9962_v21 = vld [vmem:[%s12256_s9 + $0x50] sm:$0xff] }
 0x51e   :  { %10879 = vmatpush3.xpose.msk.msra.mxu1 %vm514_vm2, %v1349_v18  ;;  %10884 = vmatpush3.msra.mxu0 %v1432_v19  ;;  %v11662_v19 = vpack.c.bf16 %v9961_v14, %v9960_v13 }
 0x51f   :  { %10880 = vmatprep.mubr.msk.f32.mxu1 %vm12185_vm1, %v12184_v12  ;;  %10888 = vmatprep.subr.mxu1 %v12184_v12 }
 0x520   :  { %10885 = vmatprep.mubr.msk.f32.mxu0 %vm12185_vm1, %v12184_v12  ;;  %10893 = vmatprep.subr.mxu0 %v12184_v12 }
 0x521   :  { %10881 = vmatmul.mubr.msk.f32.vlgmr.msra.gmra.mrb[22].mxu1 %vm514_vm2, %v1251_v23  ;;  %v9963_v23 = vld [vmem:[%s12256_s9 + $0x58] sm:$0xff] }
 0x522   :  { %10889 = vmatpush3.msra.mxu1 %v1437_v24  ;;  %10890 = vmatprep.mubr.msk.f32.mxu1 %vm12185_vm1, %v12184_v12 }
 0x523   :  { %10898 = vmatprep.subr.mxu1 %v12184_v12 }
 0x5ec   :  { %v1522_v25 = vpop.f32.mrb[18].mxu1 }
 0x5ed   :  { %v1523_v26 = vadd.f32 %v1522_v25, %v12384_v40  ;;  %v10867_v27 = vpop.f32.mrb[19].mxu1  ;;  %v11666_v25 = vpack.c.bf16 %v9963_v23, %v9962_v21 }
 0x5ee   :  { %v9971_v27 = vld [vmem:[%s12261_s13 + $0x48] sm:$0xff] }
 0x5ef   :  { %v1754_v28 = vsel %vm514_vm2, %v1523_v26, -inf }
 0x5f0   :  { %v1674_v29 = vpop.f32.mrb[22].mxu0  ;;  %1755 = vmax.xlane.f32.xlu1 %v1754_v28  ;;  %v1598_v30 = vpop.f32.mrb[20].mxu1 }
 0x5f1   :  { %v1675_v31 = vadd.f32 %v1674_v29, %v12384_v40  ;;  %v1599_v32 = vadd.f32 %v1598_v30, %v12384_v40  ;;  %v10872_v33 = vpop.f32.mrb[21].mxu1  ;;  %v10877_v34 = vpop.f32.mrb[23].mxu0  ;;  %v9972_v29 = vld [vmem:[%s12261_s13 + $0x50] sm:$0xff]  ;;  %v9973_v30 = vld [vmem:[%s12261_s13 + $0x58] sm:$0xff] }
 0x5f3   :  { %v1760_v35 = vsel %vm514_vm2, %v1675_v31, -inf  ;;  %v1757_v36 = vsel %vm514_vm2, %v1599_v32, -inf }
 0x5f4   :  { %1761 = vmax.xlane.f32.xlu1 %v1760_v35  ;;  %1758 = vmax.xlane.f32.xlu0 %v1757_v36  ;;  %v1750_v38 = vpop.f32.mrb[22].mxu1  ;;  %v9980_v35 = vld [vmem:[%s12270_s17 + $0x40] sm:$0xff]  ;;  %v9981_v36 = vld [vmem:[%s12270_s17 + $0x48] sm:$0xff] }
 0x5f5   :  { %v1751_v41 = vadd.f32 %v1750_v38, %v12384_v40  ;;  %v10882_v42 = vpop.f32.mrb[23].mxu1 }
 0x5f7   :  { %v1763_v43 = vsel %vm514_vm2, %v1751_v41, -inf }
 0x5f8   :  { %1764 = vmax.xlane.f32.xlu0 %v1763_v43 }
 0x67d   :  { %v1756_v39 = vpop.xlane.xlu1 %1755 }
 0x67e   :  { %v1766_v44 = vsub.f32 %v1523_v26, %v1756_v39  ;;  %v9970_v26 = vld [vmem:[%s12261_s13 + $0x40] sm:$0xff] }
 0x67f   :  { %v11670_v28 = vpack.c.bf16 %v9971_v27, %v9970_v26 }
 0x680   :  { %v1770_v45 = vmul.f32 1.442695, %v1766_v44 }
 0x681   :  { %v1762_v46 = vpop.xlane.xlu1 %1761  ;;  %v1759_v47 = vpop.xlane.xlu0 %1758 }
 0x682   :  { %11997 = vpow2.f32 %v1770_v45  ;;  %v1768_v48 = vsub.f32 %v1675_v31, %v1762_v46  ;;  %v1767_v37 = vsub.f32 %v1599_v32, %v1759_v47  ;;  %v9951_v31 = vld [vmem:[%s12539_s19 + $0x8] sm:$0xff]  ;;  %v1155_v32 = vld [vmem:[%s12539_s19] sm:$0xff]  ;;  %v9982_v45 = vld [vmem:[%s12270_s17 + $0x50] sm:$0xff] }
 0x683   :  { %v9983_v46 = vld [vmem:[%s12270_s17 + $0x58] sm:$0xff] }
 0x684   :  { %v1774_v50 = vmul.f32 1.442695, %v1768_v48  ;;  %v1772_v53 = vmul.f32 1.442695, %v1767_v37  ;;  %v11682_v48 = vpack.c.bf16 %v9983_v46, %v9982_v45 }
 0x685   :  { %v1765_v54 = vpop.xlane.xlu0 %1764 }
 0x686   :  { %11999 = vpow2.f32 %v1774_v50  ;;  %v1769_v56 = vsub.f32 %v1751_v41, %v1765_v54  ;;  %v11678_v41 = vpack.c.bf16 %v9981_v36, %v9980_v35  ;;  %v9965_v54 = vld [vmem:[%s12342_s3 + $0x2] ss:$0 sm:$0xff] }
 0x687   :  { %12001 = vpow2.f32 %v1772_v53 }
 0x688   :  { %v1776_v57 = vmul.f32 1.442695, %v1769_v56 }
 0x68a   :  { %12003 = vpow2.f32 %v1776_v57 }
 0x68c   :  { %v11998_v58 = vpop.eup %11997 }
 0x68d   :  { %v1778_v59 = vsel %vm514_vm2, %v11998_v58, 0.0 }
 0x68e   :  { %1779 = vadd.xlane.f32.xlu1 %v1778_v59 }
 0x690   :  { %v12000_v60 = vpop.eup %11999 }
 0x691   :  { %v12002_v61 = vpop.eup %12001  ;;  %v1784_v63 = vsel %vm514_vm2, %v12000_v60, 0.0 }
 0x692   :  { %1785 = vadd.xlane.f32.xlu1 %v1784_v63  ;;  %v1781_v0 = vsel %vm514_vm2, %v12002_v61, 0.0 }
 0x693   :  { %1782 = vadd.xlane.f32.xlu0 %v1781_v0 }
 0x694   :  { %v12004_v1 = vpop.eup %12003 }
 0x695   :  { %v1787_v2 = vsel %vm514_vm2, %v12004_v1, 0.0 }
 0x697   :  { %1788 = vadd.xlane.f32.xlu0 %v1787_v2 }
 0x71b   :  { %v1780_v3 = vpop.xlane.xlu1 %1779 }
 0x71c   :  { %12005 = vrcp.f32 %v1780_v3  ;;  %v9985_v3 = vld [vmem:[%s12348_s8 + $0x2] ss:$0 sm:$0xff] }
 0x71f   :  { %v1786_v4 = vpop.xlane.xlu1 %1785 }
 0x720   :  { %12007 = vrcp.f32 %v1786_v4  ;;  %v1783_v5 = vpop.xlane.xlu0 %1782 }
 0x721   :  { %12009 = vrcp.f32 %v1783_v5 }
 0x724   :  { %v1789_v7 = vpop.xlane.xlu0 %1788 }
 0x725   :  { %12011 = vrcp.f32 %v1789_v7 }
 0x726   :  { %v12006_v9 = vpop.eup %12005 }
 0x727   :  { %v1791_v10 = vmul.f32 %v12006_v9, %v11998_v58 }
 0x729   :  { %10886 = vmatmul.mubr.msk.f32.vlgmr.msra.gmra.mrb[24].mxu0 %vm514_vm2, %v1791_v10 }
 0x72a   :  { %v12008_v15 = vpop.eup %12007  ;;  %10894 = vmatpush3.msra.mxu0 %v12472_v22  ;;  %10895 = vmatprep.mubr.msk.f32.mxu0 %vm12185_vm1, %v12184_v12 }
 0x72b   :  { %v12010_v16 = vpop.eup %12009  ;;  %v1795_v17 = vmul.f32 %v12008_v15, %v12000_v60  ;;  %10903 = vmatprep.subr.mxu0 %v9951_v31 }
 0x72c   :  { %v1793_v18 = vmul.f32 %v12010_v16, %v12002_v61 }
 0x72d   :  { %10896 = vmatmul.mubr.msk.f32.vlgmr.msra.gmra.mrb[26].mxu0 %vm514_vm2, %v1795_v17 }
 0x72e   :  { %10891 = vmatmul.mubr.msk.f32.vlgmr.msra.gmra.mrb[24].mxu1 %vm514_vm2, %v1793_v18  ;;  %10904 = vmatpush3.msra.mxu0 %v9951_v31 }
 0x72f   :  { %v12012_v24 = vpop.eup %12011  ;;  %10899 = vmatpush3.msra.mxu1 %v12469_v20  ;;  %10900 = vmatprep.mubr.msk.f32.mxu1 %vm12185_vm1, %v12184_v12  ;;  %v11674_v20 = vpack.c.bf16 %v9973_v30, %v9972_v29 }
 0x730   :  { %v1797_v22 = vmul.f32 %v12012_v24, %v12004_v1  ;;  %11663 = vmatprep.subr.bf16.mxu1 %v11662_v19  ;;  %10911 = vmatprep.subr.mxu0 %v1155_v32 }
 0x732   :  { %10901 = vmatmul.mubr.msk.f32.vlgmr.msra.gmra.mrb[26].mxu1 %vm514_vm2, %v1797_v22 }
 0x733   :  { %11665 = vmatpush3.bf16.msra.mxu1 %v11662_v19  ;;  %10927 = vmatprep.mubr.msk.f32.mxu1 %vm140_vm0, %v12291_v62 }
 0x734   :  { %11667 = vmatprep.subr.bf16.mxu1 %v11666_v25 }
 0x737   :  { %11669 = vmatpush3.bf16.msra.mxu1 %v11666_v25 }
 0x738   :  { %11671 = vmatprep.subr.bf16.mxu1 %v11670_v28 }
 0x73a   :  { %10928 = vmatmul.mubr.msk.f32.vlgmr.msra.gmra.mrb[28].mxu1 %vm140_vm0, %v12301_v6 }
 0x73b   :  { %10930 = vmatprep.mubr.msk.f32.mxu1 %vm140_vm0, %v12304_v8  ;;  %11673 = vmatpush3.bf16.msra.mxu1 %v11670_v28 }
 0x73c   :  { %11675 = vmatprep.subr.bf16.mxu1 %v11674_v20 }
 0x73e   :  { %10931 = vmatmul.mubr.msk.f32.gmra.mrb[30].mxu1 %vm140_vm0, %v12314_v11 }
 0x73f   :  { %11677 = vmatpush3.bf16.msra.mxu1 %v11674_v20  ;;  %10941 = vmatprep.mubr.msk.f32.mxu1 %vm140_vm0, %v12291_v62 }
 0x740   :  { %10961 = vmatprep.subr.mxu1 %v12184_v12 }
 0x742   :  { %10942 = vmatmul.mubr.msk.f32.vlgmr.msra.gmra.mrb[32].mxu1 %vm140_vm0, %v12301_v6 }
 0x743   :  { %10944 = vmatprep.mubr.msk.f32.mxu1 %vm140_vm0, %v12304_v8 }
 0x746   :  { %10945 = vmatmul.mubr.msk.f32.gmra.mrb[34].mxu1 %vm140_vm0, %v12314_v11 }
 0x747   :  { %10963 = vmatprep.mubr.msk.f32.mxu1 %vm12185_vm1, %v12184_v12 }
 0x7fc   :  { %v1867_v33 = vpop.f32.mrb[24].mxu0 }
 0x7fd   :  { %v10887_v34 = vpop.f32.mrb[25].mxu0  ;;  %10905 = vmatprep.mubr.msk.f32.mxu0 %vm514_vm2, %v1867_v33 }
 0x800   :  { %v2013_v38 = vpop.f32.mrb[26].mxu0 }
 0x801   :  { %v1940_v42 = vpop.f32.mrb[24].mxu1  ;;  %v10897_v43 = vpop.f32.mrb[27].mxu0 }
 0x802   :  { %v10892_v39 = vpop.f32.mrb[25].mxu1  ;;  %10906 = vmatmul.mubr.msk.f32.vlgmr.msra.gmra.mrb[28].mxu0 %vm514_vm2, %v1940_v42 }
 0x803   :  { %10908 = vmatprep.mubr.msk.f32.mxu0 %vm514_vm2, %v2013_v38  ;;  %10912 = vmatpush3.msra.mxu0 %v1155_v32 }
 0x804   :  { %11679 = vmatprep.subr.bf16.mxu0 %v11678_v41 }
 0x805   :  { %v2086_v44 = vpop.f32.mrb[26].mxu1 }
 0x806   :  { %v10902_v47 = vpop.f32.mrb[27].mxu1  ;;  %10909 = vmatmul.mubr.msk.f32.gmra.mrb[30].mxu0 %vm514_vm2, %v2086_v44 }
 0x807   :  { %10913 = vmatprep.mubr.msk.f32.mxu0 %vm514_vm2, %v12450_v49 }
 0x80a   :  { %10914 = vmatmul.mubr.msk.f32.vlgmr.msra.gmra.mrb[28].mxu0 %vm514_vm2, %v12452_v51  ;;  %v9975_v51 = vld [vmem:[%s12337_s29 + $0x2] ss:$0 sm:$0xff] }
 0x80b   :  { %11681 = vmatpush3.bf16.msra.mxu0 %v11678_v41  ;;  %10916 = vmatprep.mubr.msk.f32.mxu0 %vm514_vm2, %v12454_v52 }
 0x80c   :  { %11683 = vmatprep.subr.bf16.mxu0 %v11682_v48 }
 0x80d   :  { %v10929_v37 = vpop.f32.mrb[28].mxu1 }
 0x80e   :  { %v2365_v50 = vpop.f32.mrb[29].mxu1  ;;  %10917 = vmatmul.mubr.msk.f32.gmra.mrb[30].mxu0 %vm514_vm2, %v12456_v55  ;;  %v2371_v58 = vadd.f32 %v10929_v37, %v9965_v54 }
 0x80f   :  { %11685 = vmatpush3.bf16.msra.mxu0 %v11682_v48  ;;  %10955 = vmatprep.mubr.msk.f32.mxu0 %vm140_vm0, %v12291_v62  ;;  %v2366_v60 = vadd.f32 %v9965_v54, %v2365_v50 }
 0x810   :  { %10966 = vmatprep.subr.mxu0 %v12184_v12 }
 0x811   :  { %v10932_v49 = vpop.f32.mrb[30].mxu1 }
 0x812   :  { %v2375_v53 = vpop.f32.mrb[31].mxu1  ;;  %10956 = vmatmul.mubr.msk.f32.vlgmr.msra.gmra.mrb[32].mxu0 %vm140_vm0, %v12301_v6  ;;  %v2381_v1 = vadd.f32 %v10932_v49, %v9965_v54 }
 0x813   :  { %10958 = vmatprep.mubr.msk.f32.mxu0 %vm140_vm0, %v12304_v8  ;;  %v2376_v2 = vadd.f32 %v9965_v54, %v2375_v53 }
 0x815   :  { %v10943_v52 = vpop.f32.mrb[32].mxu1 }
 0x816   :  { %v2469_v56 = vadd.f32 %v10943_v52, %v9975_v51  ;;  %v2463_v57 = vpop.f32.mrb[33].mxu1  ;;  %10959 = vmatmul.mubr.msk.f32.gmra.mrb[34].mxu0 %vm140_vm0, %v12314_v11 }
 0x817   :  { %v2464_v55 = vadd.f32 %v9975_v51, %v2463_v57  ;;  %10968 = vmatprep.mubr.msk.f32.mxu0 %vm12185_vm1, %v12184_v12  ;;  %v10007_v57 = vld [vmem:[%s12256_s9 + $0x60] sm:$0xff] }
 0x818   :  { %10967 = vmatpush3.xpose.msk.msra.mxu0 %vm514_vm2, %v2469_v56 }
 0x819   :  { %v10946_v59 = vpop.f32.mrb[34].mxu1  ;;  %10962 = vmatpush3.xpose.msk.msra.mxu1 %vm514_vm2, %v2464_v55  ;;  %10976 = vmatprep.subr.mxu0 %v12184_v12  ;;  %v10008_v55 = vld [vmem:[%s12256_s9 + $0x68] sm:$0xff] }
 0x81a   :  { %v2479_v61 = vadd.f32 %v10946_v59, %v9975_v51  ;;  %v2473_v63 = vpop.f32.mrb[35].mxu1  ;;  %10971 = vmatprep.subr.mxu1 %v12184_v12 }
 0x81b   :  { %v2474_v0 = vadd.f32 %v9975_v51, %v2473_v63  ;;  %10969 = vmatmul.mubr.msk.f32.vlgmr.msra.gmra.mrb[36].mxu0 %vm514_vm2, %v2371_v58  ;;  %v11686_v63 = vpack.c.bf16 %v10008_v55, %v10007_v57  ;;  %v12698_v57 = vld [vmem:[%s12381_s14] sm:$0xff] }
 0x81c   :  { %10964 = vmatmul.mubr.msk.f32.vlgmr.msra.gmra.mrb[36].mxu1 %vm514_vm2, %v2366_v60  ;;  %10977 = vmatpush3.xpose.msk.msra.mxu0 %vm514_vm2, %v2479_v61 }
 0x81d   :  { %10972 = vmatpush3.xpose.msk.msra.mxu1 %vm514_vm2, %v2474_v0  ;;  %10978 = vmatprep.mubr.msk.f32.mxu0 %vm12185_vm1, %v12184_v12  ;;  %v10009_v0 = vld [vmem:[%s12256_s9 + $0x70] sm:$0xff] }
 0x81e   :  { %10973 = vmatprep.mubr.msk.f32.mxu1 %vm12185_vm1, %v12184_v12  ;;  %10986 = vmatprep.subr.mxu0 %v12184_v12 }
 0x81f   :  { %10979 = vmatmul.mubr.msk.f32.vlgmr.msra.gmra.mrb[38].mxu0 %vm514_vm2, %v2381_v1  ;;  %10981 = vmatprep.subr.mxu1 %v12184_v12  ;;  %v10010_v1 = vld [vmem:[%s12256_s9 + $0x78] sm:$0xff] }
 0x820   :  { %10974 = vmatmul.mubr.msk.f32.vlgmr.msra.gmra.mrb[38].mxu1 %vm514_vm2, %v2376_v2  ;;  %10988 = vmatprep.mubr.msk.f32.mxu0 %vm12185_vm1, %v12184_v12 }
 0x821   :  { %10983 = vmatprep.mubr.msk.f32.mxu1 %vm12185_vm1, %v12184_v12 }
 0x8e5   :  { %v10957_v4 = vpop.f32.mrb[32].mxu0 }
 0x8e6   :  { %v2567_v5 = vadd.f32 %v10957_v4, %v9985_v3  ;;  %v2561_v7 = vpop.f32.mrb[33].mxu0 }
 0x8e7   :  { %v2562_v9 = vadd.f32 %v9985_v3, %v2561_v7  ;;  %v11690_v7 = vpack.c.bf16 %v10010_v1, %v10009_v0 }
 0x8e8   :  { %10987 = vmatpush3.msra.mxu0 %v2567_v5 }
 0x8e9   :  { %v10960_v10 = vpop.f32.mrb[34].mxu0  ;;  %10982 = vmatpush3.msra.mxu1 %v2562_v9  ;;  %10996 = vmatprep.subr.mxu0 %v12184_v12  ;;  %v10027_v9 = vld [vmem:[%s12270_s17 + $0x60] sm:$0xff] }
 0x8ea   :  { %v12594_v13 = vadd.f32 %v10960_v10, %v9985_v3  ;;  %v2571_v14 = vpop.f32.mrb[35].mxu0  ;;  %10991 = vmatprep.subr.mxu1 %v12184_v12  ;;  %v10028_v10 = vld [vmem:[%s12270_s17 + $0x68] sm:$0xff] }
 0x8eb   :  { %v12597_v15 = vadd.f32 %v9985_v3, %v2571_v14  ;;  %v10029_v14 = vld [vmem:[%s12270_s17 + $0x70] sm:$0xff] }
 0x8ee   :  { %v2728_v16 = vpop.f32.mrb[36].mxu0 }
 0x8ef   :  { %v2729_v17 = vadd.f32 %v2728_v16, %v12384_v40  ;;  %v2652_v18 = vpop.f32.mrb[36].mxu1  ;;  %v10970_v19 = vpop.f32.mrb[37].mxu0 }
 0x8f0   :  { %v2653_v21 = vadd.f32 %v2652_v18, %v12384_v40  ;;  %v10965_v23 = vpop.f32.mrb[37].mxu1  ;;  %v10017_v18 = vld [vmem:[%s12261_s13 + $0x60] sm:$0xff]  ;;  %v10018_v19 = vld [vmem:[%s12261_s13 + $0x68] sm:$0xff] }
 0x8f1   :  { %v2887_v24 = vsel %vm514_vm2, %v2729_v17, -inf  ;;  %v10019_v23 = vld [vmem:[%s12261_s13 + $0x70] sm:$0xff] }
 0x8f2   :  { %2888 = vmax.xlane.f32.xlu1 %v2887_v24  ;;  %v2880_v22 = vpop.f32.mrb[38].mxu0  ;;  %v2884_v25 = vsel %vm514_vm2, %v2653_v21, -inf  ;;  %v10020_v24 = vld [vmem:[%s12261_s13 + $0x78] sm:$0xff] }
 0x8f3   :  { %v2881_v26 = vadd.f32 %v2880_v22, %v12384_v40  ;;  %v10980_v27 = vpop.f32.mrb[39].mxu0  ;;  %2885 = vmax.xlane.f32.xlu0 %v2884_v25  ;;  %v2804_v28 = vpop.f32.mrb[38].mxu1 }
 0x8f4   :  { %v2805_v29 = vadd.f32 %v2804_v28, %v12384_v40  ;;  %v10975_v30 = vpop.f32.mrb[39].mxu1  ;;  %v11698_v27 = vpack.c.bf16 %v10020_v24, %v10019_v23 }
 0x8f5   :  { %v2893_v20 = vsel %vm514_vm2, %v2881_v26, -inf }
 0x8f6   :  { %2894 = vmax.xlane.f32.xlu1 %v2893_v20  ;;  %v2890_v31 = vsel %vm514_vm2, %v2805_v29, -inf }
 0x8f7   :  { %2891 = vmax.xlane.f32.xlu0 %v2890_v31 }
 0x97f   :  { %v2889_v32 = vpop.xlane.xlu1 %2888 }
 0x980   :  { %v2897_v33 = vsub.f32 %v2729_v17, %v2889_v32  ;;  %v2886_v34 = vpop.xlane.xlu0 %2885  ;;  %v10002_v17 = vld [vmem:[%s12539_s19 + $0x10] sm:$0xff] }
 0x981   :  { %v2896_v35 = vsub.f32 %v2653_v21, %v2886_v34  ;;  %v11694_v21 = vpack.c.bf16 %v10018_v19, %v10017_v18 }
 0x982   :  { %v2902_v36 = vmul.f32 1.442695, %v2897_v33 }
 0x983   :  { %v2900_v38 = vmul.f32 1.442695, %v2896_v35  ;;  %v2895_v41 = vpop.xlane.xlu1 %2894 }
 0x984   :  { %12013 = vpow2.f32 %v2902_v36  ;;  %v2899_v42 = vsub.f32 %v2881_v26, %v2895_v41  ;;  %v2892_v43 = vpop.xlane.xlu0 %2891 }
 0x985   :  { %12015 = vpow2.f32 %v2900_v38  ;;  %v2898_v39 = vsub.f32 %v2805_v29, %v2892_v43  ;;  %v10032_v38 = vld [vmem:[%s12348_s8 + $0x3] ss:$0 sm:$0xff] }
 0x986   :  { %v2906_v40 = vmul.f32 1.442695, %v2899_v42 }
 0x987   :  { %v2904_v44 = vmul.f32 1.442695, %v2898_v39 }
 0x988   :  { %12017 = vpow2.f32 %v2906_v40  ;;  %v10012_v40 = vld [vmem:[%s12342_s3 + $0x3] ss:$0 sm:$0xff] }
 0x989   :  { %12019 = vpow2.f32 %v2904_v44 }
 0x98e   :  { %v12014_v45 = vpop.eup %12013 }
 0x98f   :  { %v12016_v46 = vpop.eup %12015  ;;  %v2911_v47 = vsel %vm514_vm2, %v12014_v45, 0.0 }
 0x990   :  { %2912 = vadd.xlane.f32.xlu1 %v2911_v47  ;;  %v2908_v48 = vsel %vm514_vm2, %v12016_v46, 0.0 }
 0x991   :  { %2909 = vadd.xlane.f32.xlu0 %v2908_v48 }
 0x992   :  { %v12018_v37 = vpop.eup %12017 }
 0x993   :  { %v12020_v50 = vpop.eup %12019  ;;  %v2917_v49 = vsel %vm514_vm2, %v12018_v37, 0.0 }
 0x994   :  { %2918 = vadd.xlane.f32.xlu1 %v2917_v49  ;;  %v2914_v53 = vsel %vm514_vm2, %v12020_v50, 0.0 }
 0x995   :  { %2915 = vadd.xlane.f32.xlu0 %v2914_v53 }
 0xa1d   :  { %v2913_v51 = vpop.xlane.xlu1 %2912 }
 0xa1e   :  { %12021 = vrcp.f32 %v2913_v51  ;;  %v2910_v52 = vpop.xlane.xlu0 %2909 }
 0xa1f   :  { %12023 = vrcp.f32 %v2910_v52 }
 0xa21   :  { %v2919_v54 = vpop.xlane.xlu1 %2918 }
 0xa22   :  { %12025 = vrcp.f32 %v2919_v54  ;;  %v2916_v56 = vpop.xlane.xlu0 %2915 }
 0xa23   :  { %12027 = vrcp.f32 %v2916_v56 }
 0xa28   :  { %v12022_v58 = vpop.eup %12021 }
 0xa29   :  { %v12024_v59 = vpop.eup %12023  ;;  %v2923_v60 = vmul.f32 %v12022_v58, %v12014_v45 }
 0xa2a   :  { %v2921_v61 = vmul.f32 %v12024_v59, %v12016_v46 }
 0xa2b   :  { %10989 = vmatmul.mubr.msk.f32.vlgmr.msra.gmra.mrb[40].mxu0 %vm514_vm2, %v2923_v60 }
 0xa2c   :  { %v12026_v2 = vpop.eup %12025  ;;  %10997 = vmatpush3.msra.mxu0 %v12594_v13  ;;  %10984 = vmatmul.mubr.msk.f32.vlgmr.msra.gmra.mrb[40].mxu1 %vm514_vm2, %v2921_v61  ;;  %v11702_v13 = vpack.c.bf16 %v10028_v10, %v10027_v9 }
 0xa2d   :  { %v12028_v3 = vpop.eup %12027  ;;  %v2927_v4 = vmul.f32 %v12026_v2, %v12018_v37  ;;  %10992 = vmatpush3.msra.mxu1 %v12597_v15  ;;  %10998 = vmatprep.mubr.msk.f32.mxu0 %vm12185_vm1, %v12184_v12  ;;  %v10030_v15 = vld [vmem:[%s12270_s17 + $0x78] sm:$0xff] }
 0xa2e   :  { %v2925_v5 = vmul.f32 %v12028_v3, %v12020_v50  ;;  %10993 = vmatprep.mubr.msk.f32.mxu1 %vm12185_vm1, %v12184_v12  ;;  %11687 = vmatprep.subr.bf16.mxu1 %v11686_v63  ;;  %v11706_v16 = vpack.c.bf16 %v10030_v15, %v10029_v14 }
 0xa2f   :  { %10999 = vmatmul.mubr.msk.f32.vlgmr.msra.gmra.mrb[42].mxu0 %vm514_vm2, %v2927_v4  ;;  %11001 = vmatprep.subr.mxu0 %v10002_v17 }
 0xa30   :  { %10994 = vmatmul.mubr.msk.f32.vlgmr.msra.gmra.mrb[42].mxu1 %vm514_vm2, %v2925_v5  ;;  %11002 = vmatpush3.msra.mxu0 %v10002_v17 }
 0xa31   :  { %11689 = vmatpush3.bf16.msra.mxu1 %v11686_v63  ;;  %11017 = vmatprep.mubr.msk.f32.mxu1 %vm140_vm0, %v12291_v62 }
 0xa32   :  { %11691 = vmatprep.subr.bf16.mxu1 %v11690_v7  ;;  %11695 = vmatprep.subr.bf16.mxu0 %v11694_v21 }
 0xa35   :  { %11693 = vmatpush3.bf16.msra.mxu1 %v11690_v7 }
 0xa36   :  { %11703 = vmatprep.subr.bf16.mxu1 %v11702_v13 }
 0xa38   :  { %11018 = vmatmul.mubr.msk.f32.vlgmr.msra.gmra.mrb[44].mxu1 %vm140_vm0, %v12301_v6 }
 0xa39   :  { %11020 = vmatprep.mubr.msk.f32.mxu1 %vm140_vm0, %v12304_v8  ;;  %11705 = vmatpush3.bf16.msra.mxu1 %v11702_v13 }
 0xa3a   :  { %11707 = vmatprep.subr.bf16.mxu1 %v11706_v16 }
 0xa3c   :  { %11021 = vmatmul.mubr.msk.f32.gmra.mrb[46].mxu1 %vm140_vm0, %v12314_v11 }
 0xa3d   :  { %11709 = vmatpush3.bf16.msra.mxu1 %v11706_v16  ;;  %11045 = vmatprep.mubr.msk.f32.mxu1 %vm140_vm0, %v12291_v62 }
 0xa3e   :  { %11056 = vmatprep.subr.mxu1 %v12184_v12 }
 0xa40   :  { %11046 = vmatmul.mubr.msk.f32.vlgmr.msra.gmra.mrb[48].mxu1 %vm140_vm0, %v12301_v6 }
 0xa41   :  { %11048 = vmatprep.mubr.msk.f32.mxu1 %vm140_vm0, %v12304_v8 }
 0xa44   :  { %11049 = vmatmul.mubr.msk.f32.gmra.mrb[50].mxu1 %vm140_vm0, %v12314_v11 }
 0xa45   :  { %11058 = vmatprep.mubr.msk.f32.mxu1 %vm12185_vm1, %v12184_v12 }
 0xafe   :  { %v3070_v22 = vpop.f32.mrb[40].mxu0 }
 0xaff   :  { %v2997_v25 = vpop.f32.mrb[40].mxu1  ;;  %v10990_v26 = vpop.f32.mrb[41].mxu0 }
 0xb00   :  { %v10985_v28 = vpop.f32.mrb[41].mxu1  ;;  %11003 = vmatprep.mubr.msk.f32.mxu0 %vm514_vm2, %v2997_v25 }
 0xb01   :  { %11004 = vmatmul.mubr.msk.f32.vlgmr.msra.gmra.mrb[28].mxu0 %vm514_vm2, %v3070_v22 }
 0xb02   :  { %v3216_v29 = vpop.f32.mrb[42].mxu0  ;;  %11697 = vmatpush3.bf16.msra.mxu0 %v11694_v21 }
 0xb03   :  { %v3143_v30 = vpop.f32.mrb[42].mxu1  ;;  %v11000_v20 = vpop.f32.mrb[43].mxu0  ;;  %11699 = vmatprep.subr.bf16.mxu0 %v11698_v27 }
 0xb04   :  { %v10995_v31 = vpop.f32.mrb[43].mxu1  ;;  %11006 = vmatprep.mubr.msk.f32.mxu0 %vm514_vm2, %v3143_v30 }
 0xb05   :  { %11007 = vmatmul.mubr.msk.f32.gmra.mrb[30].mxu0 %vm514_vm2, %v3216_v29 }
 0xb06   :  { %11701 = vmatpush3.bf16.msra.mxu0 %v11698_v27  ;;  %11031 = vmatprep.mubr.msk.f32.mxu0 %vm140_vm0, %v12291_v62 }
 0xb07   :  { %11051 = vmatprep.subr.mxu0 %v12184_v12 }
 0xb09   :  { %11032 = vmatmul.mubr.msk.f32.vlgmr.msra.gmra.mrb[44].mxu0 %vm140_vm0, %v12301_v6 }
 0xb0a   :  { %11034 = vmatprep.mubr.msk.f32.mxu0 %vm140_vm0, %v12304_v8  ;;  %v10022_v8 = vld [vmem:[%s12337_s29 + $0x3] ss:$0 sm:$0xff] }
 0xb0b   :  { %v11019_v32 = vpop.f32.mrb[44].mxu1 }
 0xb0c   :  { %v3402_v33 = vpop.f32.mrb[45].mxu1  ;;  %v3408_v46 = vadd.f32 %v11019_v32, %v10012_v40 }
 0xb0d   :  { %11035 = vmatmul.mubr.msk.f32.gmra.mrb[46].mxu0 %vm140_vm0, %v12314_v11  ;;  %v3403_v48 = vadd.f32 %v10012_v40, %v3402_v33 }
 0xb0e   :  { %11053 = vmatprep.mubr.msk.f32.mxu0 %vm12185_vm1, %v12184_v12 }
 0xb0f   :  { %v11022_v34 = vpop.f32.mrb[46].mxu1 }
 0xb10   :  { %v3412_v62 = vpop.f32.mrb[47].mxu1  ;;  %v3418_v53 = vadd.f32 %v11022_v34, %v10012_v40 }
 0xb11   :  { %v3413_v51 = vadd.f32 %v10012_v40, %v3412_v62 }
 0xb13   :  { %v11047_v35 = vpop.f32.mrb[48].mxu1 }
 0xb14   :  { %v3598_v36 = vpop.f32.mrb[49].mxu1  ;;  %v3604_v52 = vadd.f32 %v11047_v35, %v10032_v38 }
 0xb15   :  { %v3599_v54 = vadd.f32 %v10032_v38, %v3598_v36 }
 0xb17   :  { %v11050_v41 = vpop.f32.mrb[50].mxu1 }
 0xb18   :  { %v12669_v42 = vadd.f32 %v11050_v41, %v10032_v38  ;;  %v3608_v6 = vpop.f32.mrb[51].mxu1 }
 0xb19   :  { %v12671_v43 = vadd.f32 %v10032_v38, %v3608_v6 }
 0xbdc   :  { %v11033_v39 = vpop.f32.mrb[44].mxu0 }
 0xbdd   :  { %v3506_v44 = vadd.f32 %v11033_v39, %v10022_v8  ;;  %v3500_v45 = vpop.f32.mrb[45].mxu0 }
 0xbde   :  { %v3501_v11 = vadd.f32 %v10022_v8, %v3500_v45  ;;  %v10049_v45 = vld [vmem:[%s12539_s19 + $0x18] sm:$0xff] }
 0xbdf   :  { %11057 = vmatpush3.xpose.msk.msra.mxu1 %vm514_vm2, %v3506_v44 }
 0xbe0   :  { %v11036_v47 = vpop.f32.mrb[46].mxu0  ;;  %11052 = vmatpush3.xpose.msk.msra.mxu0 %vm514_vm2, %v3501_v11  ;;  %11066 = vmatprep.subr.mxu1 %v12184_v12 }
 0xbe1   :  { %v3516_v37 = vadd.f32 %v11036_v47, %v10022_v8  ;;  %v3510_v50 = vpop.f32.mrb[47].mxu0  ;;  %11061 = vmatprep.subr.mxu0 %v12184_v12 }
 0xbe2   :  { %v3511_v49 = vadd.f32 %v10022_v8, %v3510_v50  ;;  %11059 = vmatmul.mubr.msk.f32.vlgmr.msra.gmra.mrb[52].mxu1 %vm514_vm2, %v3408_v46 }
 0xbe3   :  { %11054 = vmatmul.mubr.msk.f32.vlgmr.msra.gmra.mrb[48].mxu0 %vm514_vm2, %v3403_v48  ;;  %11067 = vmatpush3.xpose.msk.msra.mxu1 %vm514_vm2, %v3516_v37 }
 0xbe4   :  { %11062 = vmatpush3.xpose.msk.msra.mxu0 %vm514_vm2, %v3511_v49  ;;  %11068 = vmatprep.mubr.msk.f32.mxu1 %vm12185_vm1, %v12184_v12 }
 0xbe5   :  { %11063 = vmatprep.mubr.msk.f32.mxu0 %vm12185_vm1, %v12184_v12  ;;  %11076 = vmatprep.subr.mxu1 %v12184_v12 }
 0xbe6   :  { %11069 = vmatmul.mubr.msk.f32.vlgmr.msra.gmra.mrb[54].mxu1 %vm514_vm2, %v3418_v53  ;;  %11071 = vmatprep.subr.mxu0 %v12184_v12  ;;  %v10054_v53 = vld [vmem:[%s12730_s24] ss:$0 sm:$0xff] }
 0xbe7   :  { %11064 = vmatmul.mubr.msk.f32.vlgmr.msra.gmra.mrb[50].mxu0 %vm514_vm2, %v3413_v51  ;;  %11077 = vmatpush3.msra.mxu1 %v3604_v52  ;;  %v12174_v51 = vld [vmem:[%s12223_s5 + $0x8] sm:$0xff] }
 0xbe8   :  { %11072 = vmatpush3.msra.mxu0 %v3599_v54  ;;  %11078 = vmatprep.mubr.msk.f32.mxu1 %vm12185_vm1, %v12184_v12 }
 0xbe9   :  { %11086 = vmatprep.subr.mxu1 %v12184_v12  ;;  %11073 = vmatprep.mubr.msk.f32.mxu0 %vm12185_vm1, %v12184_v12 }
 0xbea   :  { %11081 = vmatprep.subr.mxu0 %v12184_v12 }
 0xcb5   :  { %v3765_v56 = vpop.f32.mrb[52].mxu1 }
 0xcb6   :  { %v3766_v55 = vadd.f32 %v12698_v57, %v3765_v56  ;;  %v3689_v58 = vpop.f32.mrb[48].mxu0  ;;  %v11060_v59 = vpop.f32.mrb[53].mxu1  ;;  %v12175_v56 = vld [vmem:[%s12223_s5] sm:$0xff] }
 0xcb7   :  { %v3690_v60 = vadd.f32 %v12698_v57, %v3689_v58  ;;  %v11055_v61 = vpop.f32.mrb[49].mxu0 }
 0xcb8   :  { %v3924_v63 = vsel %vm514_vm2, %v3766_v55, -inf  ;;  %v12176_v61 = vld [vmem:[%s12223_s5 + $0x18] sm:$0xff] }
 0xcb9   :  { %3925 = vmax.xlane.f32.xlu1 %v3924_v63  ;;  %v3917_v0 = vpop.f32.mrb[54].mxu1  ;;  %v3921_v1 = vsel %vm514_vm2, %v3690_v60, -inf }
 0xcba   :  { %v3918_v2 = vadd.f32 %v12698_v57, %v3917_v0  ;;  %v11070_v3 = vpop.f32.mrb[55].mxu1  ;;  %3922 = vmax.xlane.f32.xlu0 %v3921_v1  ;;  %v3841_v4 = vpop.f32.mrb[50].mxu0 }
 0xcbb   :  { %v3842_v5 = vadd.f32 %v12698_v57, %v3841_v4  ;;  %v11065_v7 = vpop.f32.mrb[51].mxu0 }
 0xcbc   :  { %v3930_v9 = vsel %vm514_vm2, %v3918_v2, -inf }
 0xcbd   :  { %3931 = vmax.xlane.f32.xlu1 %v3930_v9  ;;  %v3927_v10 = vsel %vm514_vm2, %v3842_v5, -inf }
 0xcbe   :  { %3928 = vmax.xlane.f32.xlu0 %v3927_v10 }
 0xd46   :  { %v3926_v13 = vpop.xlane.xlu1 %3925 }
 0xd47   :  { %v3934_v14 = vsub.f32 %v3766_v55, %v3926_v13  ;;  %v3923_v15 = vpop.xlane.xlu0 %3922 }
 0xd48   :  { %v3933_v16 = vsub.f32 %v3690_v60, %v3923_v15 }
 0xd49   :  { %v3939_v17 = vmul.f32 1.442695, %v3934_v14 }
 0xd4a   :  { %v3937_v18 = vmul.f32 1.442695, %v3933_v16  ;;  %v3932_v19 = vpop.xlane.xlu1 %3931 }
 0xd4b   :  { %12029 = vpow2.f32 %v3939_v17  ;;  %v3936_v21 = vsub.f32 %v3918_v2, %v3932_v19  ;;  %v3929_v23 = vpop.xlane.xlu0 %3928  ;;  %v12177_v2 = vld [vmem:[%s12223_s5 + $0x10] sm:$0xff]  ;;  %s12192_s5 = smov 15  }
 0xd4c   :  { %12031 = vpow2.f32 %v3937_v18  ;;  %v3935_v24 = vsub.f32 %v3842_v5, %v3929_v23  ;;  %s12764_s28 = sld [smem:[%s13431_s0 + %s12192_s5]]  }
 0xd4d   :  { %v3943_v22 = vmul.f32 1.442695, %v3936_v21  ;;  %s12811_s5 = sld [smem:[%s13431_s0 + %s12196_s20]]   ;;  %s12212_s20 = smov 27  }
 0xd4e   :  { %v3941_v25 = vmul.f32 1.442695, %v3935_v24 }
 0xd4f   :  { %12033 = vpow2.f32 %v3943_v22 }
 0xd50   :  { %12035 = vpow2.f32 %v3941_v25 }
 0xd55   :  { %v12030_v26 = vpop.eup %12029 }
 0xd56   :  { %v12032_v27 = vpop.eup %12031  ;;  %v3948_v28 = vsel %vm514_vm2, %v12030_v26, 0.0 }
 0xd57   :  { %3949 = vadd.xlane.f32.xlu1 %v3948_v28  ;;  %v3945_v29 = vsel %vm514_vm2, %v12032_v27, 0.0 }
 0xd58   :  { %3946 = vadd.xlane.f32.xlu0 %v3945_v29 }
 0xd59   :  { %v12034_v30 = vpop.eup %12033 }
 0xd5a   :  { %v12036_v20 = vpop.eup %12035  ;;  %v3954_v31 = vsel %vm514_vm2, %v12034_v30, 0.0 }
 0xd5b   :  { %3955 = vadd.xlane.f32.xlu1 %v3954_v31  ;;  %v3951_v32 = vsel %vm514_vm2, %v12036_v20, 0.0 }
 0xd5c   :  { %3952 = vadd.xlane.f32.xlu0 %v3951_v32 }
 0xde4   :  { %v3950_v33 = vpop.xlane.xlu1 %3949 }
 0xde5   :  { %12037 = vrcp.f32 %v3950_v33  ;;  %v3947_v34 = vpop.xlane.xlu0 %3946  ;;  %v4449_v33 = vld [vmem:[%s12764_s28] sm:$0xff] }
 0xde6   :  { %12039 = vrcp.f32 %v3947_v34  ;;  %v4450_v34 = vld [vmem:[%s12764_s28 + $0x8] sm:$0xff] }
 0xde8   :  { %v3956_v62 = vpop.xlane.xlu1 %3955 }
 0xde9   :  { %12041 = vrcp.f32 %v3956_v62  ;;  %v3953_v35 = vpop.xlane.xlu0 %3952  ;;  %v11710_v62 = vpack.c.bf16 %v4450_v34, %v4449_v33  ;;  %v4596_v33 = vld [vmem:[%s12789_s18 + $0x78] sm:$0xff] }
 0xdea   :  { %12043 = vrcp.f32 %v3953_v35  ;;  %v4451_v35 = vld [vmem:[%s12764_s28 + $0x10] sm:$0xff] }
 0xdef   :  { %v12038_v36 = vpop.eup %12037 }
 0xdf0   :  { %v12040_v38 = vpop.eup %12039  ;;  %v3960_v41 = vmul.f32 %v12038_v36, %v12030_v26  ;;  %v4452_v36 = vld [vmem:[%s12764_s28 + $0x18] sm:$0xff] }
 0xdf1   :  { %v3958_v6 = vmul.f32 %v12040_v38, %v12032_v27  ;;  %v11714_v38 = vpack.c.bf16 %v4452_v36, %v4451_v35 }
 0xdf2   :  { %11079 = vmatmul.mubr.msk.f32.vlgmr.msra.gmra.mrb[56].mxu1 %vm514_vm2, %v3960_v41 }
 0xdf3   :  { %v12042_v8 = vpop.eup %12041  ;;  %11087 = vmatpush3.msra.mxu1 %v12669_v42  ;;  %11074 = vmatmul.mubr.msk.f32.vlgmr.msra.gmra.mrb[52].mxu0 %vm514_vm2, %v3958_v6 }
 0xdf4   :  { %v12044_v39 = vpop.eup %12043  ;;  %v3964_v40 = vmul.f32 %v12042_v8, %v12034_v30  ;;  %11082 = vmatpush3.msra.mxu0 %v12671_v43  ;;  %11088 = vmatprep.mubr.msk.f32.mxu1 %vm12185_vm1, %v12184_v12 }
 0xdf5   :  { %v3962_v44 = vmul.f32 %v12044_v39, %v12036_v20  ;;  %11083 = vmatprep.mubr.msk.f32.mxu0 %vm12185_vm1, %v12184_v12  ;;  %11091 = vmatprep.subr.mxu0 %v10049_v45 }
 0xdf6   :  { %11089 = vmatmul.mubr.msk.f32.vlgmr.msra.gmra.mrb[58].mxu1 %vm514_vm2, %v3964_v40  ;;  %11711 = vmatprep.subr.bf16.mxu1 %v11710_v62 }
 0xdf7   :  { %11084 = vmatmul.mubr.msk.f32.vlgmr.msra.gmra.mrb[54].mxu0 %vm514_vm2, %v3962_v44  ;;  %11713 = vmatpush3.bf16.msra.mxu1 %v11710_v62  ;;  %v10057_v62 = vld [vmem:[%s12811_s5] ss:$0 sm:$0xff] }
 0xdf8   :  { %11092 = vmatpush3.msra.mxu0 %v10049_v45  ;;  %11715 = vmatprep.subr.bf16.mxu1 %v11714_v38 }
 0xdfb   :  { %11717 = vmatpush3.bf16.msra.mxu1 %v11714_v38 }
 0xec5   :  { %v4107_v42 = vpop.f32.mrb[56].mxu1 }
 0xec6   :  { %v4034_v11 = vpop.f32.mrb[52].mxu0  ;;  %v11080_v46 = vpop.f32.mrb[57].mxu1 }
 0xec7   :  { %v11075_v47 = vpop.f32.mrb[53].mxu0  ;;  %11093 = vmatprep.mubr.msk.f32.mxu0 %vm514_vm2, %v4034_v11 }
 0xec8   :  { %11094 = vmatmul.mubr.msk.f32.vlgmr.msra.gmra.mrb[28].mxu0 %vm514_vm2, %v4107_v42 }
 0xec9   :  { %v4253_v43 = vpop.f32.mrb[58].mxu1 }
 0xeca   :  { %v4180_v48 = vpop.f32.mrb[54].mxu0  ;;  %v11090_v37 = vpop.f32.mrb[59].mxu1 }
 0xecb   :  { %v11085_v50 = vpop.f32.mrb[55].mxu0  ;;  %11096 = vmatprep.mubr.msk.f32.mxu0 %vm514_vm2, %v4180_v48  ;;  %v10055_v37 = vld [vmem:[%s12773_s4] ss:$0 sm:$0xff] }
 0xecc   :  { %11097 = vmatmul.mubr.msk.f32.gmra.mrb[30].mxu0 %vm514_vm2, %v4253_v43 }
 0xf9b   :  { %v11095_v49 = vpop.f32.mrb[28].mxu0 }
 0xf9c   :  { %v4361_v52 = vadd.f32 %v12174_v51, %v11095_v49  ;;  %v4337_v54 = vpop.f32.mrb[29].mxu0  ;;  %v10056_v51 = vld [vmem:[%s12778_s11] ss:$0 sm:$0xff] }
 0xf9d   :  { %v4360_v55 = vadd.f32 %v12175_v56, %v4337_v54 }
 0xf9e   :  { %v12735_v58 = vadd.f32 %v10054_v53, %v4361_v52 }
 0xf9f   :  { %v12737_v59 = vadd.f32 %v10054_v53, %v4360_v55  ;;  %v11098_v60 = vpop.f32.mrb[30].mxu0 }
 0xfa0   :  { %v4363_v63 = vadd.f32 %v12176_v61, %v11098_v60  ;;  %v4347_v0 = vpop.f32.mrb[31].mxu0  ;;  %v4380_v1 = vsel %vm140_vm0, %v12735_v58, 0.0 }
 0xfa1   :  { %v4362_v3 = vadd.f32 %v12177_v2, %v4347_v0  ;;  %4381 = vadd.xlane.f32.xlu1 %v4380_v1  ;;  %v4377_v4 = vsel %vm140_vm0, %v12737_v59, 0.0 }
 0xfa2   :  { %v12745_v5 = vadd.f32 %v10054_v53, %v4363_v63  ;;  %4378 = vadd.xlane.f32.xlu0 %v4377_v4 }
 0xfa3   :  { %v12747_v7 = vadd.f32 %v10054_v53, %v4362_v3 }
 0xfa4   :  { %v4386_v9 = vsel %vm140_vm0, %v12745_v5, 0.0 }
 0xfa5   :  { %4387 = vadd.xlane.f32.xlu1 %v4386_v9  ;;  %v4383_v10 = vsel %vm140_vm0, %v12747_v7, 0.0  ;;  %v4581_v9 = vld [vmem:[%s12789_s18] sm:$0xff] }
 0xfa6   :  { %4384 = vadd.xlane.f32.xlu0 %v4383_v10  ;;  %v4582_v10 = vld [vmem:[%s12789_s18 + $0x8] sm:$0xff] }
0x102e   :  { %v4382_v13 = vpop.xlane.xlu1 %4381 }
0x102f   :  { %v4390_v14 = vmul.f32 0.03125, %v4382_v13  ;;  %v4379_v15 = vpop.xlane.xlu0 %4378  ;;  %v11718_v13 = vpack.c.bf16 %v4582_v10, %v4581_v9  ;;  %v10062_v9 = vld [vmem:[%s12819_s1] ss:$0 sm:$0xff] }
0x1030   :  { %v4389_v16 = vmul.f32 0.03125, %v4379_v15  ;;  %v4584_v15 = vld [vmem:[%s12789_s18 + $0x18] sm:$0xff] }
0x1031   :  { %v4394_v17 = vsub.f32 %v12735_v58, %v4390_v14  ;;  %11719 = vmatprep.subr.bf16.mxu0 %v11718_v13  ;;  %v4583_v14 = vld [vmem:[%s12789_s18 + $0x10] sm:$0xff] }
0x1032   :  { %v4393_v18 = vsub.f32 %v12737_v59, %v4389_v16  ;;  %v4388_v19 = vpop.xlane.xlu1 %4387  ;;  %11721 = vmatpush3.bf16.msra.mxu0 %v11718_v13  ;;  %v11722_v16 = vpack.c.bf16 %v4584_v15, %v4583_v14 }
0x1033   :  { %v4392_v21 = vmul.f32 0.03125, %v4388_v19  ;;  %v4385_v23 = vpop.xlane.xlu0 %4384  ;;  %v4398_v24 = vmul.f32 %v4394_v17, %v4394_v17 }
0x1034   :  { %v4391_v22 = vmul.f32 0.03125, %v4385_v23  ;;  %v4397_v25 = vmul.f32 %v4393_v18, %v4393_v18  ;;  %11723 = vmatprep.subr.bf16.mxu0 %v11722_v16  ;;  %v4588_v23 = vld [vmem:[%s12789_s18 + $0x38] sm:$0xff] }
0x1035   :  { %v4396_v26 = vsub.f32 %v12745_v5, %v4392_v21  ;;  %v4404_v27 = vsel %vm140_vm0, %v4398_v24, 0.0  ;;  %v4587_v21 = vld [vmem:[%s12789_s18 + $0x30] sm:$0xff] }
0x1036   :  { %v4395_v28 = vsub.f32 %v12747_v7, %v4391_v22  ;;  %4405 = vadd.xlane.f32.xlu1 %v4404_v27  ;;  %v4401_v29 = vsel %vm140_vm0, %v4397_v25, 0.0  ;;  %11725 = vmatpush3.bf16.msra.mxu0 %v11722_v16  ;;  %v11730_v24 = vpack.c.bf16 %v4588_v23, %v4587_v21  ;;  %v4589_v22 = vld [vmem:[%s12789_s18 + $0x40] sm:$0xff]  ;;  %v4590_v25 = vld [vmem:[%s12789_s18 + $0x48] sm:$0xff]  ;;  %v4591_v27 = vld [vmem:[%s12789_s18 + $0x50] sm:$0xff] }
0x1037   :  { %4402 = vadd.xlane.f32.xlu0 %v4401_v29  ;;  %v4400_v30 = vmul.f32 %v4396_v26, %v4396_v26 }
0x1038   :  { %v4399_v20 = vmul.f32 %v4395_v28, %v4395_v28 }
0x1039   :  { %v4410_v31 = vsel %vm140_vm0, %v4400_v30, 0.0  ;;  %v4593_v30 = vld [vmem:[%s12789_s18 + $0x60] sm:$0xff] }
0x103a   :  { %4411 = vadd.xlane.f32.xlu1 %v4410_v31  ;;  %v4407_v32 = vsel %vm140_vm0, %v4399_v20, 0.0  ;;  %v4594_v20 = vld [vmem:[%s12789_s18 + $0x68] sm:$0xff] }
0x103b   :  { %4408 = vadd.xlane.f32.xlu0 %v4407_v32  ;;  %v11742_v31 = vpack.c.bf16 %v4594_v20, %v4593_v30  ;;  %v4595_v32 = vld [vmem:[%s12789_s18 + $0x70] sm:$0xff] }
0x103c   :  { %v11746_v34 = vpack.c.bf16 %v4596_v33, %v4595_v32 }
0x10c3   :  { %v4406_v41 = vpop.xlane.xlu1 %4405 }
0x10c4   :  { %v4414_v6 = vmul.f32 0.03125, %v4406_v41  ;;  %v4403_v8 = vpop.xlane.xlu0 %4402 }
0x10c5   :  { %v4413_v39 = vmul.f32 0.03125, %v4403_v8 }
0x10c6   :  { %v4418_v40 = vadd.f32 1e-05, %v4414_v6 }
0x10c7   :  { %v4417_v44 = vadd.f32 1e-05, %v4413_v39  ;;  %v4412_v45 = vpop.xlane.xlu1 %4411 }
0x10c8   :  { %12045 = vrsqrt.f32 %v4418_v40  ;;  %v4416_v42 = vmul.f32 0.03125, %v4412_v45  ;;  %v4409_v11 = vpop.xlane.xlu0 %4408 }
0x10c9   :  { %12047 = vrsqrt.f32 %v4417_v44  ;;  %v4415_v46 = vmul.f32 0.03125, %v4409_v11 }
0x10ca   :  { %v4420_v47 = vadd.f32 1e-05, %v4416_v42 }
0x10cb   :  { %v4419_v43 = vadd.f32 1e-05, %v4415_v46 }
0x10cc   :  { %12049 = vrsqrt.f32 %v4420_v47 }
0x10cd   :  { %12051 = vrsqrt.f32 %v4419_v43 }
0x10d2   :  { %v12046_v48 = vpop.eup %12045 }
0x10d3   :  { %v12048_v50 = vpop.eup %12047  ;;  %v4426_v49 = vmul.f32 %v12046_v48, %v4394_v17  ;;  %v4585_v17 = vld [vmem:[%s12789_s18 + $0x20] sm:$0xff] }
0x10d4   :  { %v4425_v53 = vmul.f32 %v12048_v50, %v4393_v18  ;;  %v4586_v18 = vld [vmem:[%s12789_s18 + $0x28] sm:$0xff] }
0x10d5   :  { %v4436_v52 = vmul.f32 %v10055_v37, %v4426_v49  ;;  %v11726_v19 = vpack.c.bf16 %v4586_v18, %v4585_v17 }
0x10d6   :  { %v12050_v54 = vpop.eup %12049  ;;  %v4435_v56 = vmul.f32 %v10055_v37, %v4425_v53 }
0x10d7   :  { %v12052_v55 = vpop.eup %12051  ;;  %v4428_v60 = vmul.f32 %v12050_v54, %v4396_v26  ;;  %v4446_v0 = vadd.f32 %v10056_v51, %v4436_v52  ;;  %11727 = vmatprep.subr.bf16.mxu0 %v11726_v19  ;;  %v11734_v26 = vpack.c.bf16 %v4590_v25, %v4589_v22 }
0x10d8   :  { %v4445_v61 = vadd.f32 %v10056_v51, %v4435_v56  ;;  %v4427_v63 = vmul.f32 %v12052_v55, %v4395_v28  ;;  %11729 = vmatpush3.bf16.msra.mxu0 %v11726_v19  ;;  %v4592_v28 = vld [vmem:[%s12789_s18 + $0x58] sm:$0xff] }
0x10d9   :  { %v4438_v1 = vmul.f32 %v10055_v37, %v4428_v60  ;;  %11731 = vmatprep.subr.bf16.mxu0 %v11730_v24  ;;  %v11738_v29 = vpack.c.bf16 %v4592_v28, %v4591_v27 }
0x10da   :  { %11107 = vmatprep.mubr.msk.f32.mxu1 %vm140_vm0, %v4445_v61  ;;  %v4437_v2 = vmul.f32 %v10055_v37, %v4427_v63 }
0x10db   :  { %11108 = vmatmul.mubr.msk.f32.vlgmr.msra.gmra.mrb[60].mxu1 %vm140_vm0, %v4446_v0  ;;  %v4448_v4 = vadd.f32 %v10056_v51, %v4438_v1 }
0x10dc   :  { %v4447_v3 = vadd.f32 %v10056_v51, %v4437_v2  ;;  %11733 = vmatpush3.bf16.msra.mxu0 %v11730_v24 }
0x10dd   :  { %11735 = vmatprep.subr.bf16.mxu0 %v11734_v26 }
0x10de   :  { %11110 = vmatprep.mubr.msk.f32.mxu1 %vm140_vm0, %v4447_v3 }
0x10df   :  { %11111 = vmatmul.mubr.msk.f32.gmra.mrb[62].mxu1 %vm140_vm0, %v4448_v4 }
0x10e0   :  { %11737 = vmatpush3.bf16.msra.mxu0 %v11734_v26 }
0x10e1   :  { %11739 = vmatprep.subr.bf16.mxu0 %v11738_v29 }
0x10e4   :  { %11741 = vmatpush3.bf16.msra.mxu0 %v11738_v29 }
0x10e5   :  { %11743 = vmatprep.subr.bf16.mxu0 %v11742_v31 }
0x10e8   :  { %11745 = vmatpush3.bf16.msra.mxu0 %v11742_v31 }
0x10e9   :  { %11747 = vmatprep.subr.bf16.mxu0 %v11746_v34 }
0x10ec   :  { %11749 = vmatpush3.bf16.msra.mxu0 %v11746_v34 }
0x10ed   :  { %11198 = vmatprep.subr.mxu0 %v12184_v12 }
0x11ae   :  { %v11109_v35 = vpop.f32.mrb[60].mxu1 }
0x11af   :  { %v4544_v36 = vadd.f32 %v11109_v35, %v10057_v62  ;;  %v4538_v38 = vpop.f32.mrb[61].mxu1 }
0x11b0   :  { %v4539_v41 = vadd.f32 %v10057_v62, %v4538_v38 }
0x11b1   :  { %v4558_v6 = vmul.f32 -1.702, %v4544_v36 }
0x11b2   :  { %v4557_v8 = vmul.f32 -1.702, %v4539_v41  ;;  %v11112_v39 = vpop.f32.mrb[62].mxu1 }
0x11b3   :  { %v4563_v40 = vmul.f32 1.442695, %v4558_v6  ;;  %v4554_v44 = vadd.f32 %v11112_v39, %v10057_v62  ;;  %v4548_v45 = vpop.f32.mrb[63].mxu1 }
0x11b4   :  { %v4561_v42 = vmul.f32 1.442695, %v4557_v8  ;;  %v4549_v11 = vadd.f32 %v10057_v62, %v4548_v45 }
0x11b5   :  { %12053 = vpow2.f32 %v4563_v40  ;;  %v4560_v46 = vmul.f32 -1.702, %v4554_v44  ;;  %v10067_v40 = vld [vmem:[%s12256_s9 + $0x80] sm:$0xff] }
0x11b6   :  { %12055 = vpow2.f32 %v4561_v42  ;;  %v4559_v47 = vmul.f32 -1.702, %v4549_v11  ;;  %v10069_v42 = vld [vmem:[%s12256_s9 + $0x90] sm:$0xff] }
0x11b7   :  { %v4567_v43 = vmul.f32 1.442695, %v4560_v46 }
0x11b8   :  { %v4565_v48 = vmul.f32 1.442695, %v4559_v47  ;;  %v10077_v47 = vld [vmem:[%s12261_s13 + $0x80] sm:$0xff] }
0x11b9   :  { %12057 = vpow2.f32 %v4567_v43  ;;  %v10078_v43 = vld [vmem:[%s12261_s13 + $0x88] sm:$0xff] }
0x11ba   :  { %12059 = vpow2.f32 %v4565_v48  ;;  %v11758_v48 = vpack.c.bf16 %v10078_v43, %v10077_v47  ;;  %v10092_v47 = vld [vmem:[%s12348_s8 + $0x4] ss:$0 sm:$0xff] }
0x11bf   :  { %v12054_v37 = vpop.eup %12053 }
0x11c0   :  { %v12056_v50 = vpop.eup %12055  ;;  %v4570_v49 = vadd.f32 1.0, %v12054_v37 }
0x11c1   :  { %v4569_v53 = vadd.f32 1.0, %v12056_v50 }
0x11c2   :  { %12061 = vrcp.f32 %v4570_v49 }
0x11c3   :  { %v12058_v51 = vpop.eup %12057  ;;  %12063 = vrcp.f32 %v4569_v53 }
0x11c4   :  { %v12060_v52 = vpop.eup %12059  ;;  %v4572_v54 = vadd.f32 1.0, %v12058_v51 }
0x11c5   :  { %v4571_v56 = vadd.f32 1.0, %v12060_v52 }
0x11c6   :  { %12065 = vrcp.f32 %v4572_v54 }
0x11c7   :  { %12067 = vrcp.f32 %v4571_v56 }
0x11cc   :  { %v12062_v55 = vpop.eup %12061 }
0x11cd   :  { %v12064_v60 = vpop.eup %12063  ;;  %v4576_v63 = vmul.f32 %v12062_v55, %v4544_v36 }
0x11ce   :  { %v4574_v61 = vmul.f32 %v12064_v60, %v4539_v41 }
0x11d0   :  { %v12066_v0 = vpop.eup %12065  ;;  %11145 = vmatprep.mubr.f32.mxu0 %v4574_v61 }
0x11d1   :  { %v12068_v1 = vpop.eup %12067  ;;  %11146 = vmatmul.mubr.f32.vlgmr.msra.gmra.mrb[56].mxu0 %v4576_v63  ;;  %v4580_v3 = vmul.f32 %v12066_v0, %v4554_v44  ;;  %v10068_v44 = vld [vmem:[%s12256_s9 + $0x88] sm:$0xff] }
0x11d2   :  { %v4578_v2 = vmul.f32 %v12068_v1, %v4549_v11  ;;  %v11750_v45 = vpack.c.bf16 %v10068_v44, %v10067_v40  ;;  %v10070_v11 = vld [vmem:[%s12256_s9 + $0x98] sm:$0xff]  ;;  %v10065_v1 = vld [vmem:[%s12281_s21 + $0x1] ss:$0 sm:$0xff] }
0x11d3   :  { %v11754_v46 = vpack.c.bf16 %v10070_v11, %v10069_v42 }
0x11d4   :  { %11148 = vmatprep.mubr.f32.mxu0 %v4578_v2  ;;  %11751 = vmatprep.subr.bf16.mxu1 %v11750_v45 }
0x11d5   :  { %11149 = vmatmul.mubr.f32.gmra.mrb[58].mxu0 %v4580_v3  ;;  %11753 = vmatpush3.bf16.msra.mxu1 %v11750_v45 }
0x11d6   :  { %11200 = vmatprep.mubr.msk.f32.mxu0 %vm12185_vm1, %v12184_v12  ;;  %11755 = vmatprep.subr.bf16.mxu1 %v11754_v46 }
0x11d9   :  { %11757 = vmatpush3.bf16.msra.mxu1 %v11754_v46 }
0x11da   :  { %11759 = vmatprep.subr.bf16.mxu1 %v11758_v48 }
0x12a4   :  { %v11147_v4 = vpop.f32.mrb[56].mxu0 }
0x12a5   :  { %v4683_v10 = vadd.f32 %v11147_v4, %v12735_v58  ;;  %v4663_v13 = vpop.f32.mrb[57].mxu0 }
0x12a6   :  { %v4682_v14 = vadd.f32 %v4663_v13, %v12737_v59 }
0x12a7   :  { %v12824_v15 = vadd.f32 %v10062_v9, %v4683_v10 }
0x12a8   :  { %v12826_v16 = vadd.f32 %v10062_v9, %v4682_v14  ;;  %v11150_v17 = vpop.f32.mrb[58].mxu0 }
0x12a9   :  { %v4685_v18 = vadd.f32 %v11150_v17, %v12745_v5  ;;  %v4673_v19 = vpop.f32.mrb[59].mxu0  ;;  %v4704_v21 = vsel %vm140_vm0, %v12824_v15, 0.0  ;;  %v10079_v17 = vld [vmem:[%s12261_s13 + $0x90] sm:$0xff] }
0x12aa   :  { %v4684_v23 = vadd.f32 %v4673_v19, %v12747_v7  ;;  %4705 = vadd.xlane.f32.xlu1 %v4704_v21  ;;  %v4701_v58 = vsel %vm140_vm0, %v12826_v16, 0.0 }
0x12ab   :  { %v12834_v24 = vadd.f32 %v10062_v9, %v4685_v18  ;;  %4702 = vadd.xlane.f32.xlu0 %v4701_v58  ;;  %v10080_v18 = vld [vmem:[%s12261_s13 + $0x98] sm:$0xff] }
0x12ac   :  { %v12836_v59 = vadd.f32 %v10062_v9, %v4684_v23  ;;  %v10066_v9 = vld [vmem:[%s12286_s25 + $0x1] ss:$0 sm:$0xff]  ;;  %s12199_s25 = smov 21  }
0x12ad   :  { %v4710_v22 = vsel %vm140_vm0, %v12834_v24, 0.0 }
0x12ae   :  { %4711 = vadd.xlane.f32.xlu1 %v4710_v22  ;;  %v4707_v5 = vsel %vm140_vm0, %v12836_v59, 0.0 }
0x12af   :  { %4708 = vadd.xlane.f32.xlu0 %v4707_v5 }
0x1337   :  { %v4706_v25 = vpop.xlane.xlu1 %4705 }
0x1338   :  { %v4714_v26 = vmul.f32 0.03125, %v4706_v25  ;;  %v4703_v7 = vpop.xlane.xlu0 %4702  ;;  %v11762_v25 = vpack.c.bf16 %v10080_v18, %v10079_v17 }
0x1339   :  { %v4713_v27 = vmul.f32 0.03125, %v4703_v7  ;;  %v10087_v7 = vld [vmem:[%s12270_s17 + $0x80] sm:$0xff] }
0x133a   :  { %v4718_v28 = vsub.f32 %v12824_v15, %v4714_v26 }
0x133b   :  { %v4717_v29 = vsub.f32 %v12826_v16, %v4713_v27  ;;  %v4712_v30 = vpop.xlane.xlu1 %4711  ;;  %v10088_v27 = vld [vmem:[%s12270_s17 + $0x88] sm:$0xff] }
0x133c   :  { %v4716_v20 = vmul.f32 0.03125, %v4712_v30  ;;  %v4709_v31 = vpop.xlane.xlu0 %4708  ;;  %v4722_v32 = vmul.f32 %v4718_v28, %v4718_v28  ;;  %v11766_v30 = vpack.c.bf16 %v10088_v27, %v10087_v7 }
0x133d   :  { %v4715_v33 = vmul.f32 0.03125, %v4709_v31  ;;  %v4721_v34 = vmul.f32 %v4717_v29, %v4717_v29  ;;  %v10090_v31 = vld [vmem:[%s12270_s17 + $0x98] sm:$0xff] }
0x133e   :  { %v4720_v62 = vsub.f32 %v12834_v24, %v4716_v20  ;;  %v4728_v35 = vsel %vm140_vm0, %v4722_v32, 0.0  ;;  %v10089_v20 = vld [vmem:[%s12270_s17 + $0x90] sm:$0xff] }
0x133f   :  { %v4719_v36 = vsub.f32 %v12836_v59, %v4715_v33  ;;  %4729 = vadd.xlane.f32.xlu1 %v4728_v35  ;;  %v4725_v38 = vsel %vm140_vm0, %v4721_v34, 0.0  ;;  %v11770_v32 = vpack.c.bf16 %v10090_v31, %v10089_v20 }
0x1340   :  { %4726 = vadd.xlane.f32.xlu0 %v4725_v38  ;;  %v4724_v41 = vmul.f32 %v4720_v62, %v4720_v62 }
0x1341   :  { %v4723_v6 = vmul.f32 %v4719_v36, %v4719_v36 }
0x1342   :  { %v4734_v8 = vsel %vm140_vm0, %v4724_v41, 0.0  ;;  %v10072_v41 = vld [vmem:[%s12342_s3 + $0x4] ss:$0 sm:$0xff] }
0x1343   :  { %4735 = vadd.xlane.f32.xlu1 %v4734_v8  ;;  %v4731_v39 = vsel %vm140_vm0, %v4723_v6, 0.0 }
0x1344   :  { %4732 = vadd.xlane.f32.xlu0 %v4731_v39 }
0x13cc   :  { %v4730_v37 = vpop.xlane.xlu1 %4729 }
0x13cd   :  { %v4738_v50 = vmul.f32 0.03125, %v4730_v37  ;;  %v4727_v49 = vpop.xlane.xlu0 %4726 }
0x13ce   :  { %v4737_v53 = vmul.f32 0.03125, %v4727_v49 }
0x13cf   :  { %v4742_v51 = vadd.f32 1e-05, %v4738_v50 }
0x13d0   :  { %v4741_v52 = vadd.f32 1e-05, %v4737_v53  ;;  %v4736_v54 = vpop.xlane.xlu1 %4735 }
0x13d1   :  { %12069 = vrsqrt.f32 %v4742_v51  ;;  %v4740_v56 = vmul.f32 0.03125, %v4736_v54  ;;  %v4733_v55 = vpop.xlane.xlu0 %4732 }
0x13d2   :  { %12071 = vrsqrt.f32 %v4741_v52  ;;  %v4739_v60 = vmul.f32 0.03125, %v4733_v55 }
0x13d3   :  { %v4744_v61 = vadd.f32 1e-05, %v4740_v56 }
0x13d4   :  { %v4743_v63 = vadd.f32 1e-05, %v4739_v60 }
0x13d5   :  { %12073 = vrsqrt.f32 %v4744_v61 }
0x13d6   :  { %12075 = vrsqrt.f32 %v4743_v63 }
0x13db   :  { %v12070_v0 = vpop.eup %12069 }
0x13dc   :  { %v12072_v2 = vpop.eup %12071  ;;  %v4750_v3 = vmul.f32 %v12070_v0, %v4718_v28 }
0x13dd   :  { %v4749_v4 = vmul.f32 %v12072_v2, %v4717_v29 }
0x13de   :  { %v4760_v10 = vmul.f32 %v10065_v1, %v4750_v3 }
0x13df   :  { %v12074_v13 = vpop.eup %12073  ;;  %v4759_v14 = vmul.f32 %v10065_v1, %v4749_v4 }
0x13e0   :  { %v12076_v19 = vpop.eup %12075  ;;  %v4752_v21 = vmul.f32 %v12074_v13, %v4720_v62  ;;  %v12862_v22 = vadd.f32 %v10066_v9, %v4760_v10 }
0x13e1   :  { %v12860_v23 = vadd.f32 %v10066_v9, %v4759_v14  ;;  %v4751_v58 = vmul.f32 %v12076_v19, %v4719_v36  ;;  %v10082_v36 = vld [vmem:[%s12337_s29 + $0x4] ss:$0 sm:$0xff] }
0x13e2   :  { %v4762_v5 = vmul.f32 %v10065_v1, %v4752_v21 }
0x13e3   :  { %v4761_v26 = vmul.f32 %v10065_v1, %v4751_v58  ;;  %11159 = vmatprep.mubr.msk.f32.mxu1 %vm140_vm0, %v12860_v23 }
0x13e4   :  { %11160 = vmatmul.mubr.msk.f32.vlgmr.msra.gmra.mrb[64].mxu1 %vm140_vm0, %v12862_v22  ;;  %v12872_v29 = vadd.f32 %v10066_v9, %v4762_v5 }
0x13e5   :  { %v12870_v28 = vadd.f32 %v10066_v9, %v4761_v26  ;;  %11761 = vmatpush3.bf16.msra.mxu1 %v11758_v48 }
0x13e6   :  { %11763 = vmatprep.subr.bf16.mxu1 %v11762_v25 }
0x13e7   :  { %11162 = vmatprep.mubr.msk.f32.mxu1 %vm140_vm0, %v12870_v28 }
0x13e8   :  { %11163 = vmatmul.mubr.msk.f32.gmra.mrb[66].mxu1 %vm140_vm0, %v12872_v29 }
0x13e9   :  { %11765 = vmatpush3.bf16.msra.mxu1 %v11762_v25  ;;  %11173 = vmatprep.mubr.msk.f32.mxu1 %vm140_vm0, %v12860_v23 }
0x13ea   :  { %11767 = vmatprep.subr.bf16.mxu1 %v11766_v30 }
0x13ec   :  { %11174 = vmatmul.mubr.msk.f32.vlgmr.msra.gmra.mrb[68].mxu1 %vm140_vm0, %v12862_v22 }
0x13ed   :  { %11176 = vmatprep.mubr.msk.f32.mxu1 %vm140_vm0, %v12870_v28  ;;  %11769 = vmatpush3.bf16.msra.mxu1 %v11766_v30 }
0x13ee   :  { %11771 = vmatprep.subr.bf16.mxu1 %v11770_v32 }
0x13f0   :  { %11177 = vmatmul.mubr.msk.f32.gmra.mrb[70].mxu1 %vm140_vm0, %v12872_v29 }
0x13f1   :  { %11773 = vmatpush3.bf16.msra.mxu1 %v11770_v32  ;;  %11187 = vmatprep.mubr.msk.f32.mxu1 %vm140_vm0, %v12860_v23 }
0x13f2   :  { %11193 = vmatprep.subr.mxu1 %v12184_v12 }
0x13f4   :  { %11188 = vmatmul.mubr.msk.f32.vlgmr.msra.gmra.mrb[72].mxu1 %vm140_vm0, %v12862_v22 }
0x13f5   :  { %11190 = vmatprep.mubr.msk.f32.mxu1 %vm140_vm0, %v12870_v28 }
0x13f8   :  { %11191 = vmatmul.mubr.msk.f32.gmra.mrb[74].mxu1 %vm140_vm0, %v12872_v29 }
0x13f9   :  { %11195 = vmatprep.mubr.msk.f32.mxu1 %vm12185_vm1, %v12184_v12 }
0x14b7   :  { %v11161_v33 = vpop.f32.mrb[64].mxu1 }
0x14b8   :  { %v4864_v34 = vpop.f32.mrb[65].mxu1  ;;  %v4870_v40 = vadd.f32 %v11161_v33, %v10072_v41 }
0x14b9   :  { %v4865_v45 = vadd.f32 %v10072_v41, %v4864_v34 }
0x14bb   :  { %v11164_v62 = vpop.f32.mrb[66].mxu1 }
0x14bc   :  { %v4874_v35 = vpop.f32.mrb[67].mxu1  ;;  %v4880_v43 = vadd.f32 %v11164_v62, %v10072_v41 }
0x14bd   :  { %v4875_v37 = vadd.f32 %v10072_v41, %v4874_v35 }
0x14bf   :  { %v11175_v38 = vpop.f32.mrb[68].mxu1 }
0x14c0   :  { %v4968_v6 = vadd.f32 %v11175_v38, %v10082_v36  ;;  %v4962_v8 = vpop.f32.mrb[69].mxu1 }
0x14c1   :  { %v4963_v39 = vadd.f32 %v10082_v36, %v4962_v8 }
0x14c2   :  { %11199 = vmatpush3.xpose.msk.msra.mxu0 %vm514_vm2, %v4968_v6 }
0x14c3   :  { %v11178_v44 = vpop.f32.mrb[70].mxu1  ;;  %11194 = vmatpush3.xpose.msk.msra.mxu1 %vm514_vm2, %v4963_v39  ;;  %11208 = vmatprep.subr.mxu0 %v12184_v12 }
0x14c4   :  { %v4978_v42 = vadd.f32 %v11178_v44, %v10082_v36  ;;  %v4972_v11 = vpop.f32.mrb[71].mxu1  ;;  %11203 = vmatprep.subr.mxu1 %v12184_v12 }
0x14c5   :  { %v4973_v46 = vadd.f32 %v10082_v36, %v4972_v11  ;;  %11201 = vmatmul.mubr.msk.f32.vlgmr.msra.gmra.mrb[60].mxu0 %vm514_vm2, %v4870_v40 }
0x14c6   :  { %11196 = vmatmul.mubr.msk.f32.vlgmr.msra.gmra.mrb[76].mxu1 %vm514_vm2, %v4865_v45  ;;  %11209 = vmatpush3.xpose.msk.msra.mxu0 %vm514_vm2, %v4978_v42  ;;  %v10120_v45 = vld [vmem:[%s12261_s13 + $0xa0] sm:$0xff]  ;;  %v10121_v42 = vld [vmem:[%s12261_s13 + $0xa8] sm:$0xff] }
0x14c7   :  { %v11189_v48 = vpop.f32.mrb[72].mxu1  ;;  %11204 = vmatpush3.xpose.msk.msra.mxu1 %vm514_vm2, %v4973_v46  ;;  %11210 = vmatprep.mubr.msk.f32.mxu0 %vm12185_vm1, %v12184_v12  ;;  %v10110_v46 = vld [vmem:[%s12256_s9 + $0xa0] sm:$0xff] }
0x14c8   :  { %v5066_v50 = vadd.f32 %v11189_v48, %v10092_v47  ;;  %v5060_v49 = vpop.f32.mrb[73].mxu1  ;;  %11205 = vmatprep.mubr.msk.f32.mxu1 %vm12185_vm1, %v12184_v12  ;;  %11218 = vmatprep.subr.mxu0 %v12184_v12 }
0x14c9   :  { %v5061_v53 = vadd.f32 %v10092_v47, %v5060_v49  ;;  %11211 = vmatmul.mubr.msk.f32.vlgmr.msra.gmra.mrb[62].mxu0 %vm514_vm2, %v4880_v43  ;;  %11213 = vmatprep.subr.mxu1 %v12184_v12 }
0x14ca   :  { %11206 = vmatmul.mubr.msk.f32.vlgmr.msra.gmra.mrb[78].mxu1 %vm514_vm2, %v4875_v37  ;;  %11219 = vmatpush3.msra.mxu0 %v5066_v50  ;;  %v11782_v50 = vpack.c.bf16 %v10121_v42, %v10120_v45 }
0x14cb   :  { %v11192_v51 = vpop.f32.mrb[74].mxu1  ;;  %11214 = vmatpush3.msra.mxu1 %v5061_v53  ;;  %11220 = vmatprep.mubr.msk.f32.mxu0 %vm12185_vm1, %v12184_v12  ;;  %v10122_v53 = vld [vmem:[%s12261_s13 + $0xb0] sm:$0xff] }
0x14cc   :  { %v12920_v52 = vadd.f32 %v11192_v51, %v10092_v47  ;;  %v5070_v54 = vpop.f32.mrb[75].mxu1  ;;  %11228 = vmatprep.subr.mxu0 %v12184_v12  ;;  %11215 = vmatprep.mubr.msk.f32.mxu1 %vm12185_vm1, %v12184_v12  ;;  %v10123_v51 = vld [vmem:[%s12261_s13 + $0xb8] sm:$0xff] }
0x14cd   :  { %v12925_v56 = vadd.f32 %v10092_v47, %v5070_v54  ;;  %11223 = vmatprep.subr.mxu1 %v12184_v12  ;;  %v10111_v47 = vld [vmem:[%s12256_s9 + $0xa8] sm:$0xff] }
0x14ce   :  { %v11774_v49 = vpack.c.bf16 %v10111_v47, %v10110_v46 }
0x1598   :  { %v5227_v55 = vpop.f32.mrb[60].mxu0 }
0x1599   :  { %v5228_v60 = vadd.f32 %v12698_v57, %v5227_v55  ;;  %v5151_v61 = vpop.f32.mrb[76].mxu1  ;;  %v11202_v63 = vpop.f32.mrb[61].mxu0  ;;  %v10112_v55 = vld [vmem:[%s12256_s9 + $0xb0] sm:$0xff] }
0x159a   :  { %v5152_v0 = vadd.f32 %v12698_v57, %v5151_v61  ;;  %v11197_v1 = vpop.f32.mrb[77].mxu1 }
0x159b   :  { %v5386_v2 = vsel %vm514_vm2, %v5228_v60, -inf }
0x159c   :  { %5387 = vmax.xlane.f32.xlu0 %v5386_v2  ;;  %v5379_v3 = vpop.f32.mrb[62].mxu0  ;;  %v5383_v4 = vsel %vm514_vm2, %v5152_v0, -inf  ;;  %v10130_v2 = vld [vmem:[%s12270_s17 + $0xa0] sm:$0xff] }
0x159d   :  { %v5380_v9 = vadd.f32 %v12698_v57, %v5379_v3  ;;  %v11212_v10 = vpop.f32.mrb[63].mxu0  ;;  %5384 = vmax.xlane.f32.xlu1 %v5383_v4  ;;  %v5303_v13 = vpop.f32.mrb[78].mxu1  ;;  %v10131_v3 = vld [vmem:[%s12270_s17 + $0xa8] sm:$0xff]  ;;  %v10132_v4 = vld [vmem:[%s12270_s17 + $0xb0] sm:$0xff] }
0x159e   :  { %v5304_v14 = vadd.f32 %v12698_v57, %v5303_v13  ;;  %v11207_v17 = vpop.f32.mrb[79].mxu1 }
0x159f   :  { %v5392_v18 = vsel %vm514_vm2, %v5380_v9, -inf }
0x15a0   :  { %5393 = vmax.xlane.f32.xlu0 %v5392_v18  ;;  %v5389_v19 = vsel %vm514_vm2, %v5304_v14, -inf }
0x15a1   :  { %5390 = vmax.xlane.f32.xlu1 %v5389_v19 }
0x1629   :  { %v5388_v21 = vpop.xlane.xlu0 %5387 }
0x162a   :  { %v5396_v58 = vsub.f32 %v5228_v60, %v5388_v21  ;;  %v5385_v5 = vpop.xlane.xlu1 %5384  ;;  %v10113_v60 = vld [vmem:[%s12256_s9 + $0xb8] sm:$0xff] }
0x162b   :  { %v5395_v25 = vsub.f32 %v5152_v0, %v5385_v5  ;;  %v11778_v1 = vpack.c.bf16 %v10113_v60, %v10112_v55 }
0x162c   :  { %v5401_v26 = vmul.f32 1.442695, %v5396_v58 }
0x162d   :  { %v5399_v7 = vmul.f32 1.442695, %v5395_v25  ;;  %v5394_v27 = vpop.xlane.xlu0 %5393  ;;  %v10125_v25 = vld [vmem:[%s12337_s29 + $0x5] ss:$0 sm:$0xff] }
0x162e   :  { %12077 = vpow2.f32 %v5401_v26  ;;  %v5398_v30 = vsub.f32 %v5380_v9, %v5394_v27  ;;  %v5391_v20 = vpop.xlane.xlu1 %5390  ;;  %v10133_v9 = vld [vmem:[%s12270_s17 + $0xb8] sm:$0xff] }
0x162f   :  { %12079 = vpow2.f32 %v5399_v7  ;;  %v5397_v31 = vsub.f32 %v5304_v14, %v5391_v20  ;;  %v11794_v10 = vpack.c.bf16 %v10133_v9, %v10132_v4 }
0x1630   :  { %v5405_v57 = vmul.f32 1.442695, %v5398_v30  ;;  %v10115_v30 = vld [vmem:[%s12342_s3 + $0x5] ss:$0 sm:$0xff] }
0x1631   :  { %v5403_v32 = vmul.f32 1.442695, %v5397_v31 }
0x1632   :  { %12081 = vpow2.f32 %v5405_v57 }
0x1633   :  { %12083 = vpow2.f32 %v5403_v32 }
0x1638   :  { %v12078_v33 = vpop.eup %12077 }
0x1639   :  { %v12080_v34 = vpop.eup %12079  ;;  %v5410_v62 = vsel %vm514_vm2, %v12078_v33, 0.0 }
0x163a   :  { %5411 = vadd.xlane.f32.xlu0 %v5410_v62  ;;  %v5407_v35 = vsel %vm514_vm2, %v12080_v34, 0.0 }
0x163b   :  { %5408 = vadd.xlane.f32.xlu1 %v5407_v35 }
0x163c   :  { %v12082_v36 = vpop.eup %12081 }
0x163d   :  { %v12084_v38 = vpop.eup %12083  ;;  %v5416_v41 = vsel %vm514_vm2, %v12082_v36, 0.0 }
0x163e   :  { %5417 = vadd.xlane.f32.xlu0 %v5416_v41  ;;  %v5413_v6 = vsel %vm514_vm2, %v12084_v38, 0.0 }
0x163f   :  { %5414 = vadd.xlane.f32.xlu1 %v5413_v6 }
0x16c7   :  { %v5412_v8 = vpop.xlane.xlu0 %5411 }
0x16c8   :  { %12085 = vrcp.f32 %v5412_v8  ;;  %v5409_v39 = vpop.xlane.xlu1 %5408 }
0x16c9   :  { %12087 = vrcp.f32 %v5409_v39 }
0x16cb   :  { %v5418_v40 = vpop.xlane.xlu0 %5417 }
0x16cc   :  { %12089 = vrcp.f32 %v5418_v40  ;;  %v5415_v44 = vpop.xlane.xlu1 %5414 }
0x16cd   :  { %12091 = vrcp.f32 %v5415_v44 }
0x16d2   :  { %v12086_v11 = vpop.eup %12085 }
0x16d3   :  { %v12088_v43 = vpop.eup %12087  ;;  %v5422_v48 = vmul.f32 %v12086_v11, %v12078_v33 }
0x16d4   :  { %v5420_v37 = vmul.f32 %v12088_v43, %v12080_v34 }
0x16d5   :  { %11221 = vmatmul.mubr.msk.f32.vlgmr.msra.gmra.mrb[64].mxu0 %vm514_vm2, %v5422_v48 }
0x16d6   :  { %v12090_v54 = vpop.eup %12089  ;;  %11229 = vmatpush3.msra.mxu0 %v12920_v52  ;;  %11216 = vmatmul.mubr.msk.f32.vlgmr.msra.gmra.mrb[80].mxu1 %vm514_vm2, %v5420_v37  ;;  %v11786_v52 = vpack.c.bf16 %v10123_v51, %v10122_v53  ;;  %v13030_v37 = vld [vmem:[%s12381_s14] sm:$0xff]  ;;  %s12201_s14 = smov 19  }
0x16d7   :  { %v12092_v61 = vpop.eup %12091  ;;  %v5426_v63 = vmul.f32 %v12090_v54, %v12082_v36  ;;  %11224 = vmatpush3.msra.mxu1 %v12925_v56  ;;  %11230 = vmatprep.mubr.msk.f32.mxu0 %vm12185_vm1, %v12184_v12  ;;  %v11790_v56 = vpack.c.bf16 %v10131_v3, %v10130_v2 }
0x16d8   :  { %v5424_v0 = vmul.f32 %v12092_v61, %v12084_v38  ;;  %11783 = vmatprep.subr.bf16.mxu0 %v11782_v50  ;;  %11225 = vmatprep.mubr.msk.f32.mxu1 %vm12185_vm1, %v12184_v12  ;;  %v10135_v38 = vld [vmem:[%s12348_s8 + $0x5] ss:$0 sm:$0xff] }
0x16d9   :  { %11231 = vmatmul.mubr.msk.f32.vlgmr.msra.gmra.mrb[66].mxu0 %vm514_vm2, %v5426_v63  ;;  %11775 = vmatprep.subr.bf16.mxu1 %v11774_v49 }
0x16da   :  { %11785 = vmatpush3.bf16.msra.mxu0 %v11782_v50  ;;  %11226 = vmatmul.mubr.msk.f32.vlgmr.msra.gmra.mrb[82].mxu1 %vm514_vm2, %v5424_v0 }
0x16db   :  { %11777 = vmatpush3.bf16.msra.mxu1 %v11774_v49  ;;  %11255 = vmatprep.mubr.msk.f32.mxu0 %vm140_vm0, %v12860_v23 }
0x16dc   :  { %11241 = vmatprep.mubr.msk.f32.mxu1 %vm140_vm0, %v12860_v23  ;;  %11787 = vmatprep.subr.bf16.mxu0 %v11786_v52 }
0x16dd   :  { %11779 = vmatprep.subr.bf16.mxu1 %v11778_v1 }
0x16de   :  { %11789 = vmatpush3.bf16.msra.mxu0 %v11786_v52 }
0x16df   :  { %11781 = vmatpush3.bf16.msra.mxu1 %v11778_v1  ;;  %11275 = vmatprep.subr.mxu0 %v12184_v12 }
0x16e0   :  { %11791 = vmatprep.subr.bf16.mxu1 %v11790_v56 }
0x16e1   :  { %11256 = vmatmul.mubr.msk.f32.vlgmr.msra.gmra.mrb[68].mxu0 %vm140_vm0, %v12862_v22 }
0x16e2   :  { %11242 = vmatmul.mubr.msk.f32.vlgmr.msra.gmra.mrb[84].mxu1 %vm140_vm0, %v12862_v22  ;;  %11258 = vmatprep.mubr.msk.f32.mxu0 %vm140_vm0, %v12870_v28 }
0x16e3   :  { %11244 = vmatprep.mubr.msk.f32.mxu1 %vm140_vm0, %v12870_v28  ;;  %11793 = vmatpush3.bf16.msra.mxu1 %v11790_v56 }
0x16e4   :  { %11795 = vmatprep.subr.bf16.mxu1 %v11794_v10 }
0x16e5   :  { %11259 = vmatmul.mubr.msk.f32.gmra.mrb[70].mxu0 %vm140_vm0, %v12872_v29 }
0x16e6   :  { %11245 = vmatmul.mubr.msk.f32.gmra.mrb[86].mxu1 %vm140_vm0, %v12872_v29  ;;  %11277 = vmatprep.mubr.msk.f32.mxu0 %vm12185_vm1, %v12184_v12 }
0x16e7   :  { %11797 = vmatpush3.bf16.msra.mxu1 %v11794_v10  ;;  %11269 = vmatprep.mubr.msk.f32.mxu1 %vm140_vm0, %v12860_v23 }
0x16e8   :  { %11285 = vmatprep.subr.mxu1 %v12184_v12 }
0x16ea   :  { %11270 = vmatmul.mubr.msk.f32.vlgmr.msra.gmra.mrb[88].mxu1 %vm140_vm0, %v12862_v22 }
0x16eb   :  { %11272 = vmatprep.mubr.msk.f32.mxu1 %vm140_vm0, %v12870_v28 }
0x16ee   :  { %11273 = vmatmul.mubr.msk.f32.gmra.mrb[90].mxu1 %vm140_vm0, %v12872_v29 }
0x16ef   :  { %11287 = vmatprep.mubr.msk.f32.mxu1 %vm12185_vm1, %v12184_v12 }
0x17a8   :  { %v12992_v13 = vpop.f32.mrb[64].mxu0 }
0x17a9   :  { %v12994_v14 = vpop.f32.mrb[80].mxu1  ;;  %v11222_v17 = vpop.f32.mrb[65].mxu0 }
0x17aa   :  { %v11217_v18 = vpop.f32.mrb[81].mxu1 }
0x17ac   :  { %v12996_v19 = vpop.f32.mrb[66].mxu0 }
0x17ad   :  { %v12998_v21 = vpop.f32.mrb[82].mxu1  ;;  %v11232_v58 = vpop.f32.mrb[67].mxu0 }
0x17ae   :  { %v11227_v5 = vpop.f32.mrb[83].mxu1 }
0x17b4   :  { %v11257_v26 = vpop.f32.mrb[68].mxu0 }
0x17b5   :  { %v11243_v7 = vpop.f32.mrb[84].mxu1  ;;  %v5898_v27 = vpop.f32.mrb[69].mxu0  ;;  %v5904_v62 = vadd.f32 %v11257_v26, %v10125_v25 }
0x17b6   :  { %v5899_v20 = vadd.f32 %v10125_v25, %v5898_v27  ;;  %v5800_v31 = vpop.f32.mrb[85].mxu1  ;;  %v5806_v41 = vadd.f32 %v11243_v7, %v10115_v30 }
0x17b7   :  { %v5801_v32 = vadd.f32 %v10115_v30, %v5800_v31 }
0x17b8   :  { %v11260_v57 = vpop.f32.mrb[70].mxu0  ;;  %11276 = vmatpush3.xpose.msk.msra.mxu0 %vm514_vm2, %v5899_v20 }
0x17b9   :  { %v11246_v33 = vpop.f32.mrb[86].mxu1  ;;  %v5908_v34 = vpop.f32.mrb[71].mxu0  ;;  %11280 = vmatprep.subr.mxu0 %v12184_v12  ;;  %v5914_v39 = vadd.f32 %v11260_v57, %v10125_v25 }
0x17ba   :  { %v5909_v35 = vadd.f32 %v10125_v25, %v5908_v34  ;;  %v5810_v36 = vpop.f32.mrb[87].mxu1  ;;  %v5816_v45 = vadd.f32 %v11246_v33, %v10115_v30 }
0x17bb   :  { %11278 = vmatmul.mubr.msk.f32.vlgmr.msra.gmra.mrb[72].mxu0 %vm514_vm2, %v5801_v32  ;;  %v5811_v6 = vadd.f32 %v10115_v30, %v5810_v36 }
0x17bc   :  { %11281 = vmatpush3.xpose.msk.msra.mxu0 %vm514_vm2, %v5904_v62  ;;  %11286 = vmatpush3.xpose.msk.msra.mxu1 %vm514_vm2, %v5909_v35 }
0x17bd   :  { %v11271_v8 = vpop.f32.mrb[88].mxu1  ;;  %11282 = vmatprep.mubr.msk.f32.mxu0 %vm12185_vm1, %v12184_v12  ;;  %11290 = vmatprep.subr.mxu0 %v12184_v12 }
0x17be   :  { %v5996_v40 = vpop.f32.mrb[89].mxu1  ;;  %11295 = vmatprep.subr.mxu1 %v12184_v12  ;;  %v6002_v11 = vadd.f32 %v11271_v8, %v10135_v38 }
0x17bf   :  { %v5997_v44 = vadd.f32 %v10135_v38, %v5996_v40  ;;  %11283 = vmatmul.mubr.msk.f32.vlgmr.msra.gmra.mrb[74].mxu0 %vm514_vm2, %v5806_v41  ;;  %11288 = vmatmul.mubr.msk.f32.vlgmr.msra.gmra.mrb[92].mxu1 %vm514_vm2, %v5811_v6  ;;  %v10161_v40 = vld [vmem:[%s12256_s9 + $0xc0] sm:$0xff] }
0x17c0   :  { %11291 = vmatpush3.xpose.msk.msra.mxu0 %vm514_vm2, %v5914_v39  ;;  %11292 = vmatprep.mubr.msk.f32.mxu0 %vm12185_vm1, %v12184_v12 }
0x17c1   :  { %v11274_v42 = vpop.f32.mrb[90].mxu1  ;;  %11296 = vmatpush3.msra.mxu1 %v5997_v44  ;;  %11300 = vmatprep.subr.mxu0 %v12184_v12  ;;  %v10162_v44 = vld [vmem:[%s12256_s9 + $0xc8] sm:$0xff] }
0x17c2   :  { %v13018_v46 = vadd.f32 %v11274_v42, %v10135_v38  ;;  %v6006_v47 = vpop.f32.mrb[91].mxu1  ;;  %11297 = vmatprep.mubr.msk.f32.mxu1 %vm12185_vm1, %v12184_v12  ;;  %11305 = vmatprep.subr.mxu1 %v12184_v12 }
0x17c3   :  { %v13023_v43 = vadd.f32 %v10135_v38, %v6006_v47  ;;  %11293 = vmatmul.mubr.msk.f32.vlgmr.msra.gmra.mrb[76].mxu0 %vm514_vm2, %v5816_v45 }
0x17c4   :  { %11301 = vmatpush3.msra.mxu0 %v6002_v11  ;;  %11302 = vmatprep.mubr.msk.f32.mxu0 %vm12185_vm1, %v12184_v12 }
0x17c5   :  { %11310 = vmatprep.subr.mxu0 %v12184_v12 }
0x188e   :  { %v6087_v48 = vpop.f32.mrb[72].mxu0 }
0x188f   :  { %v6088_v50 = vadd.f32 %v13030_v37, %v6087_v48  ;;  %v11279_v49 = vpop.f32.mrb[73].mxu0  ;;  %v11798_v48 = vpack.c.bf16 %v10162_v44, %v10161_v40 }
0x1890   :  { %v10164_v49 = vld [vmem:[%s12256_s9 + $0xd8] sm:$0xff] }
0x1891   :  { %v6319_v53 = vsel %vm514_vm2, %v6088_v50, -inf }
0x1892   :  { %v6239_v51 = vpop.f32.mrb[92].mxu1  ;;  %6320 = vmax.xlane.f32.xlu1 %v6319_v53  ;;  %v6163_v54 = vpop.f32.mrb[74].mxu0 }
0x1893   :  { %v6240_v55 = vadd.f32 %v13030_v37, %v6239_v51  ;;  %v6164_v60 = vadd.f32 %v13030_v37, %v6163_v54  ;;  %v11284_v61 = vpop.f32.mrb[75].mxu0  ;;  %v11289_v63 = vpop.f32.mrb[93].mxu1  ;;  %v10171_v54 = vld [vmem:[%s12261_s13 + $0xc0] sm:$0xff] }
0x1894   :  { %v10173_v61 = vld [vmem:[%s12261_s13 + $0xd0] sm:$0xff]  ;;  %v10174_v63 = vld [vmem:[%s12261_s13 + $0xd8] sm:$0xff] }
0x1895   :  { %v6325_v0 = vsel %vm514_vm2, %v6240_v55, -inf  ;;  %v6322_v52 = vsel %vm514_vm2, %v6164_v60, -inf }
0x1896   :  { %6326 = vmax.xlane.f32.xlu1 %v6325_v0  ;;  %6323 = vmax.xlane.f32.xlu0 %v6322_v52  ;;  %v6315_v1 = vpop.f32.mrb[76].mxu0  ;;  %v10152_v0 = vld [vmem:[%s12539_s19 + $0x28] sm:$0xff]  ;;  %v10109_v52 = vld [vmem:[%s12539_s19 + $0x20] sm:$0xff] }
0x1897   :  { %v6316_v2 = vadd.f32 %v13030_v37, %v6315_v1  ;;  %v11294_v3 = vpop.f32.mrb[77].mxu0 }
0x1898   :  { %v10181_v3 = vld [vmem:[%s12270_s17 + $0xc0] sm:$0xff] }
0x1899   :  { %v6328_v56 = vsel %vm514_vm2, %v6316_v2, -inf }
0x189a   :  { %6329 = vmax.xlane.f32.xlu0 %v6328_v56  ;;  %v10182_v56 = vld [vmem:[%s12270_s17 + $0xc8] sm:$0xff] }
0x191f   :  { %v6321_v4 = vpop.xlane.xlu1 %6320 }
0x1920   :  { %v6331_v9 = vsub.f32 %v6088_v50, %v6321_v4  ;;  %v10163_v50 = vld [vmem:[%s12256_s9 + $0xd0] sm:$0xff] }
0x1921   :  { %v11802_v51 = vpack.c.bf16 %v10164_v49, %v10163_v50 }
0x1922   :  { %v6335_v10 = vmul.f32 1.442695, %v6331_v9  ;;  %v11814_v9 = vpack.c.bf16 %v10182_v56, %v10181_v3 }
0x1923   :  { %v6327_v17 = vpop.xlane.xlu1 %6326  ;;  %v6324_v18 = vpop.xlane.xlu0 %6323 }
0x1924   :  { %12093 = vpow2.f32 %v6335_v10  ;;  %v6333_v58 = vsub.f32 %v6240_v55, %v6327_v17  ;;  %v6332_v5 = vsub.f32 %v6164_v60, %v6324_v18  ;;  %v10172_v55 = vld [vmem:[%s12261_s13 + $0xc8] sm:$0xff] }
0x1925   :  { %v11806_v60 = vpack.c.bf16 %v10172_v55, %v10171_v54 }
0x1926   :  { %v6339_v25 = vmul.f32 1.442695, %v6333_v58  ;;  %v6337_v26 = vmul.f32 1.442695, %v6332_v5  ;;  %v10183_v5 = vld [vmem:[%s12270_s17 + $0xd0] sm:$0xff] }
0x1927   :  { %v6330_v7 = vpop.xlane.xlu0 %6329 }
0x1928   :  { %12095 = vpow2.f32 %v6339_v25  ;;  %v6334_v27 = vsub.f32 %v6316_v2, %v6330_v7  ;;  %v10184_v25 = vld [vmem:[%s12270_s17 + $0xd8] sm:$0xff] }
0x1929   :  { %12097 = vpow2.f32 %v6337_v26  ;;  %v11818_v7 = vpack.c.bf16 %v10184_v25, %v10183_v5 }
0x192a   :  { %v6341_v30 = vmul.f32 1.442695, %v6334_v27 }
0x192c   :  { %12099 = vpow2.f32 %v6341_v30 }
0x192e   :  { %v12094_v20 = vpop.eup %12093 }
0x192f   :  { %v6343_v31 = vsel %vm514_vm2, %v12094_v20, 0.0 }
0x1930   :  { %6344 = vadd.xlane.f32.xlu1 %v6343_v31  ;;  %v10166_v31 = vld [vmem:[%s12342_s3 + $0x6] ss:$0 sm:$0xff] }
0x1932   :  { %v12096_v57 = vpop.eup %12095 }
0x1933   :  { %v12098_v32 = vpop.eup %12097  ;;  %v6349_v33 = vsel %vm514_vm2, %v12096_v57, 0.0 }
0x1934   :  { %6350 = vadd.xlane.f32.xlu1 %v6349_v33  ;;  %v6346_v34 = vsel %vm514_vm2, %v12098_v32, 0.0 }
0x1935   :  { %6347 = vadd.xlane.f32.xlu0 %v6346_v34 }
0x1936   :  { %v12100_v62 = vpop.eup %12099 }
0x1937   :  { %v6352_v35 = vsel %vm514_vm2, %v12100_v62, 0.0 }
0x1939   :  { %6353 = vadd.xlane.f32.xlu0 %v6352_v35 }
0x19bd   :  { %v6345_v36 = vpop.xlane.xlu1 %6344 }
0x19be   :  { %12101 = vrcp.f32 %v6345_v36 }
0x19c1   :  { %v6351_v38 = vpop.xlane.xlu1 %6350 }
0x19c2   :  { %12103 = vrcp.f32 %v6351_v38  ;;  %v6348_v41 = vpop.xlane.xlu0 %6347 }
0x19c3   :  { %12105 = vrcp.f32 %v6348_v41 }
0x19c6   :  { %v6354_v6 = vpop.xlane.xlu0 %6353 }
0x19c7   :  { %12107 = vrcp.f32 %v6354_v6 }
0x19c8   :  { %v12102_v8 = vpop.eup %12101 }
0x19c9   :  { %v6356_v39 = vmul.f32 %v12102_v8, %v12094_v20  ;;  %v10186_v8 = vld [vmem:[%s12348_s8 + $0x6] ss:$0 sm:$0xff] }
0x19cb   :  { %11298 = vmatmul.mubr.msk.f32.vlgmr.msra.gmra.mrb[94].mxu1 %vm514_vm2, %v6356_v39 }
0x19cc   :  { %v12104_v45 = vpop.eup %12103  ;;  %11306 = vmatpush3.msra.mxu1 %v13023_v43  ;;  %11307 = vmatprep.mubr.msk.f32.mxu1 %vm12185_vm1, %v12184_v12 }
0x19cd   :  { %v12106_v42 = vpop.eup %12105  ;;  %v6360_v11 = vmul.f32 %v12104_v45, %v12096_v57  ;;  %11315 = vmatprep.subr.mxu1 %v10152_v0 }
0x19ce   :  { %v6358_v47 = vmul.f32 %v12106_v42, %v12098_v32 }
0x19cf   :  { %11308 = vmatmul.mubr.msk.f32.vlgmr.msra.gmra.mrb[96].mxu1 %vm514_vm2, %v6360_v11 }
0x19d0   :  { %11303 = vmatmul.mubr.msk.f32.vlgmr.msra.gmra.mrb[78].mxu0 %vm514_vm2, %v6358_v47  ;;  %11316 = vmatpush3.msra.mxu1 %v10152_v0 }
0x19d1   :  { %v12108_v53 = vpop.eup %12107  ;;  %11311 = vmatpush3.msra.mxu0 %v13018_v46  ;;  %11312 = vmatprep.mubr.msk.f32.mxu0 %vm12185_vm1, %v12184_v12  ;;  %v11810_v46 = vpack.c.bf16 %v10174_v63, %v10173_v61 }
0x19d2   :  { %v6362_v43 = vmul.f32 %v12108_v53, %v12100_v62  ;;  %11799 = vmatprep.subr.bf16.mxu0 %v11798_v48  ;;  %11323 = vmatprep.subr.mxu1 %v10109_v52 }
0x19d4   :  { %11313 = vmatmul.mubr.msk.f32.vlgmr.msra.gmra.mrb[80].mxu0 %vm514_vm2, %v6362_v43 }
0x19d5   :  { %11801 = vmatpush3.bf16.msra.mxu0 %v11798_v48  ;;  %11339 = vmatprep.mubr.msk.f32.mxu0 %vm140_vm0, %v12860_v23 }
0x19d6   :  { %11803 = vmatprep.subr.bf16.mxu0 %v11802_v51 }
0x19d9   :  { %11805 = vmatpush3.bf16.msra.mxu0 %v11802_v51 }
0x19da   :  { %11807 = vmatprep.subr.bf16.mxu0 %v11806_v60 }
0x19dc   :  { %11340 = vmatmul.mubr.msk.f32.vlgmr.msra.gmra.mrb[82].mxu0 %vm140_vm0, %v12862_v22 }
0x19dd   :  { %11342 = vmatprep.mubr.msk.f32.mxu0 %vm140_vm0, %v12870_v28  ;;  %11809 = vmatpush3.bf16.msra.mxu0 %v11806_v60 }
0x19de   :  { %11811 = vmatprep.subr.bf16.mxu0 %v11810_v46 }
0x19e0   :  { %11343 = vmatmul.mubr.msk.f32.gmra.mrb[84].mxu0 %vm140_vm0, %v12872_v29 }
0x19e1   :  { %11813 = vmatpush3.bf16.msra.mxu0 %v11810_v46  ;;  %11353 = vmatprep.mubr.msk.f32.mxu0 %vm140_vm0, %v12860_v23 }
0x19e2   :  { %11373 = vmatprep.subr.mxu0 %v12184_v12 }
0x19e4   :  { %11354 = vmatmul.mubr.msk.f32.vlgmr.msra.gmra.mrb[86].mxu0 %vm140_vm0, %v12862_v22 }
0x19e5   :  { %11356 = vmatprep.mubr.msk.f32.mxu0 %vm140_vm0, %v12870_v28 }
0x19e8   :  { %11357 = vmatmul.mubr.msk.f32.gmra.mrb[88].mxu0 %vm140_vm0, %v12872_v29 }
0x19e9   :  { %11375 = vmatprep.mubr.msk.f32.mxu0 %vm12185_vm1, %v12184_v12 }
0x1a9e   :  { %v6432_v1 = vpop.f32.mrb[94].mxu1 }
0x1a9f   :  { %v11299_v2 = vpop.f32.mrb[95].mxu1  ;;  %11317 = vmatprep.mubr.msk.f32.mxu1 %vm514_vm2, %v6432_v1 }
0x1aa2   :  { %v6578_v4 = vpop.f32.mrb[96].mxu1 }
0x1aa3   :  { %v6505_v10 = vpop.f32.mrb[78].mxu0  ;;  %v11309_v17 = vpop.f32.mrb[97].mxu1 }
0x1aa4   :  { %v11304_v18 = vpop.f32.mrb[79].mxu0  ;;  %11318 = vmatmul.mubr.msk.f32.vlgmr.msra.gmra.mrb[98].mxu1 %vm514_vm2, %v6505_v10 }
0x1aa5   :  { %11320 = vmatprep.mubr.msk.f32.mxu1 %vm514_vm2, %v6578_v4  ;;  %11324 = vmatpush3.msra.mxu1 %v10109_v52 }
0x1aa6   :  { %11815 = vmatprep.subr.bf16.mxu1 %v11814_v9 }
0x1aa7   :  { %v6651_v58 = vpop.f32.mrb[80].mxu0 }
0x1aa8   :  { %v11314_v26 = vpop.f32.mrb[81].mxu0  ;;  %11321 = vmatmul.mubr.msk.f32.gmra.mrb[100].mxu1 %vm514_vm2, %v6651_v58 }
0x1aa9   :  { %11325 = vmatprep.mubr.msk.f32.mxu1 %vm514_vm2, %v12994_v14 }
0x1aac   :  { %11326 = vmatmul.mubr.msk.f32.vlgmr.msra.gmra.mrb[98].mxu1 %vm514_vm2, %v12992_v13  ;;  %v10176_v13 = vld [vmem:[%s12337_s29 + $0x6] ss:$0 sm:$0xff] }
0x1aad   :  { %11817 = vmatpush3.bf16.msra.mxu1 %v11814_v9  ;;  %11328 = vmatprep.mubr.msk.f32.mxu1 %vm514_vm2, %v12998_v21 }
0x1aae   :  { %11819 = vmatprep.subr.bf16.mxu1 %v11818_v7 }
0x1aaf   :  { %v11341_v27 = vpop.f32.mrb[82].mxu0 }
0x1ab0   :  { %v6930_v30 = vpop.f32.mrb[83].mxu0  ;;  %11329 = vmatmul.mubr.msk.f32.gmra.mrb[100].mxu1 %vm514_vm2, %v12996_v19  ;;  %v6936_v33 = vadd.f32 %v11341_v27, %v10166_v31 }
0x1ab1   :  { %11821 = vmatpush3.bf16.msra.mxu1 %v11818_v7  ;;  %11367 = vmatprep.mubr.msk.f32.mxu1 %vm140_vm0, %v12860_v23  ;;  %v6931_v62 = vadd.f32 %v10166_v31, %v6930_v30 }
0x1ab2   :  { %11378 = vmatprep.subr.mxu1 %v12184_v12 }
0x1ab3   :  { %v11344_v14 = vpop.f32.mrb[84].mxu0 }
0x1ab4   :  { %v6940_v20 = vpop.f32.mrb[85].mxu0  ;;  %11368 = vmatmul.mubr.msk.f32.vlgmr.msra.gmra.mrb[102].mxu1 %vm140_vm0, %v12862_v22  ;;  %v6946_v41 = vadd.f32 %v11344_v14, %v10166_v31 }
0x1ab5   :  { %11370 = vmatprep.mubr.msk.f32.mxu1 %vm140_vm0, %v12870_v28  ;;  %v6941_v6 = vadd.f32 %v10166_v31, %v6940_v20 }
0x1ab7   :  { %v11355_v21 = vpop.f32.mrb[86].mxu0 }
0x1ab8   :  { %v7034_v57 = vadd.f32 %v11355_v21, %v10176_v13  ;;  %v7028_v32 = vpop.f32.mrb[87].mxu0  ;;  %11371 = vmatmul.mubr.msk.f32.gmra.mrb[104].mxu1 %vm140_vm0, %v12872_v29 }
0x1ab9   :  { %v7029_v19 = vadd.f32 %v10176_v13, %v7028_v32  ;;  %11380 = vmatprep.mubr.msk.f32.mxu1 %vm12185_vm1, %v12184_v12 }
0x1aba   :  { %11379 = vmatpush3.xpose.msk.msra.mxu1 %vm514_vm2, %v7034_v57 }
0x1abb   :  { %v11358_v34 = vpop.f32.mrb[88].mxu0  ;;  %11374 = vmatpush3.xpose.msk.msra.mxu0 %vm514_vm2, %v7029_v19  ;;  %11388 = vmatprep.subr.mxu1 %v12184_v12 }
0x1abc   :  { %v7044_v35 = vadd.f32 %v11358_v34, %v10176_v13  ;;  %v7038_v36 = vpop.f32.mrb[89].mxu0  ;;  %11383 = vmatprep.subr.mxu0 %v12184_v12 }
0x1abd   :  { %v7039_v38 = vadd.f32 %v10176_v13, %v7038_v36  ;;  %11381 = vmatmul.mubr.msk.f32.vlgmr.msra.gmra.mrb[106].mxu1 %vm514_vm2, %v6936_v33  ;;  %v10209_v36 = vld [vmem:[%s12256_s9 + $0xe8] sm:$0xff] }
0x1abe   :  { %11376 = vmatmul.mubr.msk.f32.vlgmr.msra.gmra.mrb[90].mxu0 %vm514_vm2, %v6931_v62  ;;  %11389 = vmatpush3.xpose.msk.msra.mxu1 %vm514_vm2, %v7044_v35  ;;  %v10208_v35 = vld [vmem:[%s12256_s9 + $0xe0] sm:$0xff] }
0x1abf   :  { %11384 = vmatpush3.xpose.msk.msra.mxu0 %vm514_vm2, %v7039_v38  ;;  %11390 = vmatprep.mubr.msk.f32.mxu1 %vm12185_vm1, %v12184_v12 }
0x1ac0   :  { %11385 = vmatprep.mubr.msk.f32.mxu0 %vm12185_vm1, %v12184_v12  ;;  %11398 = vmatprep.subr.mxu1 %v12184_v12 }
0x1ac1   :  { %11391 = vmatmul.mubr.msk.f32.vlgmr.msra.gmra.mrb[108].mxu1 %vm514_vm2, %v6946_v41  ;;  %11393 = vmatprep.subr.mxu0 %v12184_v12 }
0x1ac2   :  { %11386 = vmatmul.mubr.msk.f32.vlgmr.msra.gmra.mrb[92].mxu0 %vm514_vm2, %v6941_v6  ;;  %11400 = vmatprep.mubr.msk.f32.mxu1 %vm12185_vm1, %v12184_v12 }
0x1ac3   :  { %11395 = vmatprep.mubr.msk.f32.mxu0 %vm12185_vm1, %v12184_v12 }
0x1b87   :  { %v11369_v39 = vpop.f32.mrb[102].mxu1 }
0x1b88   :  { %v7132_v40 = vadd.f32 %v11369_v39, %v10186_v8  ;;  %v7126_v44 = vpop.f32.mrb[103].mxu1  ;;  %v11822_v39 = vpack.c.bf16 %v10209_v36, %v10208_v35 }
0x1b89   :  { %v7127_v45 = vadd.f32 %v10186_v8, %v7126_v44  ;;  %v10211_v44 = vld [vmem:[%s12256_s9 + $0xf8] sm:$0xff] }
0x1b8a   :  { %11399 = vmatpush3.msra.mxu1 %v7132_v40  ;;  %v10210_v40 = vld [vmem:[%s12256_s9 + $0xf0] sm:$0xff]  ;;  %s12198_s9 = smov 2  }
0x1b8b   :  { %v11372_v42 = vpop.f32.mrb[104].mxu1  ;;  %11394 = vmatpush3.msra.mxu0 %v7127_v45  ;;  %11408 = vmatprep.subr.mxu1 %v12184_v12  ;;  %s9848_s21 = sld [smem:[%s13431_s0 + %s12198_s9]]   ;;  %s12214_s9 = smov 33  }
0x1b8c   :  { %v13134_v11 = vadd.f32 %v11372_v42, %v10186_v8  ;;  %v7136_v47 = vpop.f32.mrb[105].mxu1  ;;  %11403 = vmatprep.subr.mxu0 %v12184_v12 }
0x1b8d   :  { %v13137_v48 = vadd.f32 %v10186_v8, %v7136_v47 }
0x1b90   :  { %v7293_v50 = vpop.f32.mrb[106].mxu1 }
0x1b91   :  { %v7294_v49 = vadd.f32 %v13030_v37, %v7293_v50  ;;  %v7217_v53 = vpop.f32.mrb[90].mxu0  ;;  %v11382_v43 = vpop.f32.mrb[107].mxu1 }
0x1b92   :  { %v7218_v51 = vadd.f32 %v13030_v37, %v7217_v53  ;;  %v11377_v54 = vpop.f32.mrb[91].mxu0  ;;  %v10229_v53 = vld [vmem:[%s12270_s17 + $0xe8] sm:$0xff]  ;;  %v10230_v43 = vld [vmem:[%s12270_s17 + $0xf0] sm:$0xff] }
0x1b93   :  { %v7452_v55 = vsel %vm514_vm2, %v7294_v49, -inf }
0x1b94   :  { %7453 = vmax.xlane.f32.xlu1 %v7452_v55  ;;  %v7445_v60 = vpop.f32.mrb[108].mxu1  ;;  %v7449_v61 = vsel %vm514_vm2, %v7218_v51, -inf  ;;  %v10203_v55 = vld [vmem:[%s12539_s19 + $0x30] sm:$0xff] }
0x1b95   :  { %v7446_v63 = vadd.f32 %v13030_v37, %v7445_v60  ;;  %v11392_v46 = vpop.f32.mrb[109].mxu1  ;;  %7450 = vmax.xlane.f32.xlu0 %v7449_v61  ;;  %v7369_v0 = vpop.f32.mrb[92].mxu0  ;;  %v10218_v60 = vld [vmem:[%s12261_s13 + $0xe0] sm:$0xff]  ;;  %v10219_v61 = vld [vmem:[%s12261_s13 + $0xe8] sm:$0xff] }
0x1b96   :  { %v7370_v52 = vadd.f32 %v13030_v37, %v7369_v0  ;;  %v11387_v1 = vpop.f32.mrb[93].mxu0  ;;  %v10220_v46 = vld [vmem:[%s12261_s13 + $0xf0] sm:$0xff]  ;;  %v10221_v0 = vld [vmem:[%s12261_s13 + $0xf8] sm:$0xff]  ;;  %s9877_s13 = sld [smem:[%s13431_s0 + %s12206_s30]]  }
0x1b97   :  { %v7458_v2 = vsel %vm514_vm2, %v7446_v63, -inf }
0x1b98   :  { %7459 = vmax.xlane.f32.xlu1 %v7458_v2  ;;  %v7455_v3 = vsel %vm514_vm2, %v7370_v52, -inf }
0x1b99   :  { %7456 = vmax.xlane.f32.xlu0 %v7455_v3  ;;  %v11834_v3 = vpack.c.bf16 %v10221_v0, %v10220_v46 }
0x1c21   :  { %v7454_v56 = vpop.xlane.xlu1 %7453 }
0x1c22   :  { %v7462_v4 = vsub.f32 %v7294_v49, %v7454_v56  ;;  %v7451_v9 = vpop.xlane.xlu0 %7450  ;;  %v11826_v49 = vpack.c.bf16 %v10211_v44, %v10210_v40 }
0x1c23   :  { %v7461_v10 = vsub.f32 %v7218_v51, %v7451_v9  ;;  %v10231_v51 = vld [vmem:[%s12270_s17 + $0xf8] sm:$0xff] }
0x1c24   :  { %v7467_v17 = vmul.f32 1.442695, %v7462_v4  ;;  %v11842_v54 = vpack.c.bf16 %v10231_v51, %v10230_v43 }
0x1c25   :  { %v7465_v18 = vmul.f32 1.442695, %v7461_v10  ;;  %v7460_v58 = vpop.xlane.xlu1 %7459 }
0x1c26   :  { %12109 = vpow2.f32 %v7467_v17  ;;  %v7464_v5 = vsub.f32 %v7446_v63, %v7460_v58  ;;  %v7457_v25 = vpop.xlane.xlu0 %7456  ;;  %v11830_v63 = vpack.c.bf16 %v10219_v61, %v10218_v60 }
0x1c27   :  { %12111 = vpow2.f32 %v7465_v18  ;;  %v7463_v26 = vsub.f32 %v7370_v52, %v7457_v25 }
0x1c28   :  { %v7471_v7 = vmul.f32 1.442695, %v7464_v5 }
0x1c29   :  { %v7469_v27 = vmul.f32 1.442695, %v7463_v26 }
0x1c2a   :  { %12113 = vpow2.f32 %v7471_v7  ;;  %v10233_v7 = vld [vmem:[%s12348_s8 + $0x7] ss:$0 sm:$0xff]  ;;  %s9867_s8 = sld [smem:[%s13431_s0 + %s12199_s25]]  }
0x1c2b   :  { %12115 = vpow2.f32 %v7469_v27 }
0x1c30   :  { %v12110_v30 = vpop.eup %12109 }
0x1c31   :  { %v12112_v14 = vpop.eup %12111  ;;  %v7476_v20 = vsel %vm514_vm2, %v12110_v30, 0.0 }
0x1c32   :  { %7477 = vadd.xlane.f32.xlu1 %v7476_v20  ;;  %v7473_v13 = vsel %vm514_vm2, %v12112_v14, 0.0 }
0x1c33   :  { %7474 = vadd.xlane.f32.xlu0 %v7473_v13  ;;  %v10213_v13 = vld [vmem:[%s12342_s3 + $0x7] ss:$0 sm:$0xff]  ;;  %s12208_s3 = smov 26  }
0x1c34   :  { %v12114_v21 = vpop.eup %12113 }
0x1c35   :  { %v12116_v31 = vpop.eup %12115  ;;  %v7482_v57 = vsel %vm514_vm2, %v12114_v21, 0.0 }
0x1c36   :  { %7483 = vadd.xlane.f32.xlu1 %v7482_v57  ;;  %v7479_v32 = vsel %vm514_vm2, %v12116_v31, 0.0 }
0x1c37   :  { %7480 = vadd.xlane.f32.xlu0 %v7479_v32 }
0x1cbf   :  { %v7478_v19 = vpop.xlane.xlu1 %7477 }
0x1cc0   :  { %12117 = vrcp.f32 %v7478_v19  ;;  %v7475_v33 = vpop.xlane.xlu0 %7474 }
0x1cc1   :  { %12119 = vrcp.f32 %v7475_v33 }
0x1cc3   :  { %v7484_v34 = vpop.xlane.xlu1 %7483 }
0x1cc4   :  { %12121 = vrcp.f32 %v7484_v34  ;;  %v7481_v62 = vpop.xlane.xlu0 %7480 }
0x1cc5   :  { %12123 = vrcp.f32 %v7481_v62 }
0x1cca   :  { %v12118_v38 = vpop.eup %12117 }
0x1ccb   :  { %v12120_v41 = vpop.eup %12119  ;;  %v7488_v6 = vmul.f32 %v12118_v38, %v12110_v30 }
0x1ccc   :  { %v7486_v8 = vmul.f32 %v12120_v41, %v12112_v14 }
0x1ccd   :  { %11401 = vmatmul.mubr.msk.f32.vlgmr.msra.gmra.mrb[110].mxu1 %vm514_vm2, %v7488_v6 }
0x1cce   :  { %v12122_v45 = vpop.eup %12121  ;;  %11409 = vmatpush3.msra.mxu1 %v13134_v11  ;;  %11396 = vmatmul.mubr.msk.f32.vlgmr.msra.gmra.mrb[94].mxu0 %vm514_vm2, %v7486_v8  ;;  %v10228_v11 = vld [vmem:[%s12270_s17 + $0xe0] sm:$0xff]  ;;  %s12207_s17 = smov 23  }
0x1ccf   :  { %v12124_v42 = vpop.eup %12123  ;;  %v7492_v47 = vmul.f32 %v12122_v45, %v12114_v21  ;;  %11404 = vmatpush3.msra.mxu0 %v13137_v48  ;;  %11410 = vmatprep.mubr.msk.f32.mxu1 %vm12185_vm1, %v12184_v12  ;;  %v11838_v48 = vpack.c.bf16 %v10229_v53, %v10228_v11 }
0x1cd0   :  { %v7490_v50 = vmul.f32 %v12124_v42, %v12116_v31  ;;  %11405 = vmatprep.mubr.msk.f32.mxu0 %vm12185_vm1, %v12184_v12  ;;  %11823 = vmatprep.subr.bf16.mxu0 %v11822_v39 }
0x1cd1   :  { %11411 = vmatmul.mubr.msk.f32.vlgmr.msra.gmra.mrb[112].mxu1 %vm514_vm2, %v7492_v47  ;;  %11413 = vmatprep.subr.mxu1 %v10203_v55 }
0x1cd2   :  { %11406 = vmatmul.mubr.msk.f32.vlgmr.msra.gmra.mrb[96].mxu0 %vm514_vm2, %v7490_v50  ;;  %11414 = vmatpush3.msra.mxu1 %v10203_v55 }
0x1cd3   :  { %11825 = vmatpush3.bf16.msra.mxu0 %v11822_v39  ;;  %11429 = vmatprep.mubr.msk.f32.mxu0 %vm140_vm0, %v12860_v23 }
0x1cd4   :  { %11827 = vmatprep.subr.bf16.mxu0 %v11826_v49  ;;  %11831 = vmatprep.subr.bf16.mxu1 %v11830_v63 }
0x1cd7   :  { %11829 = vmatpush3.bf16.msra.mxu0 %v11826_v49 }
0x1cd8   :  { %11839 = vmatprep.subr.bf16.mxu0 %v11838_v48 }
0x1cda   :  { %11430 = vmatmul.mubr.msk.f32.vlgmr.msra.gmra.mrb[98].mxu0 %vm140_vm0, %v12862_v22 }
0x1cdb   :  { %11432 = vmatprep.mubr.msk.f32.mxu0 %vm140_vm0, %v12870_v28  ;;  %11841 = vmatpush3.bf16.msra.mxu0 %v11838_v48 }
0x1cdc   :  { %11843 = vmatprep.subr.bf16.mxu0 %v11842_v54 }
0x1cde   :  { %11433 = vmatmul.mubr.msk.f32.gmra.mrb[100].mxu0 %vm140_vm0, %v12872_v29 }
0x1cdf   :  { %11845 = vmatpush3.bf16.msra.mxu0 %v11842_v54  ;;  %11457 = vmatprep.mubr.msk.f32.mxu0 %vm140_vm0, %v12860_v23 }
0x1ce0   :  { %11468 = vmatprep.subr.mxu0 %v12184_v12 }
0x1ce2   :  { %11458 = vmatmul.mubr.msk.f32.vlgmr.msra.gmra.mrb[102].mxu0 %vm140_vm0, %v12862_v22 }
0x1ce3   :  { %11460 = vmatprep.mubr.msk.f32.mxu0 %vm140_vm0, %v12870_v28 }
0x1ce6   :  { %11461 = vmatmul.mubr.msk.f32.gmra.mrb[104].mxu0 %vm140_vm0, %v12872_v29 }
0x1ce7   :  { %11470 = vmatprep.mubr.msk.f32.mxu0 %vm12185_vm1, %v12184_v12 }
0x1da0   :  { %v7635_v52 = vpop.f32.mrb[110].mxu1 }
0x1da1   :  { %v7562_v1 = vpop.f32.mrb[94].mxu0  ;;  %v11402_v2 = vpop.f32.mrb[111].mxu1 }
0x1da2   :  { %v11397_v56 = vpop.f32.mrb[95].mxu0  ;;  %11415 = vmatprep.mubr.msk.f32.mxu1 %vm514_vm2, %v7562_v1 }
0x1da3   :  { %11416 = vmatmul.mubr.msk.f32.vlgmr.msra.gmra.mrb[98].mxu1 %vm514_vm2, %v7635_v52 }
0x1da4   :  { %v7781_v4 = vpop.f32.mrb[112].mxu1  ;;  %11833 = vmatpush3.bf16.msra.mxu1 %v11830_v63 }
0x1da5   :  { %v7708_v9 = vpop.f32.mrb[96].mxu0  ;;  %v11412_v10 = vpop.f32.mrb[113].mxu1  ;;  %11835 = vmatprep.subr.bf16.mxu1 %v11834_v3 }
0x1da6   :  { %v11407_v17 = vpop.f32.mrb[97].mxu0  ;;  %11418 = vmatprep.mubr.msk.f32.mxu1 %vm514_vm2, %v7708_v9 }
0x1da7   :  { %11419 = vmatmul.mubr.msk.f32.gmra.mrb[100].mxu1 %vm514_vm2, %v7781_v4 }
0x1da8   :  { %11837 = vmatpush3.bf16.msra.mxu1 %v11834_v3  ;;  %11443 = vmatprep.mubr.msk.f32.mxu1 %vm140_vm0, %v12860_v23 }
0x1da9   :  { %11463 = vmatprep.subr.mxu1 %v12184_v12 }
0x1dab   :  { %11444 = vmatmul.mubr.msk.f32.vlgmr.msra.gmra.mrb[114].mxu1 %vm140_vm0, %v12862_v22 }
0x1dac   :  { %11446 = vmatprep.mubr.msk.f32.mxu1 %vm140_vm0, %v12870_v28  ;;  %v10223_v28 = vld [vmem:[%s12337_s29 + $0x7] ss:$0 sm:$0xff]  ;;  %s9869_s29 = sld [smem:[%s13431_s0 + %s12207_s17]]  }
0x1dad   :  { %v11431_v18 = vpop.f32.mrb[98].mxu0 }
0x1dae   :  { %v7967_v58 = vpop.f32.mrb[99].mxu0  ;;  %v7973_v57 = vadd.f32 %v11431_v18, %v10213_v13 }
0x1daf   :  { %11447 = vmatmul.mubr.msk.f32.gmra.mrb[116].mxu1 %vm140_vm0, %v12872_v29  ;;  %v7968_v19 = vadd.f32 %v10213_v13, %v7967_v58 }
0x1db0   :  { %11465 = vmatprep.mubr.msk.f32.mxu1 %vm12185_vm1, %v12184_v12 }
0x1db1   :  { %v11434_v5 = vpop.f32.mrb[100].mxu0 }
0x1db2   :  { %v7977_v23 = vpop.f32.mrb[101].mxu0  ;;  %v7983_v35 = vadd.f32 %v11434_v5, %v10213_v13 }
0x1db3   :  { %v7978_v36 = vadd.f32 %v10213_v13, %v7977_v23 }
0x1db5   :  { %v11459_v25 = vpop.f32.mrb[102].mxu0 }
0x1db6   :  { %v8163_v26 = vpop.f32.mrb[103].mxu0  ;;  %v8169_v38 = vadd.f32 %v11459_v25, %v10233_v7 }
0x1db7   :  { %v8164_v41 = vadd.f32 %v10233_v7, %v8163_v26 }
0x1db9   :  { %v11462_v27 = vpop.f32.mrb[104].mxu0 }
0x1dba   :  { %v13209_v30 = vadd.f32 %v11462_v27, %v10233_v7  ;;  %v8173_v22 = vpop.f32.mrb[105].mxu0 }
0x1dbb   :  { %v13211_v14 = vadd.f32 %v10233_v7, %v8173_v22 }
0x1e7e   :  { %v11445_v20 = vpop.f32.mrb[114].mxu1 }
0x1e7f   :  { %v8071_v21 = vadd.f32 %v11445_v20, %v10223_v28  ;;  %v8065_v31 = vpop.f32.mrb[115].mxu1 }
0x1e80   :  { %v8066_v29 = vadd.f32 %v10223_v28, %v8065_v31 }
0x1e81   :  { %11469 = vmatpush3.xpose.msk.msra.mxu0 %vm514_vm2, %v8071_v21 }
0x1e82   :  { %v11448_v32 = vpop.f32.mrb[116].mxu1  ;;  %11464 = vmatpush3.xpose.msk.msra.mxu1 %vm514_vm2, %v8066_v29  ;;  %11478 = vmatprep.subr.mxu0 %v12184_v12 }
0x1e83   :  { %v8081_v33 = vadd.f32 %v11448_v32, %v10223_v28  ;;  %v8075_v34 = vpop.f32.mrb[117].mxu1  ;;  %11473 = vmatprep.subr.mxu1 %v12184_v12  ;;  %v10250_v32 = vld [vmem:[%s12539_s19 + $0x38] sm:$0xff]  ;;  %s9872_s19 = sld [smem:[%s13431_s0 + %s12208_s3]]  }
0x1e84   :  { %v8076_v62 = vadd.f32 %v10223_v28, %v8075_v34  ;;  %11471 = vmatmul.mubr.msk.f32.vlgmr.msra.gmra.mrb[106].mxu0 %vm514_vm2, %v7973_v57 }
0x1e85   :  { %11466 = vmatmul.mubr.msk.f32.vlgmr.msra.gmra.mrb[118].mxu1 %vm514_vm2, %v7968_v19  ;;  %11479 = vmatpush3.xpose.msk.msra.mxu0 %vm514_vm2, %v8081_v33 }
0x1e86   :  { %11474 = vmatpush3.xpose.msk.msra.mxu1 %vm514_vm2, %v8076_v62  ;;  %11480 = vmatprep.mubr.msk.f32.mxu0 %vm12185_vm1, %v12184_v12 }
0x1e87   :  { %11475 = vmatprep.mubr.msk.f32.mxu1 %vm12185_vm1, %v12184_v12  ;;  %11488 = vmatprep.subr.mxu0 %v12184_v12 }
0x1e88   :  { %11481 = vmatmul.mubr.msk.f32.vlgmr.msra.gmra.mrb[108].mxu0 %vm514_vm2, %v7983_v35  ;;  %11483 = vmatprep.subr.mxu1 %v12184_v12 }
0x1e89   :  { %11476 = vmatmul.mubr.msk.f32.vlgmr.msra.gmra.mrb[120].mxu1 %vm514_vm2, %v7978_v36  ;;  %11489 = vmatpush3.msra.mxu0 %v8169_v38 }
0x1e8a   :  { %11484 = vmatpush3.msra.mxu1 %v8164_v41  ;;  %11490 = vmatprep.mubr.msk.f32.mxu0 %vm12185_vm1, %v12184_v12  ;;  %v10256_v41 = vld [vmem:[%s12730_s24 + $0x1] ss:$0 sm:$0xff]  ;;  %s12209_s24 = smov 28  }
0x1e8b   :  { %11498 = vmatprep.subr.mxu0 %v12184_v12  ;;  %11485 = vmatprep.mubr.msk.f32.mxu1 %vm12185_vm1, %v12184_v12 }
0x1e8c   :  { %11493 = vmatprep.subr.mxu1 %v12184_v12 }
0x1f57   :  { %v8330_v6 = vpop.f32.mrb[106].mxu0 }
0x1f58   :  { %v8331_v8 = vadd.f32 %v13030_v37, %v8330_v6  ;;  %v8254_v39 = vpop.f32.mrb[118].mxu1  ;;  %v11472_v40 = vpop.f32.mrb[107].mxu0 }
0x1f59   :  { %v8255_v44 = vadd.f32 %v13030_v37, %v8254_v39  ;;  %v11467_v45 = vpop.f32.mrb[119].mxu1 }
0x1f5a   :  { %v8489_v42 = vsel %vm514_vm2, %v8331_v8, -inf }
0x1f5b   :  { %8490 = vmax.xlane.f32.xlu1 %v8489_v42  ;;  %v8482_v47 = vpop.f32.mrb[108].mxu0  ;;  %v8486_v50 = vsel %vm514_vm2, %v8255_v44, -inf }
0x1f5c   :  { %v8483_v49 = vadd.f32 %v13030_v37, %v8482_v47  ;;  %v11482_v11 = vpop.f32.mrb[109].mxu0  ;;  %8487 = vmax.xlane.f32.xlu0 %v8486_v50  ;;  %v8406_v53 = vpop.f32.mrb[120].mxu1 }
0x1f5d   :  { %v8407_v48 = vadd.f32 %v13030_v37, %v8406_v53  ;;  %v11477_v43 = vpop.f32.mrb[121].mxu1 }
0x1f5e   :  { %v8495_v51 = vsel %vm514_vm2, %v8483_v49, -inf }
0x1f5f   :  { %8496 = vmax.xlane.f32.xlu1 %v8495_v51  ;;  %v8492_v54 = vsel %vm514_vm2, %v8407_v48, -inf }
0x1f60   :  { %8493 = vmax.xlane.f32.xlu0 %v8492_v54 }
0x1fe8   :  { %v8491_v55 = vpop.xlane.xlu1 %8490 }
0x1fe9   :  { %v8499_v60 = vsub.f32 %v8331_v8, %v8491_v55  ;;  %v8488_v61 = vpop.xlane.xlu0 %8487 }
0x1fea   :  { %v8498_v63 = vsub.f32 %v8255_v44, %v8488_v61 }
0x1feb   :  { %v8504_v46 = vmul.f32 1.442695, %v8499_v60 }
0x1fec   :  { %v8502_v0 = vmul.f32 1.442695, %v8498_v63  ;;  %v8497_v52 = vpop.xlane.xlu1 %8496 }
0x1fed   :  { %12125 = vpow2.f32 %v8504_v46  ;;  %v8501_v1 = vsub.f32 %v8483_v49, %v8497_v52  ;;  %v8494_v2 = vpop.xlane.xlu0 %8493 }
0x1fee   :  { %12127 = vpow2.f32 %v8502_v0  ;;  %v8500_v3 = vsub.f32 %v8407_v48, %v8494_v2 }
0x1fef   :  { %v8508_v37 = vmul.f32 1.442695, %v8501_v1 }
0x1ff0   :  { %v8506_v56 = vmul.f32 1.442695, %v8500_v3 }
0x1ff1   :  { %12129 = vpow2.f32 %v8508_v37 }
0x1ff2   :  { %12131 = vpow2.f32 %v8506_v56 }
0x1ff7   :  { %v12126_v4 = vpop.eup %12125 }
0x1ff8   :  { %v12128_v9 = vpop.eup %12127  ;;  %v8513_v10 = vsel %vm514_vm2, %v12126_v4, 0.0 }
0x1ff9   :  { %8514 = vadd.xlane.f32.xlu1 %v8513_v10  ;;  %v8510_v17 = vsel %vm514_vm2, %v12128_v9, 0.0 }
0x1ffa   :  { %8511 = vadd.xlane.f32.xlu0 %v8510_v17  ;;  %v10261_v17 = vld [vmem:[%s12764_s28 + $0x20] sm:$0xff] }
0x1ffb   :  { %v12130_v18 = vpop.eup %12129 }
0x1ffc   :  { %v12132_v58 = vpop.eup %12131  ;;  %v8519_v5 = vsel %vm514_vm2, %v12130_v18, 0.0 }
0x1ffd   :  { %8520 = vadd.xlane.f32.xlu1 %v8519_v5  ;;  %v8516_v23 = vsel %vm514_vm2, %v12132_v58, 0.0  ;;  %v10263_v5 = vld [vmem:[%s12764_s28 + $0x30] sm:$0xff] }
0x1ffe   :  { %8517 = vadd.xlane.f32.xlu0 %v8516_v23  ;;  %v10264_v23 = vld [vmem:[%s12764_s28 + $0x38] sm:$0xff] }
0x2086   :  { %v8515_v25 = vpop.xlane.xlu1 %8514 }
0x2087   :  { %12133 = vrcp.f32 %v8515_v25  ;;  %v8512_v26 = vpop.xlane.xlu0 %8511  ;;  %v11850_v25 = vpack.c.bf16 %v10264_v23, %v10263_v5 }
0x2088   :  { %12135 = vrcp.f32 %v8512_v26 }
0x208a   :  { %v8521_v7 = vpop.xlane.xlu1 %8520 }
0x208b   :  { %12137 = vrcp.f32 %v8521_v7  ;;  %v8518_v27 = vpop.xlane.xlu0 %8517 }
0x208c   :  { %12139 = vrcp.f32 %v8518_v27 }
0x2091   :  { %v12134_v22 = vpop.eup %12133 }
0x2092   :  { %v12136_v28 = vpop.eup %12135  ;;  %v8525_v20 = vmul.f32 %v12134_v22, %v12126_v4 }
0x2093   :  { %v8523_v13 = vmul.f32 %v12136_v28, %v12128_v9 }
0x2094   :  { %11491 = vmatmul.mubr.msk.f32.vlgmr.msra.gmra.mrb[110].mxu0 %vm514_vm2, %v8525_v20 }
0x2095   :  { %v12138_v21 = vpop.eup %12137  ;;  %11499 = vmatpush3.msra.mxu0 %v13209_v30  ;;  %11486 = vmatmul.mubr.msk.f32.vlgmr.msra.gmra.mrb[122].mxu1 %vm514_vm2, %v8523_v13 }
0x2096   :  { %v12140_v31 = vpop.eup %12139  ;;  %v8529_v29 = vmul.f32 %v12138_v21, %v12130_v18  ;;  %11494 = vmatpush3.msra.mxu1 %v13211_v14  ;;  %11500 = vmatprep.mubr.msk.f32.mxu0 %vm12185_vm1, %v12184_v12  ;;  %v10262_v18 = vld [vmem:[%s12764_s28 + $0x28] sm:$0xff]  ;;  %s9865_s28 = sld [smem:[%s13431_s0 + %s12201_s14]]  }
0x2097   :  { %v8527_v57 = vmul.f32 %v12140_v31, %v12132_v58  ;;  %11495 = vmatprep.mubr.msk.f32.mxu1 %vm12185_vm1, %v12184_v12  ;;  %11503 = vmatprep.subr.mxu1 %v10250_v32  ;;  %v11846_v58 = vpack.c.bf16 %v10262_v18, %v10261_v17  ;;  %v10266_v18 = vld [vmem:[%s12811_s5 + $0x1] ss:$0 sm:$0xff]  ;;  %s9873_s5 = sld [smem:[%s13431_s0 + %s12212_s20]]  }
0x2098   :  { %11501 = vmatmul.mubr.msk.f32.vlgmr.msra.gmra.mrb[112].mxu0 %vm514_vm2, %v8529_v29 }
0x2099   :  { %11496 = vmatmul.mubr.msk.f32.vlgmr.msra.gmra.mrb[124].mxu1 %vm514_vm2, %v8527_v57  ;;  %11847 = vmatprep.subr.bf16.mxu0 %v11846_v58 }
0x209a   :  { %11504 = vmatpush3.msra.mxu1 %v10250_v32  ;;  %11849 = vmatpush3.bf16.msra.mxu0 %v11846_v58 }
0x209b   :  { %11851 = vmatprep.subr.bf16.mxu0 %v11850_v25 }
0x209e   :  { %11853 = vmatpush3.bf16.msra.mxu0 %v11850_v25 }
0x2167   :  { %v8672_v30 = vpop.f32.mrb[110].mxu0 }
0x2168   :  { %v8599_v19 = vpop.f32.mrb[122].mxu1  ;;  %v11492_v33 = vpop.f32.mrb[111].mxu0 }
0x2169   :  { %v11487_v34 = vpop.f32.mrb[123].mxu1  ;;  %11505 = vmatprep.mubr.msk.f32.mxu1 %vm514_vm2, %v8599_v19  ;;  %v10259_v19 = vld [vmem:[%s12773_s4 + $0x1] ss:$0 sm:$0xff]  ;;  %s9874_s4 = sld [smem:[%s13431_s0 + %s12209_s24]]  }
0x216a   :  { %11506 = vmatmul.mubr.msk.f32.vlgmr.msra.gmra.mrb[98].mxu1 %vm514_vm2, %v8672_v30 }
0x216b   :  { %v8818_v14 = vpop.f32.mrb[112].mxu0 }
0x216c   :  { %v8745_v62 = vpop.f32.mrb[124].mxu1  ;;  %v11502_v35 = vpop.f32.mrb[113].mxu0 }
0x216d   :  { %v11497_v36 = vpop.f32.mrb[125].mxu1  ;;  %11508 = vmatprep.mubr.msk.f32.mxu1 %vm514_vm2, %v8745_v62  ;;  %v10260_v62 = vld [vmem:[%s12778_s11 + $0x1] ss:$0 sm:$0xff]  ;;  %s9871_s11 = sld [smem:[%s13431_s0 + %s12210_s6]]  }
0x216e   :  { %11509 = vmatmul.mubr.msk.f32.gmra.mrb[100].mxu1 %vm514_vm2, %v8818_v14 }
0x223d   :  { %v11507_v38 = vpop.f32.mrb[98].mxu1 }
0x223e   :  { %v8926_v6 = vadd.f32 %v11507_v38, %v12824_v15  ;;  %v8902_v8 = vpop.f32.mrb[99].mxu1 }
0x223f   :  { %v8925_v39 = vadd.f32 %v8902_v8, %v12826_v16 }
0x2240   :  { %v13267_v40 = vadd.f32 %v10256_v41, %v8926_v6 }
0x2241   :  { %v13269_v44 = vadd.f32 %v10256_v41, %v8925_v39  ;;  %v11510_v45 = vpop.f32.mrb[100].mxu1 }
0x2242   :  { %v8928_v42 = vadd.f32 %v11510_v45, %v12834_v24  ;;  %v8912_v47 = vpop.f32.mrb[101].mxu1  ;;  %v8948_v50 = vsel %vm140_vm0, %v13267_v40, 0.0 }
0x2243   :  { %v8927_v49 = vadd.f32 %v8912_v47, %v12836_v59  ;;  %8949 = vadd.xlane.f32.xlu1 %v8948_v50  ;;  %v8945_v15 = vsel %vm140_vm0, %v13269_v44, 0.0 }
0x2244   :  { %v13277_v11 = vadd.f32 %v10256_v41, %v8928_v42  ;;  %8946 = vadd.xlane.f32.xlu0 %v8945_v15  ;;  %v10271_v15 = vld [vmem:[%s12789_s18 + $0x80] sm:$0xff] }
0x2245   :  { %v13279_v16 = vadd.f32 %v10256_v41, %v8927_v49 }
0x2246   :  { %v8954_v53 = vsel %vm140_vm0, %v13277_v11, 0.0 }
0x2247   :  { %8955 = vadd.xlane.f32.xlu1 %v8954_v53  ;;  %v8951_v24 = vsel %vm140_vm0, %v13279_v16, 0.0  ;;  %v10272_v53 = vld [vmem:[%s12789_s18 + $0x88] sm:$0xff] }
0x2248   :  { %8952 = vadd.xlane.f32.xlu0 %v8951_v24  ;;  %v11854_v24 = vpack.c.bf16 %v10272_v53, %v10271_v15 }
0x224a   :  { %11855 = vmatprep.subr.bf16.mxu1 %v11854_v24 }
0x224b   :  { %11857 = vmatpush3.bf16.msra.mxu1 %v11854_v24 }
0x22d0   :  { %v8950_v48 = vpop.xlane.xlu1 %8949 }
0x22d1   :  { %v8958_v43 = vmul.f32 0.03125, %v8950_v48  ;;  %v8947_v59 = vpop.xlane.xlu0 %8946  ;;  %v10273_v48 = vld [vmem:[%s12789_s18 + $0x90] sm:$0xff] }
0x22d2   :  { %v8957_v51 = vmul.f32 0.03125, %v8947_v59 }
0x22d3   :  { %v8962_v54 = vsub.f32 %v13267_v40, %v8958_v43  ;;  %v10274_v43 = vld [vmem:[%s12789_s18 + $0x98] sm:$0xff] }
0x22d4   :  { %v8961_v55 = vsub.f32 %v13269_v44, %v8957_v51  ;;  %v8956_v60 = vpop.xlane.xlu1 %8955  ;;  %v11858_v59 = vpack.c.bf16 %v10274_v43, %v10273_v48  ;;  %v10275_v51 = vld [vmem:[%s12789_s18 + $0xa0] sm:$0xff] }
0x22d5   :  { %v8960_v61 = vmul.f32 0.03125, %v8956_v60  ;;  %v8953_v63 = vpop.xlane.xlu0 %8952  ;;  %v8966_v46 = vmul.f32 %v8962_v54, %v8962_v54  ;;  %v10277_v60 = vld [vmem:[%s12789_s18 + $0xb0] sm:$0xff] }
0x22d6   :  { %v8959_v0 = vmul.f32 0.03125, %v8953_v63  ;;  %v8965_v52 = vmul.f32 %v8961_v55, %v8961_v55  ;;  %11859 = vmatprep.subr.bf16.mxu1 %v11858_v59 }
0x22d7   :  { %v8964_v1 = vsub.f32 %v13277_v11, %v8960_v61  ;;  %v8972_v2 = vsel %vm140_vm0, %v8966_v46, 0.0  ;;  %11861 = vmatpush3.bf16.msra.mxu1 %v11858_v59  ;;  %v10278_v61 = vld [vmem:[%s12789_s18 + $0xb8] sm:$0xff]  ;;  %v10279_v46 = vld [vmem:[%s12789_s18 + $0xc0] sm:$0xff] }
0x22d8   :  { %v8963_v3 = vsub.f32 %v13279_v16, %v8959_v0  ;;  %8973 = vadd.xlane.f32.xlu1 %v8972_v2  ;;  %v8969_v37 = vsel %vm140_vm0, %v8965_v52, 0.0  ;;  %v11866_v63 = vpack.c.bf16 %v10278_v61, %v10277_v60  ;;  %v10280_v0 = vld [vmem:[%s12789_s18 + $0xc8] sm:$0xff]  ;;  %v10282_v2 = vld [vmem:[%s12789_s18 + $0xd8] sm:$0xff] }
0x22d9   :  { %8970 = vadd.xlane.f32.xlu0 %v8969_v37  ;;  %v8968_v56 = vmul.f32 %v8964_v1, %v8964_v1  ;;  %v11870_v52 = vpack.c.bf16 %v10280_v0, %v10279_v46  ;;  %v10283_v37 = vld [vmem:[%s12789_s18 + $0xe0] sm:$0xff] }
0x22da   :  { %v8967_v4 = vmul.f32 %v8963_v3, %v8963_v3 }
0x22db   :  { %v8978_v9 = vsel %vm140_vm0, %v8968_v56, 0.0  ;;  %v10284_v56 = vld [vmem:[%s12789_s18 + $0xe8] sm:$0xff] }
0x22dc   :  { %8979 = vadd.xlane.f32.xlu1 %v8978_v9  ;;  %v8975_v10 = vsel %vm140_vm0, %v8967_v4, 0.0  ;;  %v11878_v4 = vpack.c.bf16 %v10284_v56, %v10283_v37  ;;  %v10285_v9 = vld [vmem:[%s12789_s18 + $0xf0] sm:$0xff] }
0x22dd   :  { %8976 = vadd.xlane.f32.xlu0 %v8975_v10  ;;  %v10286_v10 = vld [vmem:[%s12789_s18 + $0xf8] sm:$0xff] }
0x22de   :  { %v11882_v17 = vpack.c.bf16 %v10286_v10, %v10285_v9 }
0x2365   :  { %v8974_v26 = vpop.xlane.xlu1 %8973 }
0x2366   :  { %v8982_v7 = vmul.f32 0.03125, %v8974_v26  ;;  %v8971_v27 = vpop.xlane.xlu0 %8970 }
0x2367   :  { %v8981_v22 = vmul.f32 0.03125, %v8971_v27 }
0x2368   :  { %v8986_v28 = vadd.f32 1e-05, %v8982_v7 }
0x2369   :  { %v8985_v20 = vadd.f32 1e-05, %v8981_v22  ;;  %v8980_v13 = vpop.xlane.xlu1 %8979 }
0x236a   :  { %12141 = vrsqrt.f32 %v8986_v28  ;;  %v8984_v21 = vmul.f32 0.03125, %v8980_v13  ;;  %v8977_v31 = vpop.xlane.xlu0 %8976 }
0x236b   :  { %12143 = vrsqrt.f32 %v8985_v20  ;;  %v8983_v29 = vmul.f32 0.03125, %v8977_v31 }
0x236c   :  { %v8988_v57 = vadd.f32 1e-05, %v8984_v21 }
0x236d   :  { %v8987_v32 = vadd.f32 1e-05, %v8983_v29 }
0x236e   :  { %12145 = vrsqrt.f32 %v8988_v57 }
0x236f   :  { %12147 = vrsqrt.f32 %v8987_v32 }
0x2374   :  { %v12142_v30 = vpop.eup %12141 }
0x2375   :  { %v12144_v33 = vpop.eup %12143  ;;  %v8994_v34 = vmul.f32 %v12142_v30, %v8962_v54  ;;  %v10276_v54 = vld [vmem:[%s12789_s18 + $0xa8] sm:$0xff] }
0x2376   :  { %v8993_v14 = vmul.f32 %v12144_v33, %v8961_v55  ;;  %v11862_v55 = vpack.c.bf16 %v10276_v54, %v10275_v51 }
0x2377   :  { %v9004_v35 = vmul.f32 %v10259_v19, %v8994_v34 }
0x2378   :  { %v12146_v36 = vpop.eup %12145  ;;  %v9003_v38 = vmul.f32 %v10259_v19, %v8993_v14  ;;  %11863 = vmatprep.subr.bf16.mxu1 %v11862_v55 }
0x2379   :  { %v12148_v41 = vpop.eup %12147  ;;  %v8996_v6 = vmul.f32 %v12146_v36, %v8964_v1  ;;  %v9014_v45 = vadd.f32 %v10260_v62, %v9004_v35  ;;  %11865 = vmatpush3.bf16.msra.mxu1 %v11862_v55  ;;  %v10281_v1 = vld [vmem:[%s12789_s18 + $0xd0] sm:$0xff]  ;;  %s9878_s18 = sld [smem:[%s13431_s0 + %s12211_s12]]  }
0x237a   :  { %v9013_v8 = vadd.f32 %v10260_v62, %v9003_v38  ;;  %v8995_v39 = vmul.f32 %v12148_v41, %v8963_v3  ;;  %11867 = vmatprep.subr.bf16.mxu1 %v11866_v63  ;;  %v11874_v3 = vpack.c.bf16 %v10282_v2, %v10281_v1 }
0x237b   :  { %v9006_v42 = vmul.f32 %v10259_v19, %v8996_v6 }
0x237c   :  { %11519 = vmatprep.mubr.msk.f32.mxu0 %vm140_vm0, %v9013_v8  ;;  %v9005_v47 = vmul.f32 %v10259_v19, %v8995_v39 }
0x237d   :  { %11520 = vmatmul.mubr.msk.f32.vlgmr.msra.gmra.mrb[114].mxu0 %vm140_vm0, %v9014_v45  ;;  %v9016_v49 = vadd.f32 %v10260_v62, %v9006_v42  ;;  %11869 = vmatpush3.bf16.msra.mxu1 %v11866_v63 }
0x237e   :  { %v9015_v50 = vadd.f32 %v10260_v62, %v9005_v47  ;;  %11871 = vmatprep.subr.bf16.mxu1 %v11870_v52 }
0x2380   :  { %11522 = vmatprep.mubr.msk.f32.mxu0 %vm140_vm0, %v9015_v50 }
0x2381   :  { %11523 = vmatmul.mubr.msk.f32.gmra.mrb[116].mxu0 %vm140_vm0, %v9016_v49  ;;  %11873 = vmatpush3.bf16.msra.mxu1 %v11870_v52  ;;  %v10288_v49 = vld [vmem:[%s12819_s1 + $0x1] ss:$0 sm:$0xff]  ;;  %s9875_s1 = sld [smem:[%s13431_s0 + %s12213_s26]]  }
0x2382   :  { %11571 = vmatprep.mubr.msk.f32.mxu0 %vm12185_vm1, %v12184_v12  ;;  %11875 = vmatprep.subr.bf16.mxu1 %v11874_v3 }
0x2385   :  { %11877 = vmatpush3.bf16.msra.mxu1 %v11874_v3 }
0x2386   :  { %11879 = vmatprep.subr.bf16.mxu1 %v11878_v4 }
0x2389   :  { %11881 = vmatpush3.bf16.msra.mxu1 %v11878_v4 }
0x238a   :  { %11883 = vmatprep.subr.bf16.mxu1 %v11882_v17 }
0x238d   :  { %11885 = vmatpush3.bf16.msra.mxu1 %v11882_v17 }
0x2450   :  { %v11521_v58 = vpop.f32.mrb[114].mxu0 }
0x2451   :  { %v9114_v5 = vadd.f32 %v11521_v58, %v10266_v18  ;;  %v9108_v23 = vpop.f32.mrb[115].mxu0 }
0x2452   :  { %v9109_v25 = vadd.f32 %v10266_v18, %v9108_v23 }
0x2453   :  { %v9128_v26 = vmul.f32 -1.702, %v9114_v5 }
0x2454   :  { %v9127_v7 = vmul.f32 -1.702, %v9109_v25  ;;  %v11524_v27 = vpop.f32.mrb[116].mxu0 }
0x2455   :  { %v9133_v22 = vmul.f32 1.442695, %v9128_v26  ;;  %v9124_v28 = vadd.f32 %v11524_v27, %v10266_v18  ;;  %v9118_v20 = vpop.f32.mrb[117].mxu0  ;;  %v9344_v27 = vlaneseq }
0x2456   :  { %v9131_v13 = vmul.f32 1.442695, %v9127_v7  ;;  %v9119_v21 = vadd.f32 %v10266_v18, %v9118_v20  ;;  %v9343_v20 = vld [vmem:[%s9848_s21] sm:$0xf]  ;;  %s9879_s21 = sld [smem:[%s13431_s0 + %s12214_s9]]  }
0x2457   :  { %12149 = vpow2.f32 %v9133_v22  ;;  %v9130_v31 = vmul.f32 -1.702, %v9124_v28  ;;  %v9345_v22 = vshrl.u32 %v9344_v27, 7 }
0x2458   :  { %12151 = vpow2.f32 %v9131_v13  ;;  %v9129_v29 = vmul.f32 -1.702, %v9119_v21 }
0x2459   :  { %v9137_v57 = vmul.f32 1.442695, %v9130_v31  ;;  %v9346_v31 = vsub.s32 0, %v9345_v22 }
0x245a   :  { %v9135_v32 = vmul.f32 1.442695, %v9129_v29 }
0x245b   :  { %12153 = vpow2.f32 %v9137_v57  ;;  %v9367_v57 = vsub.s32 3, %v9345_v22 }
0x245c   :  { %12155 = vpow2.f32 %v9135_v32  ;;  %v9347_v32 = vrot.slane %v9343_v20, %v9346_v31 }
0x2461   :  { %v12150_v30 = vpop.eup %12149 }
0x2462   :  { %v12152_v19 = vpop.eup %12151  ;;  %v9140_v33 = vadd.f32 1.0, %v12150_v30  ;;  %v9368_v30 = vrot.slane %v9343_v20, %v9367_v57 }
0x2463   :  { %v9139_v34 = vadd.f32 1.0, %v12152_v19  ;;  %v9417_v19 = vld [vmem:[%s9867_s8] sm:$0xff] }
0x2464   :  { %12157 = vrcp.f32 %v9140_v33  ;;  %v9418_v33 = vld [vmem:[%s9867_s8 + $0x8] sm:$0xff] }
0x2465   :  { %v12154_v14 = vpop.eup %12153  ;;  %12159 = vrcp.f32 %v9139_v34  ;;  %v11887_v34 = vpack.c.bf16 %v9418_v33, %v9417_v19 }
0x2466   :  { %v12156_v62 = vpop.eup %12155  ;;  %v9142_v35 = vadd.f32 1.0, %v12154_v14  ;;  %v12200_v14 = vmov 0.0|0.0  }
0x2467   :  { %v9141_v36 = vadd.f32 1.0, %v12156_v62  ;;  %11886 = vmatprep.subr.bf16.mxu0 %v12200_v14  ;;  %11907 = vmatprep.subr.bf16.mxu1 %v12200_v14  ;;  %v9419_v62 = vld [vmem:[%s9867_s8 + $0x10] sm:$0xff] }
0x2468   :  { %12161 = vrcp.f32 %v9142_v35  ;;  %11888 = vmatpush3.bf16.msra.mxu0 %v11887_v34  ;;  %v9420_v35 = vld [vmem:[%s9867_s8 + $0x18] sm:$0xff] }
0x2469   :  { %12163 = vrcp.f32 %v9141_v36  ;;  %11889 = vmatprep.subr.bf16.mxu0 %v12200_v14  ;;  %v11890_v36 = vpack.c.bf16 %v9420_v35, %v9419_v62 }
0x246c   :  { %11891 = vmatpush3.bf16.msra.mxu0 %v11890_v36 }
0x246d   :  { %11892 = vmatprep.subr.bf16.mxu0 %v12200_v14 }
0x246e   :  { %v12158_v38 = vpop.eup %12157 }
0x246f   :  { %v12160_v41 = vpop.eup %12159  ;;  %v9146_v8 = vmul.f32 %v12158_v38, %v9114_v5 }
0x2470   :  { %v9144_v6 = vmul.f32 %v12160_v41, %v9109_v25 }
0x2472   :  { %v12162_v39 = vpop.eup %12161  ;;  %11557 = vmatprep.mubr.f32.mxu1 %v9144_v6 }
0x2473   :  { %v12164_v45 = vpop.eup %12163  ;;  %11558 = vmatmul.mubr.f32.vlgmr.msra.gmra.mrb[126].mxu1 %v9146_v8  ;;  %v9150_v47 = vmul.f32 %v12162_v39, %v9124_v28  ;;  %v9353_v28 = vsub.s32 1, %v9345_v22 }
0x2474   :  { %v9148_v42 = vmul.f32 %v12164_v45, %v9119_v21  ;;  %v9360_v21 = vsub.s32 2, %v9345_v22 }
0x2475   :  { %v9354_v13 = vrot.slane %v9343_v20, %v9353_v28 }
0x2476   :  { %11560 = vmatprep.mubr.f32.mxu1 %v9148_v42  ;;  %v9361_v29 = vrot.slane %v9343_v20, %v9360_v21 }
0x2477   :  { %11561 = vmatmul.mubr.f32.gmra.mrb[128].mxu1 %v9150_v47 }
0x2478   :  { %11611 = vmatprep.mubr.msk.f32.mxu1 %vm12185_vm1, %v12184_v12 }
0x2546   :  { %v11559_v50 = vpop.f32.mrb[126].mxu1 }
0x2547   :  { %v9254_v15 = vadd.f32 %v11559_v50, %v13267_v40  ;;  %v9234_v53 = vpop.f32.mrb[127].mxu1 }
0x2548   :  { %v9253_v24 = vadd.f32 %v9234_v53, %v13269_v44 }
0x2549   :  { %v9266_v48 = vadd.f32 %v10288_v49, %v9254_v15 }
0x254a   :  { %v11562_v43 = vpop.f32.mrb[128].mxu1  ;;  %v9265_v59 = vadd.f32 %v10288_v49, %v9253_v24 }
0x254b   :  { %v9256_v51 = vadd.f32 %v11562_v43, %v13277_v11  ;;  %v9244_v54 = vpop.f32.mrb[129].mxu1  ;;  %v9274_v55 = vsel %vm140_vm0, %v9266_v48, 0.0  ;;  %v10289_v43 = vld [vmem:[%s9865_s28] ss:$0 sm:$0xff] }
0x254c   :  { %v9255_v60 = vadd.f32 %v9244_v54, %v13279_v16  ;;  %9275 = vadd.xlane.f32.xlu1 %v9274_v55  ;;  %v9271_v61 = vsel %vm140_vm0, %v9265_v59, 0.0  ;;  %v10290_v54 = vld [vmem:[%s9866_s7] ss:$0 sm:$0xff] }
0x254d   :  { %v9268_v63 = vadd.f32 %v10288_v49, %v9256_v51  ;;  %9272 = vadd.xlane.f32.xlu0 %v9271_v61 }
0x254e   :  { %v9267_v46 = vadd.f32 %v10288_v49, %v9255_v60 }
0x254f   :  { %v9280_v40 = vsel %vm140_vm0, %v9268_v63, 0.0 }
0x2550   :  { %9281 = vadd.xlane.f32.xlu1 %v9280_v40  ;;  %v9277_v44 = vsel %vm140_vm0, %v9267_v46, 0.0 }
0x2551   :  { %9278 = vadd.xlane.f32.xlu0 %v9277_v44 }
0x25d9   :  { %v9276_v0 = vpop.xlane.xlu1 %9275 }
0x25da   :  { %v9284_v52 = vmul.f32 0.03125, %v9276_v0  ;;  %v9273_v11 = vpop.xlane.xlu0 %9272 }
0x25db   :  { %v9283_v1 = vmul.f32 0.03125, %v9273_v11 }
0x25dc   :  { %v13333_v2 = vsub.f32 %v9266_v48, %v9284_v52 }
0x25dd   :  { %v13335_v3 = vsub.f32 %v9265_v59, %v9283_v1  ;;  %v9282_v16 = vpop.xlane.xlu1 %9281 }
0x25de   :  { %v9286_v37 = vmul.f32 0.03125, %v9282_v16  ;;  %v9279_v56 = vpop.xlane.xlu0 %9278  ;;  %v9292_v4 = vmul.f32 %v13333_v2, %v13333_v2 }
0x25df   :  { %v9285_v9 = vmul.f32 0.03125, %v9279_v56  ;;  %v9291_v10 = vmul.f32 %v13335_v3, %v13335_v3 }
0x25e0   :  { %v13341_v17 = vsub.f32 %v9268_v63, %v9286_v37  ;;  %v9298_v18 = vsel %vm140_vm0, %v9292_v4, 0.0 }
0x25e1   :  { %v13344_v58 = vsub.f32 %v9267_v46, %v9285_v9  ;;  %9299 = vadd.xlane.f32.xlu1 %v9298_v18  ;;  %v9295_v5 = vsel %vm140_vm0, %v9291_v10, 0.0 }
0x25e2   :  { %9296 = vadd.xlane.f32.xlu0 %v9295_v5  ;;  %v9294_v23 = vmul.f32 %v13341_v17, %v13341_v17 }
0x25e3   :  { %v9293_v25 = vmul.f32 %v13344_v58, %v13344_v58 }
0x25e4   :  { %v9304_v26 = vsel %vm140_vm0, %v9294_v23, 0.0 }
0x25e5   :  { %9305 = vadd.xlane.f32.xlu1 %v9304_v26  ;;  %v9301_v7 = vsel %vm140_vm0, %v9293_v25, 0.0 }
0x25e6   :  { %9302 = vadd.xlane.f32.xlu0 %v9301_v7 }
0x25f6   :  { %9356 = vbcast.lane.b32.xlu1 %v9354_v13, 256 }
0x25fa   :  { %9363 = vbcast.lane.b32.xlu1 %v9361_v29, 256 }
0x25fc   :  { %9349 = vbcast.lane.b32.xlu0 %v9347_v32, 256 }
0x25fe   :  { %9370 = vbcast.lane.b32.xlu1 %v9368_v30, 256 }
0x266e   :  { %v9300_v38 = vpop.xlane.xlu1 %9299 }
0x266f   :  { %v9308_v41 = vmul.f32 0.03125, %v9300_v38  ;;  %v9297_v6 = vpop.xlane.xlu0 %9296 }
0x2670   :  { %v9307_v8 = vmul.f32 0.03125, %v9297_v6  ;;  %v9495_v6 = vld [vmem:[%s9868_s15] sm:$0xff] }
0x2671   :  { %v9312_v39 = vadd.f32 1e-05, %v9308_v41 }
0x2672   :  { %v9311_v45 = vadd.f32 1e-05, %v9307_v8  ;;  %v9306_v42 = vpop.xlane.xlu1 %9305  ;;  %v9496_v8 = vld [vmem:[%s9868_s15 + $0x8] sm:$0xff] }
0x2673   :  { %12165 = vrsqrt.f32 %v9312_v39  ;;  %v9310_v47 = vmul.f32 0.03125, %v9306_v42  ;;  %v9303_v50 = vpop.xlane.xlu0 %9302 }
0x2674   :  { %12167 = vrsqrt.f32 %v9311_v45  ;;  %v9309_v49 = vmul.f32 0.03125, %v9303_v50 }
0x2675   :  { %v9314_v15 = vadd.f32 1e-05, %v9310_v47  ;;  %v11893_v47 = vpack.c.bf16 %v9496_v8, %v9495_v6 }
0x2676   :  { %v9313_v53 = vadd.f32 1e-05, %v9309_v49  ;;  %v9357_v24 = vpop.permute.xlu1 %9356  ;;  %v9497_v49 = vld [vmem:[%s9868_s15 + $0x10] sm:$0xff] }
0x2677   :  { %12169 = vrsqrt.f32 %v9314_v15  ;;  %v9350_v0 = vpop.permute.xlu0 %9349  ;;  %v9498_v15 = vld [vmem:[%s9868_s15 + $0x18] sm:$0xff] }
0x2678   :  { %12171 = vrsqrt.f32 %v9313_v53 }
0x267a   :  { %v9364_v55 = vpop.permute.xlu1 %9363 }
0x267d   :  { %v12166_v48 = vpop.eup %12165 }
0x267e   :  { %v12168_v59 = vpop.eup %12167  ;;  %v9320_v51 = vmul.f32 %v12166_v48, %v13333_v2  ;;  %v9371_v2 = vpop.permute.xlu1 %9370  ;;  %v9500_v48 = vld [vmem:[%s9870_s27] sm:$0xff] }
0x267f   :  { %v9319_v60 = vmul.f32 %v12168_v59, %v13335_v3 }
0x2680   :  { %v9330_v61 = vmul.f32 %v10289_v43, %v9320_v51  ;;  %v9502_v51 = vld [vmem:[%s9870_s27 + $0x10] sm:$0xff] }
0x2681   :  { %v12170_v63 = vpop.eup %12169  ;;  %v9329_v46 = vmul.f32 %v10289_v43, %v9319_v60 }
0x2682   :  { %v12172_v40 = vpop.eup %12171  ;;  %v9340_v44 = vadd.f32 %v10290_v54, %v9330_v61  ;;  %v9322_v52 = vmul.f32 %v12170_v63, %v13341_v17  ;;  %v10292_v63 = vld [vmem:[%s9869_s29] ss:$0 sm:$0xff] }
0x2683   :  { %v9321_v11 = vmul.f32 %v12172_v40, %v13344_v58  ;;  %v9339_v1 = vadd.f32 %v10290_v54, %v9329_v46 }
0x2684   :  { %v9373_v16 = vmul.f32 %v9357_v24, %v9340_v44  ;;  %v9332_v37 = vmul.f32 %v10289_v43, %v9322_v52  ;;  %v11896_v24 = vpack.c.bf16 %v9498_v15, %v9497_v49  ;;  %v9505_v52 = vld [vmem:[%s9872_s19] sm:$0xff] }
0x2685   :  { %v9331_v56 = vmul.f32 %v10289_v43, %v9321_v11  ;;  %v9372_v4 = vmul.f32 %v9350_v0, %v9339_v1  ;;  %v9501_v43 = vld [vmem:[%s9870_s27 + $0x8] sm:$0xff] }
0x2686   :  { %v9383_v9 = vsel %vm140_vm0, %v9373_v16, 0.0  ;;  %v9342_v10 = vadd.f32 %v10290_v54, %v9332_v37  ;;  %v11899_v59 = vpack.c.bf16 %v9501_v43, %v9500_v48  ;;  %v9506_v11 = vld [vmem:[%s9872_s19 + $0x8] sm:$0xff]  ;;  %v9508_v16 = vld [vmem:[%s9874_s4] sm:$0xff] }
0x2687   :  { %v9384_v3 = vrot.slane %v9383_v9, 4  ;;  %v9341_v18 = vadd.f32 %v10290_v54, %v9331_v56  ;;  %v9376_v5 = vsel %vm140_vm0, %v9372_v4, 0.0  ;;  %v9503_v54 = vld [vmem:[%s9870_s27 + $0x18] sm:$0xff]  ;;  %v11905_v1 = vpack.c.bf16 %v9506_v11, %v9505_v52  ;;  %v9509_v37 = vld [vmem:[%s9874_s4 + $0x8] sm:$0xff] }
0x2688   :  { %v9377_v23 = vrot.slane %v9376_v5, 4  ;;  %v9375_v25 = vmul.f32 %v9371_v2, %v9342_v10  ;;  %v11908_v56 = vpack.c.bf16 %v9509_v37, %v9508_v16  ;;  %v9510_v10 = vld [vmem:[%s9874_s4 + $0x10] sm:$0xff] }
0x2689   :  { %v9385_v26 = vadd.f32 %v9384_v3, %v9383_v9  ;;  %v9374_v7 = vmul.f32 %v9364_v55, %v9341_v18  ;;  %v11902_v55 = vpack.c.bf16 %v9503_v54, %v9502_v51  ;;  %v10296_v18 = vld [vmem:[%s9873_s5] ss:$0 sm:$0xff] }
0x268a   :  { %v9378_v17 = vadd.f32 %v9377_v23, %v9376_v5  ;;  %v9397_v58 = vsel %vm140_vm0, %v9375_v25, 0.0  ;;  %11909 = vmatpush3.bf16.msra.mxu1 %v11908_v56 }
0x268b   :  { %v9386_v27 = vrot.slane %v9385_v26, 2  ;;  %v9390_v22 = vsel %vm140_vm0, %v9374_v7, 0.0  ;;  %v9398_v28 = vrot.slane %v9397_v58, 4  ;;  %11910 = vmatprep.subr.bf16.mxu1 %v12200_v14  ;;  %v10298_v7 = vld [vmem:[%s9875_s1] ss:$0 sm:$0xff] }
0x268c   :  { %v9391_v20 = vrot.slane %v9390_v22, 4  ;;  %v9379_v13 = vrot.slane %v9378_v17, 2 }
0x268d   :  { %v9387_v21 = vadd.f32 %v9386_v27, %v9385_v26  ;;  %v9399_v31 = vadd.f32 %v9398_v28, %v9397_v58 }
0x268e   :  { %v9392_v29 = vadd.f32 %v9391_v20, %v9390_v22  ;;  %v9380_v57 = vadd.f32 %v9379_v13, %v9378_v17 }
0x268f   :  { %v9388_v32 = vrot.slane %v9387_v21, 1  ;;  %v9400_v30 = vrot.slane %v9399_v31, 2 }
0x2690   :  { %v9393_v19 = vrot.slane %v9392_v29, 2  ;;  %v9381_v33 = vrot.slane %v9380_v57, 1 }
0x2691   :  { %v9401_v34 = vadd.f32 %v9400_v30, %v9399_v31  ;;  %v9389_v35 = vadd.f32 %v9388_v32, %v9387_v21 }
0x2692   :  { %v9394_v62 = vadd.f32 %v9393_v19, %v9392_v29  ;;  %v9382_v36 = vadd.f32 %v9381_v33, %v9380_v57 }
0x2693   :  { %v9402_v38 = vrot.slane %v9401_v34, 1 }
0x2694   :  { %v9395_v41 = vrot.slane %v9394_v62, 1  ;;  %v9409_v45 = vsel %vm9408_vm3, %v9389_v35, %v9382_v36 }
0x2695   :  { %v9403_v42 = vadd.f32 %v9402_v38, %v9401_v34 }
0x2696   :  { %v9396_v39 = vadd.f32 %v9395_v41, %v9394_v62 }
0x2698   :  { %v9411_v50 = vsel %vm9410_vm4, %v9396_v39, %v9409_v45 }
0x2699   :  { %v9413_v53 = vsel %vm9412_vm5, %v9403_v42, %v9411_v50 }
0x269a   :  { %9416 = vst.msk [vmem:[%s9876_s22] sm:$0xf] %vm9415_vm6, %v9413_v53  ;;  %11572 = vmatmul.mubr.msk.f32.vlgmr.msra.gmra.mrb[118].mxu0 %vm140_vm0, %v9413_v53 }
0x269b   :  { %11894 = vmatpush3.bf16.msra.mxu0 %v11893_v47  ;;  %11582 = vmatprep.mubr.msk.f32.mxu0 %vm12185_vm1, %v12184_v12 }
0x269c   :  { %11895 = vmatprep.subr.bf16.mxu0 %v12200_v14 }
0x269f   :  { %11897 = vmatpush3.bf16.msra.mxu0 %v11896_v24 }
0x26a0   :  { %11898 = vmatprep.subr.bf16.mxu0 %v12200_v14 }
0x26a2   :  { %11583 = vmatmul.mubr.msk.f32.vlgmr.msra.gmra.mrb[120].mxu0 %vm140_vm0, %v9413_v53 }
0x26a3   :  { %11593 = vmatprep.mubr.msk.f32.mxu0 %vm12185_vm1, %v12184_v12  ;;  %11900 = vmatpush3.bf16.msra.mxu0 %v11899_v59 }
0x26a4   :  { %11901 = vmatprep.subr.bf16.mxu0 %v12200_v14 }
0x26a7   :  { %11903 = vmatpush3.bf16.msra.mxu0 %v11902_v55 }
0x26a8   :  { %11904 = vmatprep.subr.bf16.mxu0 %v12200_v14  ;;  %v9511_v14 = vld [vmem:[%s9874_s4 + $0x18] sm:$0xff] }
0x26a9   :  { %v11911_v3 = vpack.c.bf16 %v9511_v14, %v9510_v10 }
0x26ab   :  { %11912 = vmatpush3.bf16.msra.mxu1 %v11911_v3 }
0x276d   :  { %v9489_v60 = vpop.f32.mrb[118].mxu0 }
0x276e   :  { %9494 = vst.msk [vmem:[%s9877_s13] sm:$0xf] %vm9493_vm7, %v9489_v60  ;;  %v11573_v61 = vpop.f32.mrb[119].mxu0 }
0x2775   :  { %v9585_v46 = vpop.f32.mrb[120].mxu0 }
0x2776   :  { %v9586_v40 = vadd.f32 %v10292_v63, %v9585_v46  ;;  %v11584_v44 = vpop.f32.mrb[121].mxu0 }
0x2778   :  { %v9589_v0 = vmax.f32 %v9586_v40, 0.0 }
0x277a   :  { %11594 = vmatmul.mubr.msk.f32.vlgmr.msra.gmra.mrb[122].mxu0 %vm140_vm0, %v9589_v0 }
0x277b   :  { %11600 = vmatprep.mubr.msk.f32.mxu0 %vm12185_vm1, %v12184_v12  ;;  %11906 = vmatpush3.bf16.msra.mxu0 %v11905_v1  ;;  %v10294_v12 = vld [vmem:[%s9871_s11] ss:$0 sm:$0xff] }
0x284d   :  { %v9665_v4 = vpop.f32.mrb[122].mxu0 }
0x284e   :  { %v9666_v2 = vadd.f32 %v10294_v12, %v9665_v4  ;;  %v11595_v9 = vpop.f32.mrb[123].mxu0 }
0x2850   :  { %9829 = vst.msk [vmem:[%s9878_s18] sm:$0xf] %vm9493_vm7, %v9666_v2  ;;  %11601 = vmatmul.mubr.msk.f32.vlgmr.msra.gmra.mrb[124].mxu0 %vm9675_vm8, %v9666_v2 }
0x2923   :  { %v9745_v5 = vpop.f32.mrb[124].mxu0 }
0x2924   :  { %v9746_v23 = vadd.f32 %v10296_v18, %v9745_v5  ;;  %v11602_v25 = vpop.f32.mrb[125].mxu0 }
0x2926   :  { %v9749_v26 = vmax.f32 %v9746_v23, 0.0 }
0x2928   :  { %11612 = vmatmul.mubr.msk.f32.vlgmr.msra.gmra.mrb[130].mxu1 %vm140_vm0, %v9749_v26 }
0x29fb   :  { %v9825_v17 = vpop.f32.mrb[130].mxu1 }
0x29fc   :  { %v9826_v58 = vadd.f32 %v10298_v7, %v9825_v17  ;;  %v11613_v27 = vpop.f32.mrb[131].mxu1 }
0x29fe   :  { %9830 = vst.msk [vmem:[%s9879_s21] sm:$0xf] %vm9493_vm7, %v9826_v58 }

</bundles_post_ra>
